<compile_context>
chip_gen: v7x
topology: tpu7x:2x2x1
jax: 0.10.0
libtpu: 0.0.40
codegen_flags: <defaults>
</compile_context>

<pallas_src>
import functools
import math

import jax
import jax.numpy as jnp
from jax import lax
from jax.experimental import pallas as pl
from jax.experimental.pallas import tpu as pltpu


_VMEM_LIMIT_BYTES = 32 * 1024 * 1024   # safe on v5e/v6e (128 MiB) and v7x (64 MiB)


def _cparams():
    return pltpu.CompilerParams(dimension_semantics=("parallel",),
                                vmem_limit_bytes=_VMEM_LIMIT_BYTES)


def _row_tile(M, max_rows=512):
    """Largest row tile <= max_rows that is a multiple of 8 and divides M."""
    if M <= max_rows:
        return M
    t = max_rows - (max_rows % 8)
    while t >= 8:
        if M % t == 0:
            return t
        t -= 8
    return M


def _batch_tile(B, cap=8):
    """Batch tile giving >=2 grid blocks when possible (2 TCs on v7x)."""
    if B <= 1:
        return B
    limit = max(1, min(cap, B // 2))
    for t in range(limit, 0, -1):
        if B % t == 0:
            return t
    return 1


# -----------------------------------------------------------------------------
# Conv 3x3 'same' + LeakyReLU
#   Width taps folded into a banded weight at init -> three full-row matmuls.
# -----------------------------------------------------------------------------
def _conv3x3_lrelu_kernel(xp_ref, w_ref, b_ref, o_ref, *, H, W, Cin, Cout):
    # xp_ref: (tile_b, H+2, (W+2)*Cin) f32   padded NHWC rows, (width,ch) merged
    # w_ref : (3, (W+2)*Cin, W*Cout)   bf16  per-ky banded (width-folded) weight
    # b_ref : (1, W*Cout)              f32
    # o_ref : (tile_b, H, W*Cout)      f32
    tile_b = xp_ref.shape[0]
    for bi in range(tile_b):
        img = xp_ref[bi].astype(jnp.bfloat16)              # (H+2, (W+2)*Cin)
        acc = jnp.zeros((H, W * Cout), jnp.float32)
        for ky in range(3):
            acc = acc + jnp.dot(img[ky:ky + H, :], w_ref[ky],
                                preferred_element_type=jnp.float32)
        y = acc + b_ref[...]
        o_ref[bi] = jnp.where(y >= 0.0, y, 0.01 * y).astype(o_ref.dtype)


def pallas_conv3x3_lrelu(x_nhwc, bigw, bias_row):
    """Conv2d(kernel=3, padding='same') + LeakyReLU(0.01) on NHWC input."""
    B, H, W, Cin = x_nhwc.shape
    Cout = bigw.shape[-1] // W
    assert bigw.shape == (3, (W + 2) * Cin, W * Cout), bigw.shape

    xp = jnp.pad(x_nhwc, ((0, 0), (1, 1), (1, 1), (0, 0)))
    xp = xp.reshape(B, H + 2, (W + 2) * Cin)               # free XLA reshape
    tile_b = _batch_tile(B)

    out = pl.pallas_call(
        functools.partial(_conv3x3_lrelu_kernel, H=H, W=W, Cin=Cin, Cout=Cout),
        out_shape=jax.ShapeDtypeStruct((B, H, W * Cout), jnp.float32),
        grid=(B // tile_b,),
        in_specs=[
            pl.BlockSpec((tile_b, H + 2, (W + 2) * Cin), lambda i: (i, 0, 0)),
            pl.BlockSpec((3, (W + 2) * Cin, W * Cout), lambda i: (0, 0, 0)),
            pl.BlockSpec((1, W * Cout), lambda i: (0, 0)),
        ],
        out_specs=pl.BlockSpec((tile_b, H, W * Cout), lambda i: (i, 0, 0)),
        compiler_params=_cparams(),
    )(xp, bigw, jnp.tile(bias_row, (1, W)))
    return out.reshape(B, H, W, Cout)


# -----------------------------------------------------------------------------
# Linear (bf16 MXU operands, f32 accumulation, full weight resident in VMEM)
# -----------------------------------------------------------------------------
def _linear_kernel(x_ref, w_ref, b_ref, o_ref):
    y = jnp.dot(x_ref[...].astype(jnp.bfloat16), w_ref[...],
                preferred_element_type=jnp.float32)
    o_ref[...] = y + b_ref[...]


def pallas_linear(x, w_bf16, b_row):
    M, K = x.shape
    K2, N = w_bf16.shape
    assert K == K2
    tile_m = _row_tile(M)
    return pl.pallas_call(
        _linear_kernel,
        out_shape=jax.ShapeDtypeStruct((M, N), jnp.float32),
        grid=(M // tile_m,),
        in_specs=[
            pl.BlockSpec((tile_m, K), lambda i: (i, 0)),
            pl.BlockSpec((K, N), lambda i: (0, 0)),
            pl.BlockSpec((1, N), lambda i: (0, 0)),
        ],
        out_specs=pl.BlockSpec((tile_m, N), lambda i: (i, 0)),
        compiler_params=_cparams(),
    )(x, w_bf16, b_row)


# -----------------------------------------------------------------------------
# Fused transformer encoder stack + action head (one pallas_call, grid = seqs)
# -----------------------------------------------------------------------------
def _transformer_head_kernel(x_ref, wqkv_ref, bqkv_ref, wo_ref, bo_ref,
                             ln1g_ref, ln1b_ref, wff1_ref, bff1_ref,
                             wff2_ref, bff2_ref, ln2g_ref, ln2b_ref,
                             wact_ref, bact_ref, logits_ref,
                             *, num_layers, num_heads, eps):
    _, T, D = x_ref.shape
    Dh = D // num_heads
    scale = 1.0 / math.sqrt(Dh)
    bf16 = jnp.bfloat16

    # causal additive mask: torch.triu(ones, diagonal=1) -> -inf (use -1e30)
    row = lax.broadcasted_iota(jnp.int32, (T, T), 0)
    col = lax.broadcasted_iota(jnp.int32, (T, T), 1)
    neg_mask = jnp.where(col > row, -1e30, 0.0).astype(jnp.float32)

    def layer_norm(h, g, b):                       # PyTorch LN (biased var)
        mu = jnp.mean(h, axis=-1, keepdims=True)
        var = jnp.mean((h - mu) * (h - mu), axis=-1, keepdims=True)
        return (h - mu) * lax.rsqrt(var + eps) * g + b

    x = x_ref[0].astype(jnp.float32)                               # (T, D)

    for l in range(num_layers):                    # post-LN encoder layers
        qkv = jnp.dot(x.astype(bf16), wqkv_ref[l],
                      preferred_element_type=jnp.float32) + bqkv_ref[l]  # (T,3D)
        wo_l = wo_ref[l]                                           # (D, D) bf16
        attn_out = jnp.zeros((T, D), jnp.float32)
        for h in range(num_heads):
            q = qkv[:, h * Dh:(h + 1) * Dh]
            k = qkv[:, D + h * Dh:D + (h + 1) * Dh]
            v = qkv[:, 2 * D + h * Dh:2 * D + (h + 1) * Dh]
            # q @ k^T via dot_general (contract last dims, no transpose)
            s = lax.dot_general(q.astype(bf16), k.astype(bf16),
                                (((1,), (1,)), ((), ())),
                                preferred_element_type=jnp.float32) * scale
            s = s + neg_mask
            s = s - jnp.max(s, axis=-1, keepdims=True)
            p = jnp.exp(s)
            p = p * pl.reciprocal(jnp.sum(p, axis=-1, keepdims=True), approx=True)
            o_h = jnp.dot(p.astype(bf16), v.astype(bf16),
                          preferred_element_type=jnp.float32)      # (T, Dh)
            # concat-over-heads @ Wo  ==  sum_h o_h @ Wo[h*Dh:(h+1)*Dh, :]
            attn_out = attn_out + jnp.dot(o_h.astype(bf16),
                                          wo_l[h * Dh:(h + 1) * Dh, :],
                                          preferred_element_type=jnp.float32)
        attn_out = attn_out + bo_ref[l]
        h1 = layer_norm(x + attn_out, ln1g_ref[l], ln1b_ref[l])
        ff = jnp.dot(h1.astype(bf16), wff1_ref[l],
                     preferred_element_type=jnp.float32) + bff1_ref[l]
        ff = jnp.maximum(ff, 0.0)                                  # ReLU FFN
        ff = jnp.dot(ff.astype(bf16), wff2_ref[l],
                     preferred_element_type=jnp.float32) + bff2_ref[l]
        x = layer_norm(h1 + ff, ln2g_ref[l], ln2b_ref[l])

    logits = jnp.dot(x.astype(bf16), wact_ref[...],
                     preferred_element_type=jnp.float32) + bact_ref[...]
    logits_ref[0] = logits


def pallas_transformer_action_head(seq, layers, head, num_heads):
    S, T, D = seq.shape
    L = layers["wqkv"].shape[0]
    A = head["w"].shape[-1]

    def full(shape):
        nd = len(shape)
        return pl.BlockSpec(shape, lambda s, _nd=nd: (0,) * _nd)

    in_specs = [
        pl.BlockSpec((1, T, D), lambda s: (s, 0, 0)),
        full((L, D, 3 * D)), full((L, 1, 3 * D)),
        full((L, D, D)), full((L, 1, D)),
        full((L, 1, D)), full((L, 1, D)),
        full((L, D, D)), full((L, 1, D)),
        full((L, D, D)), full((L, 1, D)),
        full((L, 1, D)), full((L, 1, D)),
        full((D, A)), full((1, A)),
    ]
    out = pl.pallas_call(
        functools.partial(_transformer_head_kernel, num_layers=L,
                          num_heads=num_heads, eps=1e-5),
        out_shape=jax.ShapeDtypeStruct((S, T, A), jnp.float32),
        grid=(S,),
        in_specs=in_specs,
        out_specs=pl.BlockSpec((1, T, A), lambda s: (s, 0, 0)),
        compiler_params=_cparams(),
    )(seq,
      layers["wqkv"], layers["bqkv"], layers["wo"], layers["bo"],
      layers["ln1_g"], layers["ln1_b"], layers["wff1"], layers["bff1"],
      layers["wff2"], layers["bff2"], layers["ln2_g"], layers["ln2_b"],
      head["w"], head["b"])
    return out.reshape(S * T, A)


# -----------------------------------------------------------------------------
# Full forward
# -----------------------------------------------------------------------------
def forward(params, obs, prev_obs, prev_actions, state,
            *, num_seqs, num_heads, num_actions):
    B, C, H, W = obs.shape
    # Build the concatenated observation directly in NHWC; channel order
    # [obs, prev_obs, one_hot(prev_actions)] matches torch.cat(..., dim=1).
    obs_nhwc = jnp.transpose(obs, (0, 2, 3, 1))
    prev_nhwc = jnp.transpose(prev_obs, (0, 2, 3, 1))
    oh = jax.nn.one_hot(prev_actions, num_actions, dtype=jnp.float32)
    oh_map = jnp.broadcast_to(oh[:, None, None, :], (B, H, W, num_actions))
    x = jnp.concatenate([obs_nhwc, prev_nhwc, oh_map], axis=-1)     # (B,H,W,Cin)

    # conv encoder: (Conv3x3 'same' + LeakyReLU) * num_conv_layers
    for bigw, b in params["conv"]:
        x = pallas_conv3x3_lrelu(x, bigw, b)                        # (B,H,W,F)

    # Flatten + Linear.  fc1 weights were pre-permuted at init so they consume
    # the NHWC (h,w,c) flatten order (no runtime NCHW transpose needed).
    F_ = x.shape[-1]
    enc = pallas_linear(x.reshape(B, H * W * F_),
                        params["fc1"]["w"], params["fc1"]["b"])     # (B, D)

    D = enc.shape[-1]
    T = B // num_seqs                               # max_seq_len
    seq = enc.reshape(num_seqs, T, D)               # add_time_dimension (batch-major)

    logits = pallas_transformer_action_head(seq, params["layers"],
                                            params["action_head"], num_heads)
    state_out = [s + 1 for s in state]
    return logits, state_out


# -----------------------------------------------------------------------------
# Deterministic synthetic parameters (torch layouts folded at init)
# -----------------------------------------------------------------------------
def init_params(key, in_ch, num_conv_layers, num_filters, H, W,
                hidden, num_layers, num_outputs):
    def nrm(k, shape, scale=0.05):
        return scale * jax.random.normal(k, shape, jnp.float32)

    ki = iter(jax.random.split(key, 256))
    params = {"conv": []}
    # banded width-fold matrices: band[kx][i, o] == 1  iff  i == o + kx
    bands = [jnp.eye(W + 2, W, k=-kx, dtype=jnp.float32) for kx in range(3)]
    cin = in_ch
    for _ in range(num_conv_layers):
        # torch Conv2d weight (Cout, Cin, 3, 3) -> (9, Cin, Cout) tap matrices,
        # then fold the three width taps of each row tap ky into a banded
        # ((W+2)*Cin, W*Cout) matrix -> conv = 3 full-row matmuls per image.
        w_t = nrm(next(ki), (num_filters, cin, 3, 3))
        w9 = jnp.transpose(w_t, (2, 3, 1, 0)).reshape(9, cin, num_filters)
        bigw = jnp.stack([
            sum(jnp.kron(bands[kx], w9[ky * 3 + kx]) for kx in range(3))
            for ky in range(3)])
        params["conv"].append((bigw.astype(jnp.bfloat16),
                               nrm(next(ki), (1, num_filters))))
        cin = num_filters

    # fc1: torch weight (hidden, F*H*W) acts on an NCHW (c,h,w) flatten; fold
    # the (c,h,w)->(h,w,c) permutation into the weight once here.
    w_fc1_t = nrm(next(ki), (hidden, num_filters * H * W))
    w_fc1 = (w_fc1_t.reshape(hidden, num_filters, H, W)
                     .transpose(2, 3, 1, 0)
                     .reshape(H * W * num_filters, hidden))
    params["fc1"] = {"w": w_fc1.astype(jnp.bfloat16),
                     "b": nrm(next(ki), (1, hidden))}

    def stack(shape, dtype=jnp.float32):
        return jnp.stack([nrm(next(ki), shape)
                          for _ in range(num_layers)]).astype(dtype)

    bf16 = jnp.bfloat16
    params["layers"] = {
        # torch in_proj_weight (3D, D) transposed -> (D, 3D); columns = [q|k|v]
        "wqkv": stack((hidden, 3 * hidden), bf16),
        "bqkv": stack((1, 3 * hidden)),
        "wo": stack((hidden, hidden), bf16),
        "bo": stack((1, hidden)),
        "ln1_g": jnp.ones((num_layers, 1, hidden), jnp.float32),
        "ln1_b": jnp.zeros((num_layers, 1, hidden), jnp.float32),
        "wff1": stack((hidden, hidden), bf16),
        "bff1": stack((1, hidden)),
        "wff2": stack((hidden, hidden), bf16),
        "bff2": stack((1, hidden)),
        "ln2_g": jnp.ones((num_layers, 1, hidden), jnp.float32),
        "ln2_b": jnp.zeros((num_layers, 1, hidden), jnp.float32),
    }
    params["action_head"] = {"w": nrm(next(ki), (hidden, num_outputs)).astype(bf16),
                             "b": nrm(next(ki), (1, num_outputs))}
    return params


if __name__ == "__main__":
    # small config consistent with the module's __init__
    num_seqs, max_seq_len = 2, 4
    B = num_seqs * max_seq_len           # flattened (batch*time) rows
    C, H, W = 5, 8, 8                    # per-frame obs channels / spatial
    A = 6                                # action_space.n (Overcooked)
    num_conv_layers = 2
    num_filters = 16
    size_hidden_layers = 32
    num_hidden_layers = 2                # transformer layers
    num_heads = 2
    num_outputs = A
    in_channels = 2 * C + A              # _get_in_channels override

    key = jax.random.PRNGKey(0)
    k_p, k_obs, k_pobs, k_act = jax.random.split(key, 4)

    params = init_params(k_p, in_channels, num_conv_layers, num_filters,
                         H, W, size_hidden_layers, num_hidden_layers,
                         num_outputs)

    obs = jax.random.normal(k_obs, (B, C, H, W), jnp.float32)        # NCHW
    prev_obs = jax.random.normal(k_pobs, (B, C, H, W), jnp.float32)  # NCHW
    prev_actions = jax.random.randint(k_act, (B,), 0, A)
    state = [jnp.zeros((1,), jnp.float32)]                           # fake state

    fwd = jax.jit(functools.partial(forward,
                                    num_seqs=num_seqs,
                                    num_heads=num_heads,
                                    num_actions=A))
    logits, state_out = fwd(params, obs, prev_obs, prev_actions, state)
    logits = jax.block_until_ready(logits)
    jax.block_until_ready(state_out)

    assert logits.shape == (B, num_outputs), logits.shape
    assert bool(jnp.all(jnp.isfinite(logits)))
    print("KERNEL_OK")
</pallas_src>

<mosaic_0001>
module attributes {stable_mosaic.version = 11 : i64} {
  func.func @_conv3x3_lrelu_kernel(%arg0: i32, %arg1: memref<4x10x160xf32, #tpu.memory_space<vmem>>, %arg2: memref<3x160x128xbf16, #tpu.memory_space<vmem>>, %arg3: memref<1x128xf32, #tpu.memory_space<vmem>>, %arg4: memref<4x8x128xf32, #tpu.memory_space<vmem>>) attributes {dimension_semantics = [#tpu.dimension_semantics<parallel>], iteration_bounds = array<i64: 2>, scalar_prefetch = 0 : i64, scratch_operands = 0 : i64, tpu.core_type = #tpu.core_type<tc>, window_params = [{transform_indices = @transform_0, window_bounds = array<i64: 4, 10, 160>}, {pipeline_mode = #tpu.pipeline_mode<synchronous>, transform_indices = @transform_1, window_bounds = array<i64: 3, 160, 128>}, {pipeline_mode = #tpu.pipeline_mode<synchronous>, transform_indices = @transform_2, window_bounds = array<i64: 1, 128>}, {transform_indices = @transform_3, window_bounds = array<i64: 4, 8, 128>}]} {
    %c0 = arith.constant 0 : index
    %c0_0 = arith.constant 0 : index
    %c0_1 = arith.constant 0 : index
    %0 = vector.load %arg1[%c0, %c0_0, %c0_1] : memref<4x10x160xf32, #tpu.memory_space<vmem>>, vector<1x10x160xf32>
    %1 = vector.shape_cast %0 : vector<1x10x160xf32> to vector<10x160xf32>
    %2 = arith.truncf %1 : vector<10x160xf32> to vector<10x160xbf16>
    %cst = arith.constant 0.000000e+00 : f32
    %3 = vector.broadcast %cst : f32 to vector<8x128xf32>
    %4 = vector.extract_strided_slice %2 {offsets = [0, 0], sizes = [8, 160], strides = [1, 1]} : vector<10x160xbf16> to vector<8x160xbf16>
    %c0_2 = arith.constant 0 : index
    %c0_3 = arith.constant 0 : index
    %c0_4 = arith.constant 0 : index
    %5 = vector.load %arg2[%c0_2, %c0_3, %c0_4] : memref<3x160x128xbf16, #tpu.memory_space<vmem>>, vector<1x160x128xbf16>
    %6 = vector.shape_cast %5 : vector<1x160x128xbf16> to vector<160x128xbf16>
    %cst_5 = arith.constant dense<0.000000e+00> : vector<8x128xf32>
    %7 = tpu.matmul %4, %6, %cst_5 {dimension_numbers = #tpu.dot_dimension_numbers<[1], [0], [0], [1], [0, 0, 1, 1], [], []>} : vector<8x160xbf16>, vector<160x128xbf16>, vector<8x128xf32> -> vector<8x128xf32>
    %8 = arith.addf %3, %7 : vector<8x128xf32>
    %9 = vector.extract_strided_slice %2 {offsets = [1, 0], sizes = [8, 160], strides = [1, 1]} : vector<10x160xbf16> to vector<8x160xbf16>
    %c1 = arith.constant 1 : index
    %c0_6 = arith.constant 0 : index
    %c0_7 = arith.constant 0 : index
    %10 = vector.load %arg2[%c1, %c0_6, %c0_7] : memref<3x160x128xbf16, #tpu.memory_space<vmem>>, vector<1x160x128xbf16>
    %11 = vector.shape_cast %10 : vector<1x160x128xbf16> to vector<160x128xbf16>
    %cst_8 = arith.constant dense<0.000000e+00> : vector<8x128xf32>
    %12 = tpu.matmul %9, %11, %cst_8 {dimension_numbers = #tpu.dot_dimension_numbers<[1], [0], [0], [1], [0, 0, 1, 1], [], []>} : vector<8x160xbf16>, vector<160x128xbf16>, vector<8x128xf32> -> vector<8x128xf32>
    %13 = arith.addf %8, %12 : vector<8x128xf32>
    %14 = vector.extract_strided_slice %2 {offsets = [2, 0], sizes = [8, 160], strides = [1, 1]} : vector<10x160xbf16> to vector<8x160xbf16>
    %c2 = arith.constant 2 : index
    %c0_9 = arith.constant 0 : index
    %c0_10 = arith.constant 0 : index
    %15 = vector.load %arg2[%c2, %c0_9, %c0_10] : memref<3x160x128xbf16, #tpu.memory_space<vmem>>, vector<1x160x128xbf16>
    %16 = vector.shape_cast %15 : vector<1x160x128xbf16> to vector<160x128xbf16>
    %cst_11 = arith.constant dense<0.000000e+00> : vector<8x128xf32>
    %17 = tpu.matmul %14, %16, %cst_11 {dimension_numbers = #tpu.dot_dimension_numbers<[1], [0], [0], [1], [0, 0, 1, 1], [], []>} : vector<8x160xbf16>, vector<160x128xbf16>, vector<8x128xf32> -> vector<8x128xf32>
    %18 = arith.addf %13, %17 : vector<8x128xf32>
    %c0_12 = arith.constant 0 : index
    %c0_13 = arith.constant 0 : index
    %19 = vector.load %arg3[%c0_12, %c0_13] : memref<1x128xf32, #tpu.memory_space<vmem>>, vector<1x128xf32>
    %20 = vector.broadcast %19 : vector<1x128xf32> to vector<8x128xf32>
    %21 = arith.addf %18, %20 : vector<8x128xf32>
    %cst_14 = arith.constant 0.000000e+00 : f32
    %22 = vector.broadcast %cst_14 : f32 to vector<8x128xf32>
    %23 = arith.cmpf oge, %21, %22 : vector<8x128xf32>
    %cst_15 = arith.constant 0.00999999977 : f32
    %24 = vector.broadcast %cst_15 : f32 to vector<8x128xf32>
    %25 = arith.mulf %24, %21 : vector<8x128xf32>
    %26 = arith.select %23, %21, %25 : vector<8x128xi1>, vector<8x128xf32>
    %c0_16 = arith.constant 0 : index
    %c0_17 = arith.constant 0 : index
    %c0_18 = arith.constant 0 : index
    %27 = vector.load %arg4[%c0_16, %c0_17, %c0_18] : memref<4x8x128xf32, #tpu.memory_space<vmem>>, vector<1x8x128xf32>
    %28 = vector.shape_cast %27 : vector<1x8x128xf32> to vector<8x128xf32>
    %29 = vector.shape_cast %26 : vector<8x128xf32> to vector<1x8x128xf32>
    tpu.vector_store %arg4[%c0_16, %c0_17, %c0_18], %29 {strides = array<i32>} : memref<4x8x128xf32, #tpu.memory_space<vmem>>, vector<1x8x128xf32>,
    %c1_19 = arith.constant 1 : index
    %c0_20 = arith.constant 0 : index
    %c0_21 = arith.constant 0 : index
    %30 = vector.load %arg1[%c1_19, %c0_20, %c0_21] : memref<4x10x160xf32, #tpu.memory_space<vmem>>, vector<1x10x160xf32>
    %31 = vector.shape_cast %30 : vector<1x10x160xf32> to vector<10x160xf32>
    %32 = arith.truncf %31 : vector<10x160xf32> to vector<10x160xbf16>
    %cst_22 = arith.constant 0.000000e+00 : f32
    %33 = vector.broadcast %cst_22 : f32 to vector<8x128xf32>
    %34 = vector.extract_strided_slice %32 {offsets = [0, 0], sizes = [8, 160], strides = [1, 1]} : vector<10x160xbf16> to vector<8x160xbf16>
    %c0_23 = arith.constant 0 : index
    %c0_24 = arith.constant 0 : index
    %c0_25 = arith.constant 0 : index
    %35 = vector.load %arg2[%c0_23, %c0_24, %c0_25] : memref<3x160x128xbf16, #tpu.memory_space<vmem>>, vector<1x160x128xbf16>
    %36 = vector.shape_cast %35 : vector<1x160x128xbf16> to vector<160x128xbf16>
    %cst_26 = arith.constant dense<0.000000e+00> : vector<8x128xf32>
    %37 = tpu.matmul %34, %36, %cst_26 {dimension_numbers = #tpu.dot_dimension_numbers<[1], [0], [0], [1], [0, 0, 1, 1], [], []>} : vector<8x160xbf16>, vector<160x128xbf16>, vector<8x128xf32> -> vector<8x128xf32>
    %38 = arith.addf %33, %37 : vector<8x128xf32>
    %39 = vector.extract_strided_slice %32 {offsets = [1, 0], sizes = [8, 160], strides = [1, 1]} : vector<10x160xbf16> to vector<8x160xbf16>
    %c1_27 = arith.constant 1 : index
    %c0_28 = arith.constant 0 : index
    %c0_29 = arith.constant 0 : index
    %40 = vector.load %arg2[%c1_27, %c0_28, %c0_29] : memref<3x160x128xbf16, #tpu.memory_space<vmem>>, vector<1x160x128xbf16>
    %41 = vector.shape_cast %40 : vector<1x160x128xbf16> to vector<160x128xbf16>
    %cst_30 = arith.constant dense<0.000000e+00> : vector<8x128xf32>
    %42 = tpu.matmul %39, %41, %cst_30 {dimension_numbers = #tpu.dot_dimension_numbers<[1], [0], [0], [1], [0, 0, 1, 1], [], []>} : vector<8x160xbf16>, vector<160x128xbf16>, vector<8x128xf32> -> vector<8x128xf32>
    %43 = arith.addf %38, %42 : vector<8x128xf32>
    %44 = vector.extract_strided_slice %32 {offsets = [2, 0], sizes = [8, 160], strides = [1, 1]} : vector<10x160xbf16> to vector<8x160xbf16>
    %c2_31 = arith.constant 2 : index
    %c0_32 = arith.constant 0 : index
    %c0_33 = arith.constant 0 : index
    %45 = vector.load %arg2[%c2_31, %c0_32, %c0_33] : memref<3x160x128xbf16, #tpu.memory_space<vmem>>, vector<1x160x128xbf16>
    %46 = vector.shape_cast %45 : vector<1x160x128xbf16> to vector<160x128xbf16>
    %cst_34 = arith.constant dense<0.000000e+00> : vector<8x128xf32>
    %47 = tpu.matmul %44, %46, %cst_34 {dimension_numbers = #tpu.dot_dimension_numbers<[1], [0], [0], [1], [0, 0, 1, 1], [], []>} : vector<8x160xbf16>, vector<160x128xbf16>, vector<8x128xf32> -> vector<8x128xf32>
    %48 = arith.addf %43, %47 : vector<8x128xf32>
    %c0_35 = arith.constant 0 : index
    %c0_36 = arith.constant 0 : index
    %49 = vector.load %arg3[%c0_35, %c0_36] : memref<1x128xf32, #tpu.memory_space<vmem>>, vector<1x128xf32>
    %50 = vector.broadcast %49 : vector<1x128xf32> to vector<8x128xf32>
    %51 = arith.addf %48, %50 : vector<8x128xf32>
    %cst_37 = arith.constant 0.000000e+00 : f32
    %52 = vector.broadcast %cst_37 : f32 to vector<8x128xf32>
    %53 = arith.cmpf oge, %51, %52 : vector<8x128xf32>
    %cst_38 = arith.constant 0.00999999977 : f32
    %54 = vector.broadcast %cst_38 : f32 to vector<8x128xf32>
    %55 = arith.mulf %54, %51 : vector<8x128xf32>
    %56 = arith.select %53, %51, %55 : vector<8x128xi1>, vector<8x128xf32>
    %c1_39 = arith.constant 1 : index
    %c0_40 = arith.constant 0 : index
    %c0_41 = arith.constant 0 : index
    %57 = vector.load %arg4[%c1_39, %c0_40, %c0_41] : memref<4x8x128xf32, #tpu.memory_space<vmem>>, vector<1x8x128xf32>
    %58 = vector.shape_cast %57 : vector<1x8x128xf32> to vector<8x128xf32>
    %59 = vector.shape_cast %56 : vector<8x128xf32> to vector<1x8x128xf32>
    tpu.vector_store %arg4[%c1_39, %c0_40, %c0_41], %59 {strides = array<i32>} : memref<4x8x128xf32, #tpu.memory_space<vmem>>, vector<1x8x128xf32>,
    %c2_42 = arith.constant 2 : index
    %c0_43 = arith.constant 0 : index
    %c0_44 = arith.constant 0 : index
    %60 = vector.load %arg1[%c2_42, %c0_43, %c0_44] : memref<4x10x160xf32, #tpu.memory_space<vmem>>, vector<1x10x160xf32>
    %61 = vector.shape_cast %60 : vector<1x10x160xf32> to vector<10x160xf32>
    %62 = arith.truncf %61 : vector<10x160xf32> to vector<10x160xbf16>
    %cst_45 = arith.constant 0.000000e+00 : f32
    %63 = vector.broadcast %cst_45 : f32 to vector<8x128xf32>
    %64 = vector.extract_strided_slice %62 {offsets = [0, 0], sizes = [8, 160], strides = [1, 1]} : vector<10x160xbf16> to vector<8x160xbf16>
    %c0_46 = arith.constant 0 : index
    %c0_47 = arith.constant 0 : index
    %c0_48 = arith.constant 0 : index
    %65 = vector.load %arg2[%c0_46, %c0_47, %c0_48] : memref<3x160x128xbf16, #tpu.memory_space<vmem>>, vector<1x160x128xbf16>
    %66 = vector.shape_cast %65 : vector<1x160x128xbf16> to vector<160x128xbf16>
    %cst_49 = arith.constant dense<0.000000e+00> : vector<8x128xf32>
    %67 = tpu.matmul %64, %66, %cst_49 {dimension_numbers = #tpu.dot_dimension_numbers<[1], [0], [0], [1], [0, 0, 1, 1], [], []>} : vector<8x160xbf16>, vector<160x128xbf16>, vector<8x128xf32> -> vector<8x128xf32>
    %68 = arith.addf %63, %67 : vector<8x128xf32>
    %69 = vector.extract_strided_slice %62 {offsets = [1, 0], sizes = [8, 160], strides = [1, 1]} : vector<10x160xbf16> to vector<8x160xbf16>
    %c1_50 = arith.constant 1 : index
    %c0_51 = arith.constant 0 : index
    %c0_52 = arith.constant 0 : index
    %70 = vector.load %arg2[%c1_50, %c0_51, %c0_52] : memref<3x160x128xbf16, #tpu.memory_space<vmem>>, vector<1x160x128xbf16>
    %71 = vector.shape_cast %70 : vector<1x160x128xbf16> to vector<160x128xbf16>
    %cst_53 = arith.constant dense<0.000000e+00> : vector<8x128xf32>
    %72 = tpu.matmul %69, %71, %cst_53 {dimension_numbers = #tpu.dot_dimension_numbers<[1], [0], [0], [1], [0, 0, 1, 1], [], []>} : vector<8x160xbf16>, vector<160x128xbf16>, vector<8x128xf32> -> vector<8x128xf32>
    %73 = arith.addf %68, %72 : vector<8x128xf32>
    %74 = vector.extract_strided_slice %62 {offsets = [2, 0], sizes = [8, 160], strides = [1, 1]} : vector<10x160xbf16> to vector<8x160xbf16>
    %c2_54 = arith.constant 2 : index
    %c0_55 = arith.constant 0 : index
    %c0_56 = arith.constant 0 : index
    %75 = vector.load %arg2[%c2_54, %c0_55, %c0_56] : memref<3x160x128xbf16, #tpu.memory_space<vmem>>, vector<1x160x128xbf16>
    %76 = vector.shape_cast %75 : vector<1x160x128xbf16> to vector<160x128xbf16>
    %cst_57 = arith.constant dense<0.000000e+00> : vector<8x128xf32>
    %77 = tpu.matmul %74, %76, %cst_57 {dimension_numbers = #tpu.dot_dimension_numbers<[1], [0], [0], [1], [0, 0, 1, 1], [], []>} : vector<8x160xbf16>, vector<160x128xbf16>, vector<8x128xf32> -> vector<8x128xf32>
    %78 = arith.addf %73, %77 : vector<8x128xf32>
    %c0_58 = arith.constant 0 : index
    %c0_59 = arith.constant 0 : index
    %79 = vector.load %arg3[%c0_58, %c0_59] : memref<1x128xf32, #tpu.memory_space<vmem>>, vector<1x128xf32>
    %80 = vector.broadcast %79 : vector<1x128xf32> to vector<8x128xf32>
    %81 = arith.addf %78, %80 : vector<8x128xf32>
    %cst_60 = arith.constant 0.000000e+00 : f32
    %82 = vector.broadcast %cst_60 : f32 to vector<8x128xf32>
    %83 = arith.cmpf oge, %81, %82 : vector<8x128xf32>
    %cst_61 = arith.constant 0.00999999977 : f32
    %84 = vector.broadcast %cst_61 : f32 to vector<8x128xf32>
    %85 = arith.mulf %84, %81 : vector<8x128xf32>
    %86 = arith.select %83, %81, %85 : vector<8x128xi1>, vector<8x128xf32>
    %c2_62 = arith.constant 2 : index
    %c0_63 = arith.constant 0 : index
    %c0_64 = arith.constant 0 : index
    %87 = vector.load %arg4[%c2_62, %c0_63, %c0_64] : memref<4x8x128xf32, #tpu.memory_space<vmem>>, vector<1x8x128xf32>
    %88 = vector.shape_cast %87 : vector<1x8x128xf32> to vector<8x128xf32>
    %89 = vector.shape_cast %86 : vector<8x128xf32> to vector<1x8x128xf32>
    tpu.vector_store %arg4[%c2_62, %c0_63, %c0_64], %89 {strides = array<i32>} : memref<4x8x128xf32, #tpu.memory_space<vmem>>, vector<1x8x128xf32>,
    %c3 = arith.constant 3 : index
    %c0_65 = arith.constant 0 : index
    %c0_66 = arith.constant 0 : index
    %90 = vector.load %arg1[%c3, %c0_65, %c0_66] : memref<4x10x160xf32, #tpu.memory_space<vmem>>, vector<1x10x160xf32>
    %91 = vector.shape_cast %90 : vector<1x10x160xf32> to vector<10x160xf32>
    %92 = arith.truncf %91 : vector<10x160xf32> to vector<10x160xbf16>
    %cst_67 = arith.constant 0.000000e+00 : f32
    %93 = vector.broadcast %cst_67 : f32 to vector<8x128xf32>
    %94 = vector.extract_strided_slice %92 {offsets = [0, 0], sizes = [8, 160], strides = [1, 1]} : vector<10x160xbf16> to vector<8x160xbf16>
    %c0_68 = arith.constant 0 : index
    %c0_69 = arith.constant 0 : index
    %c0_70 = arith.constant 0 : index
    %95 = vector.load %arg2[%c0_68, %c0_69, %c0_70] : memref<3x160x128xbf16, #tpu.memory_space<vmem>>, vector<1x160x128xbf16>
    %96 = vector.shape_cast %95 : vector<1x160x128xbf16> to vector<160x128xbf16>
    %cst_71 = arith.constant dense<0.000000e+00> : vector<8x128xf32>
    %97 = tpu.matmul %94, %96, %cst_71 {dimension_numbers = #tpu.dot_dimension_numbers<[1], [0], [0], [1], [0, 0, 1, 1], [], []>} : vector<8x160xbf16>, vector<160x128xbf16>, vector<8x128xf32> -> vector<8x128xf32>
    %98 = arith.addf %93, %97 : vector<8x128xf32>
    %99 = vector.extract_strided_slice %92 {offsets = [1, 0], sizes = [8, 160], strides = [1, 1]} : vector<10x160xbf16> to vector<8x160xbf16>
    %c1_72 = arith.constant 1 : index
    %c0_73 = arith.constant 0 : index
    %c0_74 = arith.constant 0 : index
    %100 = vector.load %arg2[%c1_72, %c0_73, %c0_74] : memref<3x160x128xbf16, #tpu.memory_space<vmem>>, vector<1x160x128xbf16>
    %101 = vector.shape_cast %100 : vector<1x160x128xbf16> to vector<160x128xbf16>
    %cst_75 = arith.constant dense<0.000000e+00> : vector<8x128xf32>
    %102 = tpu.matmul %99, %101, %cst_75 {dimension_numbers = #tpu.dot_dimension_numbers<[1], [0], [0], [1], [0, 0, 1, 1], [], []>} : vector<8x160xbf16>, vector<160x128xbf16>, vector<8x128xf32> -> vector<8x128xf32>
    %103 = arith.addf %98, %102 : vector<8x128xf32>
    %104 = vector.extract_strided_slice %92 {offsets = [2, 0], sizes = [8, 160], strides = [1, 1]} : vector<10x160xbf16> to vector<8x160xbf16>
    %c2_76 = arith.constant 2 : index
    %c0_77 = arith.constant 0 : index
    %c0_78 = arith.constant 0 : index
    %105 = vector.load %arg2[%c2_76, %c0_77, %c0_78] : memref<3x160x128xbf16, #tpu.memory_space<vmem>>, vector<1x160x128xbf16>
    %106 = vector.shape_cast %105 : vector<1x160x128xbf16> to vector<160x128xbf16>
    %cst_79 = arith.constant dense<0.000000e+00> : vector<8x128xf32>
    %107 = tpu.matmul %104, %106, %cst_79 {dimension_numbers = #tpu.dot_dimension_numbers<[1], [0], [0], [1], [0, 0, 1, 1], [], []>} : vector<8x160xbf16>, vector<160x128xbf16>, vector<8x128xf32> -> vector<8x128xf32>
    %108 = arith.addf %103, %107 : vector<8x128xf32>
    %c0_80 = arith.constant 0 : index
    %c0_81 = arith.constant 0 : index
    %109 = vector.load %arg3[%c0_80, %c0_81] : memref<1x128xf32, #tpu.memory_space<vmem>>, vector<1x128xf32>
    %110 = vector.broadcast %109 : vector<1x128xf32> to vector<8x128xf32>
    %111 = arith.addf %108, %110 : vector<8x128xf32>
    %cst_82 = arith.constant 0.000000e+00 : f32
    %112 = vector.broadcast %cst_82 : f32 to vector<8x128xf32>
    %113 = arith.cmpf oge, %111, %112 : vector<8x128xf32>
    %cst_83 = arith.constant 0.00999999977 : f32
    %114 = vector.broadcast %cst_83 : f32 to vector<8x128xf32>
    %115 = arith.mulf %114, %111 : vector<8x128xf32>
    %116 = arith.select %113, %111, %115 : vector<8x128xi1>, vector<8x128xf32>
    %c3_84 = arith.constant 3 : index
    %c0_85 = arith.constant 0 : index
    %c0_86 = arith.constant 0 : index
    %117 = vector.load %arg4[%c3_84, %c0_85, %c0_86] : memref<4x8x128xf32, #tpu.memory_space<vmem>>, vector<1x8x128xf32>
    %118 = vector.shape_cast %117 : vector<1x8x128xf32> to vector<8x128xf32>
    %119 = vector.shape_cast %116 : vector<8x128xf32> to vector<1x8x128xf32>
    tpu.vector_store %arg4[%c3_84, %c0_85, %c0_86], %119 {strides = array<i32>} : memref<4x8x128xf32, #tpu.memory_space<vmem>>, vector<1x8x128xf32>,
    return
  }
  func.func @transform_0(%arg0: i32) -> (i32, i32, i32) {
    %c0_i32 = arith.constant 0 : i32
    %c0_i32_0 = arith.constant 0 : i32
    %c0_i32_1 = arith.constant 0 : i32
    return %arg0, %c0_i32, %c0_i32_0 : i32, i32, i32
  }
  func.func @transform_1(%arg0: i32) -> (i32, i32, i32) {
    %c0_i32 = arith.constant 0 : i32
    %c0_i32_0 = arith.constant 0 : i32
    %c0_i32_1 = arith.constant 0 : i32
    %c0_i32_2 = arith.constant 0 : i32
    return %c0_i32, %c0_i32_0, %c0_i32_1 : i32, i32, i32
  }
  func.func @transform_2(%arg0: i32) -> (i32, i32) {
    %c0_i32 = arith.constant 0 : i32
    %c0_i32_0 = arith.constant 0 : i32
    %c0_i32_1 = arith.constant 0 : i32
    return %c0_i32, %c0_i32_0 : i32, i32
  }
  func.func @transform_3(%arg0: i32) -> (i32, i32, i32) {
    %c0_i32 = arith.constant 0 : i32
    %c0_i32_0 = arith.constant 0 : i32
    %c0_i32_1 = arith.constant 0 : i32
    return %arg0, %c0_i32, %c0_i32_0 : i32, i32, i32
  }
}

module attributes {stable_mosaic.version = 11 : i64} {
  func.func @_linear_kernel(%arg0: i32, %arg1: memref<8x1024xf32, #tpu.memory_space<vmem>>, %arg2: memref<1024x32xbf16, #tpu.memory_space<vmem>>, %arg3: memref<1x32xf32, #tpu.memory_space<vmem>>, %arg4: memref<8x32xf32, #tpu.memory_space<vmem>>) attributes {dimension_semantics = [#tpu.dimension_semantics<parallel>], iteration_bounds = array<i64: 1>, scalar_prefetch = 0 : i64, scratch_operands = 0 : i64, tpu.core_type = #tpu.core_type<tc>, window_params = [{transform_indices = @transform_0, window_bounds = array<i64: 8, 1024>}, {pipeline_mode = #tpu.pipeline_mode<synchronous>, transform_indices = @transform_1, window_bounds = array<i64: 1024, 32>}, {pipeline_mode = #tpu.pipeline_mode<synchronous>, transform_indices = @transform_2, window_bounds = array<i64: 1, 32>}, {transform_indices = @transform_3, window_bounds = array<i64: 8, 32>}]} {
    %c0 = arith.constant 0 : index
    %c0_0 = arith.constant 0 : index
    %0 = vector.load %arg1[%c0, %c0_0] : memref<8x1024xf32, #tpu.memory_space<vmem>>, vector<8x1024xf32>
    %1 = arith.truncf %0 : vector<8x1024xf32> to vector<8x1024xbf16>
    %c0_1 = arith.constant 0 : index
    %c0_2 = arith.constant 0 : index
    %2 = vector.load %arg2[%c0_1, %c0_2] : memref<1024x32xbf16, #tpu.memory_space<vmem>>, vector<1024x32xbf16>
    %cst = arith.constant dense<0.000000e+00> : vector<8x32xf32>
    %3 = tpu.matmul %1, %2, %cst {dimension_numbers = #tpu.dot_dimension_numbers<[1], [0], [0], [1], [0, 0, 1, 1], [], []>} : vector<8x1024xbf16>, vector<1024x32xbf16>, vector<8x32xf32> -> vector<8x32xf32>
    %c0_3 = arith.constant 0 : index
    %c0_4 = arith.constant 0 : index
    %4 = vector.load %arg3[%c0_3, %c0_4] : memref<1x32xf32, #tpu.memory_space<vmem>>, vector<1x32xf32>
    %5 = vector.broadcast %4 : vector<1x32xf32> to vector<8x32xf32>
    %6 = arith.addf %3, %5 : vector<8x32xf32>
    %c0_5 = arith.constant 0 : index
    %c0_6 = arith.constant 0 : index
    %7 = vector.load %arg4[%c0_5, %c0_6] : memref<8x32xf32, #tpu.memory_space<vmem>>, vector<8x32xf32>
    tpu.vector_store %arg4[%c0_5, %c0_6], %6 {strides = array<i32>} : memref<8x32xf32, #tpu.memory_space<vmem>>, vector<8x32xf32>,
    return
  }
  func.func @transform_0(%arg0: i32) -> (i32, i32) {
    %c0_i32 = arith.constant 0 : i32
    %c0_i32_0 = arith.constant 0 : i32
    return %arg0, %c0_i32 : i32, i32
  }
  func.func @transform_1(%arg0: i32) -> (i32, i32) {
    %c0_i32 = arith.constant 0 : i32
    %c0_i32_0 = arith.constant 0 : i32
    %c0_i32_1 = arith.constant 0 : i32
    return %c0_i32, %c0_i32_0 : i32, i32
  }
  func.func @transform_2(%arg0: i32) -> (i32, i32) {
    %c0_i32 = arith.constant 0 : i32
    %c0_i32_0 = arith.constant 0 : i32
    %c0_i32_1 = arith.constant 0 : i32
    return %c0_i32, %c0_i32_0 : i32, i32
  }
  func.func @transform_3(%arg0: i32) -> (i32, i32) {
    %c0_i32 = arith.constant 0 : i32
    %c0_i32_0 = arith.constant 0 : i32
    return %arg0, %c0_i32 : i32, i32
  }
}

module attributes {stable_mosaic.version = 11 : i64} {
  func.func @_transformer_head_kernel(%arg0: i32, %arg1: memref<1x4x32xf32, #tpu.memory_space<vmem>>, %arg2: memref<2x32x96xbf16, #tpu.memory_space<vmem>>, %arg3: memref<2x1x96xf32, #tpu.memory_space<vmem>>, %arg4: memref<2x32x32xbf16, #tpu.memory_space<vmem>>, %arg5: memref<2x1x32xf32, #tpu.memory_space<vmem>>, %arg6: memref<2x1x32xf32, #tpu.memory_space<vmem>>, %arg7: memref<2x1x32xf32, #tpu.memory_space<vmem>>, %arg8: memref<2x32x32xbf16, #tpu.memory_space<vmem>>, %arg9: memref<2x1x32xf32, #tpu.memory_space<vmem>>, %arg10: memref<2x32x32xbf16, #tpu.memory_space<vmem>>, %arg11: memref<2x1x32xf32, #tpu.memory_space<vmem>>, %arg12: memref<2x1x32xf32, #tpu.memory_space<vmem>>, %arg13: memref<2x1x32xf32, #tpu.memory_space<vmem>>, %arg14: memref<32x6xbf16, #tpu.memory_space<vmem>>, %arg15: memref<1x6xf32, #tpu.memory_space<vmem>>, %arg16: memref<1x4x6xf32, #tpu.memory_space<vmem>>) attributes {dimension_semantics = [#tpu.dimension_semantics<parallel>], iteration_bounds = array<i64: 2>, scalar_prefetch = 0 : i64, scratch_operands = 0 : i64, tpu.core_type = #tpu.core_type<tc>, window_params = [{transform_indices = @transform_0, window_bounds = array<i64: 1, 4, 32>}, {pipeline_mode = #tpu.pipeline_mode<synchronous>, transform_indices = @transform_1, window_bounds = array<i64: 2, 32, 96>}, {pipeline_mode = #tpu.pipeline_mode<synchronous>, transform_indices = @transform_2, window_bounds = array<i64: 2, 1, 96>}, {pipeline_mode = #tpu.pipeline_mode<synchronous>, transform_indices = @transform_3, window_bounds = array<i64: 2, 32, 32>}, {pipeline_mode = #tpu.pipeline_mode<synchronous>, transform_indices = @transform_4, window_bounds = array<i64: 2, 1, 32>}, {pipeline_mode = #tpu.pipeline_mode<synchronous>, transform_indices = @transform_5, window_bounds = array<i64: 2, 1, 32>}, {pipeline_mode = #tpu.pipeline_mode<synchronous>, transform_indices = @transform_6, window_bounds = array<i64: 2, 1, 32>}, {pipeline_mode = #tpu.pipeline_mode<synchronous>, transform_indices = @transform_7, window_bounds = array<i64: 2, 32, 32>}, {pipeline_mode = #tpu.pipeline_mode<synchronous>, transform_indices = @transform_8, window_bounds = array<i64: 2, 1, 32>}, {pipeline_mode = #tpu.pipeline_mode<synchronous>, transform_indices = @transform_9, window_bounds = array<i64: 2, 32, 32>}, {pipeline_mode = #tpu.pipeline_mode<synchronous>, transform_indices = @transform_10, window_bounds = array<i64: 2, 1, 32>}, {pipeline_mode = #tpu.pipeline_mode<synchronous>, transform_indices = @transform_11, window_bounds = array<i64: 2, 1, 32>}, {pipeline_mode = #tpu.pipeline_mode<synchronous>, transform_indices = @transform_12, window_bounds = array<i64: 2, 1, 32>}, {pipeline_mode = #tpu.pipeline_mode<synchronous>, transform_indices = @transform_13, window_bounds = array<i64: 32, 6>}, {pipeline_mode = #tpu.pipeline_mode<synchronous>, transform_indices = @transform_14, window_bounds = array<i64: 1, 6>}, {transform_indices = @transform_15, window_bounds = array<i64: 1, 4, 6>}]} {
    %0 = tpu.iota {dimensions = array<i32: 0>} : vector<4x4xi32>
    %1 = tpu.iota {dimensions = array<i32: 1>} : vector<4x4xi32>
    %2 = arith.cmpi sgt, %1, %0 : vector<4x4xi32>
    %cst = arith.constant -1.000000e+30 : f32
    %cst_0 = arith.constant 0.000000e+00 : f32
    %3 = vector.broadcast %cst : f32 to vector<4x4xf32>
    %4 = vector.broadcast %cst_0 : f32 to vector<4x4xf32>
    %5 = arith.select %2, %3, %4 : vector<4x4xi1>, vector<4x4xf32>
    %c0 = arith.constant 0 : index
    %c0_1 = arith.constant 0 : index
    %c0_2 = arith.constant 0 : index
    %6 = vector.load %arg1[%c0, %c0_1, %c0_2] : memref<1x4x32xf32, #tpu.memory_space<vmem>>, vector<1x4x32xf32>
    %7 = vector.shape_cast %6 : vector<1x4x32xf32> to vector<4x32xf32>
    %8 = arith.truncf %7 : vector<4x32xf32> to vector<4x32xbf16>
    %c0_3 = arith.constant 0 : index
    %c0_4 = arith.constant 0 : index
    %c0_5 = arith.constant 0 : index
    %9 = vector.load %arg2[%c0_3, %c0_4, %c0_5] : memref<2x32x96xbf16, #tpu.memory_space<vmem>>, vector<1x32x96xbf16>
    %10 = vector.shape_cast %9 : vector<1x32x96xbf16> to vector<32x96xbf16>
    %cst_6 = arith.constant dense<0.000000e+00> : vector<4x96xf32>
    %11 = tpu.matmul %8, %10, %cst_6 {dimension_numbers = #tpu.dot_dimension_numbers<[1], [0], [0], [1], [0, 0, 1, 1], [], []>} : vector<4x32xbf16>, vector<32x96xbf16>, vector<4x96xf32> -> vector<4x96xf32>
    %c0_7 = arith.constant 0 : index
    %c0_8 = arith.constant 0 : index
    %c0_9 = arith.constant 0 : index
    %12 = vector.load %arg3[%c0_7, %c0_8, %c0_9] : memref<2x1x96xf32, #tpu.memory_space<vmem>>, vector<1x1x96xf32>
    %13 = vector.shape_cast %12 : vector<1x1x96xf32> to vector<1x96xf32>
    %14 = vector.broadcast %13 : vector<1x96xf32> to vector<4x96xf32>
    %15 = arith.addf %11, %14 : vector<4x96xf32>
    %c0_10 = arith.constant 0 : index
    %c0_11 = arith.constant 0 : index
    %c0_12 = arith.constant 0 : index
    %16 = vector.load %arg4[%c0_10, %c0_11, %c0_12] : memref<2x32x32xbf16, #tpu.memory_space<vmem>>, vector<1x32x32xbf16>
    %17 = vector.shape_cast %16 : vector<1x32x32xbf16> to vector<32x32xbf16>
    %cst_13 = arith.constant 0.000000e+00 : f32
    %18 = vector.broadcast %cst_13 : f32 to vector<4x32xf32>
    %19 = vector.extract_strided_slice %15 {offsets = [0, 0], sizes = [4, 16], strides = [1, 1]} : vector<4x96xf32> to vector<4x16xf32>
    %20 = vector.extract_strided_slice %15 {offsets = [0, 32], sizes = [4, 16], strides = [1, 1]} : vector<4x96xf32> to vector<4x16xf32>
    %21 = vector.extract_strided_slice %15 {offsets = [0, 64], sizes = [4, 16], strides = [1, 1]} : vector<4x96xf32> to vector<4x16xf32>
    %22 = arith.truncf %19 : vector<4x16xf32> to vector<4x16xbf16>
    %23 = arith.truncf %20 : vector<4x16xf32> to vector<4x16xbf16>
    %cst_14 = arith.constant dense<0.000000e+00> : vector<4x4xf32>
    %24 = tpu.matmul %22, %23, %cst_14 {dimension_numbers = #tpu.dot_dimension_numbers<[1], [1], [0], [0], [0, 0, 1, 0], [], []>} : vector<4x16xbf16>, vector<4x16xbf16>, vector<4x4xf32> -> vector<4x4xf32>
    %cst_15 = arith.constant 2.500000e-01 : f32
    %25 = vector.broadcast %cst_15 : f32 to vector<4x4xf32>
    %26 = arith.mulf %24, %25 : vector<4x4xf32>
    %27 = arith.addf %26, %5 : vector<4x4xf32>
    %cst_16 = arith.constant dense<0xFF800000> : vector<4xf32>
    %28 = vector.multi_reduction <maximumf>, %27, %cst_16 [1] : vector<4x4xf32> to vector<4xf32>
    %29 = vector.shape_cast %28 : vector<4xf32> to vector<4x1xf32>
    %30 = vector.broadcast %29 : vector<4x1xf32> to vector<4x4xf32>
    %31 = arith.subf %27, %30 : vector<4x4xf32>
    %32 = math.exp %31 : vector<4x4xf32>
    %cst_17 = arith.constant dense<0.000000e+00> : vector<4xf32>
    %33 = vector.multi_reduction <add>, %32, %cst_17 [1] : vector<4x4xf32> to vector<4xf32>
    %34 = vector.shape_cast %33 : vector<4xf32> to vector<4x1xf32>
    %35 = tpu.reciprocal %34 {approx = true} : vector<4x1xf32> -> vector<4x1xf32>
    %36 = vector.broadcast %35 : vector<4x1xf32> to vector<4x4xf32>
    %37 = arith.mulf %32, %36 : vector<4x4xf32>
    %38 = arith.truncf %37 : vector<4x4xf32> to vector<4x4xbf16>
    %39 = arith.truncf %21 : vector<4x16xf32> to vector<4x16xbf16>
    %cst_18 = arith.constant dense<0.000000e+00> : vector<4x16xf32>
    %40 = tpu.matmul %38, %39, %cst_18 {dimension_numbers = #tpu.dot_dimension_numbers<[1], [0], [0], [1], [0, 0, 1, 1], [], []>} : vector<4x4xbf16>, vector<4x16xbf16>, vector<4x16xf32> -> vector<4x16xf32>
    %41 = arith.truncf %40 : vector<4x16xf32> to vector<4x16xbf16>
    %42 = vector.extract_strided_slice %17 {offsets = [0, 0], sizes = [16, 32], strides = [1, 1]} : vector<32x32xbf16> to vector<16x32xbf16>
    %cst_19 = arith.constant dense<0.000000e+00> : vector<4x32xf32>
    %43 = tpu.matmul %41, %42, %cst_19 {dimension_numbers = #tpu.dot_dimension_numbers<[1], [0], [0], [1], [0, 0, 1, 1], [], []>} : vector<4x16xbf16>, vector<16x32xbf16>, vector<4x32xf32> -> vector<4x32xf32>
    %44 = arith.addf %18, %43 : vector<4x32xf32>
    %45 = vector.extract_strided_slice %15 {offsets = [0, 16], sizes = [4, 16], strides = [1, 1]} : vector<4x96xf32> to vector<4x16xf32>
    %46 = vector.extract_strided_slice %15 {offsets = [0, 48], sizes = [4, 16], strides = [1, 1]} : vector<4x96xf32> to vector<4x16xf32>
    %47 = vector.extract_strided_slice %15 {offsets = [0, 80], sizes = [4, 16], strides = [1, 1]} : vector<4x96xf32> to vector<4x16xf32>
    %48 = arith.truncf %45 : vector<4x16xf32> to vector<4x16xbf16>
    %49 = arith.truncf %46 : vector<4x16xf32> to vector<4x16xbf16>
    %cst_20 = arith.constant dense<0.000000e+00> : vector<4x4xf32>
    %50 = tpu.matmul %48, %49, %cst_20 {dimension_numbers = #tpu.dot_dimension_numbers<[1], [1], [0], [0], [0, 0, 1, 0], [], []>} : vector<4x16xbf16>, vector<4x16xbf16>, vector<4x4xf32> -> vector<4x4xf32>
    %cst_21 = arith.constant 2.500000e-01 : f32
    %51 = vector.broadcast %cst_21 : f32 to vector<4x4xf32>
    %52 = arith.mulf %50, %51 : vector<4x4xf32>
    %53 = arith.addf %52, %5 : vector<4x4xf32>
    %cst_22 = arith.constant dense<0xFF800000> : vector<4xf32>
    %54 = vector.multi_reduction <maximumf>, %53, %cst_22 [1] : vector<4x4xf32> to vector<4xf32>
    %55 = vector.shape_cast %54 : vector<4xf32> to vector<4x1xf32>
    %56 = vector.broadcast %55 : vector<4x1xf32> to vector<4x4xf32>
    %57 = arith.subf %53, %56 : vector<4x4xf32>
    %58 = math.exp %57 : vector<4x4xf32>
    %cst_23 = arith.constant dense<0.000000e+00> : vector<4xf32>
    %59 = vector.multi_reduction <add>, %58, %cst_23 [1] : vector<4x4xf32> to vector<4xf32>
    %60 = vector.shape_cast %59 : vector<4xf32> to vector<4x1xf32>
    %61 = tpu.reciprocal %60 {approx = true} : vector<4x1xf32> -> vector<4x1xf32>
    %62 = vector.broadcast %61 : vector<4x1xf32> to vector<4x4xf32>
    %63 = arith.mulf %58, %62 : vector<4x4xf32>
    %64 = arith.truncf %63 : vector<4x4xf32> to vector<4x4xbf16>
    %65 = arith.truncf %47 : vector<4x16xf32> to vector<4x16xbf16>
    %cst_24 = arith.constant dense<0.000000e+00> : vector<4x16xf32>
    %66 = tpu.matmul %64, %65, %cst_24 {dimension_numbers = #tpu.dot_dimension_numbers<[1], [0], [0], [1], [0, 0, 1, 1], [], []>} : vector<4x4xbf16>, vector<4x16xbf16>, vector<4x16xf32> -> vector<4x16xf32>
    %67 = arith.truncf %66 : vector<4x16xf32> to vector<4x16xbf16>
    %68 = vector.extract_strided_slice %17 {offsets = [16, 0], sizes = [16, 32], strides = [1, 1]} : vector<32x32xbf16> to vector<16x32xbf16>
    %cst_25 = arith.constant dense<0.000000e+00> : vector<4x32xf32>
    %69 = tpu.matmul %67, %68, %cst_25 {dimension_numbers = #tpu.dot_dimension_numbers<[1], [0], [0], [1], [0, 0, 1, 1], [], []>} : vector<4x16xbf16>, vector<16x32xbf16>, vector<4x32xf32> -> vector<4x32xf32>
    %70 = arith.addf %44, %69 : vector<4x32xf32>
    %c0_26 = arith.constant 0 : index
    %c0_27 = arith.constant 0 : index
    %c0_28 = arith.constant 0 : index
    %71 = vector.load %arg5[%c0_26, %c0_27, %c0_28] : memref<2x1x32xf32, #tpu.memory_space<vmem>>, vector<1x1x32xf32>
    %72 = vector.shape_cast %71 : vector<1x1x32xf32> to vector<1x32xf32>
    %73 = vector.broadcast %72 : vector<1x32xf32> to vector<4x32xf32>
    %74 = arith.addf %70, %73 : vector<4x32xf32>
    %75 = arith.addf %7, %74 : vector<4x32xf32>
    %c0_29 = arith.constant 0 : index
    %c0_30 = arith.constant 0 : index
    %c0_31 = arith.constant 0 : index
    %76 = vector.load %arg6[%c0_29, %c0_30, %c0_31] : memref<2x1x32xf32, #tpu.memory_space<vmem>>, vector<1x1x32xf32>
    %77 = vector.shape_cast %76 : vector<1x1x32xf32> to vector<1x32xf32>
    %c0_32 = arith.constant 0 : index
    %c0_33 = arith.constant 0 : index
    %c0_34 = arith.constant 0 : index
    %78 = vector.load %arg7[%c0_32, %c0_33, %c0_34] : memref<2x1x32xf32, #tpu.memory_space<vmem>>, vector<1x1x32xf32>
    %79 = vector.shape_cast %78 : vector<1x1x32xf32> to vector<1x32xf32>
    %cst_35 = arith.constant dense<0.000000e+00> : vector<4xf32>
    %80 = vector.multi_reduction <add>, %75, %cst_35 [1] : vector<4x32xf32> to vector<4xf32>
    %81 = vector.shape_cast %80 : vector<4xf32> to vector<4x1xf32>
    %cst_36 = arith.constant 3.200000e+01 : f32
    %82 = vector.broadcast %cst_36 : f32 to vector<4x1xf32>
    %83 = arith.divf %81, %82 : vector<4x1xf32>
    %84 = vector.broadcast %83 : vector<4x1xf32> to vector<4x32xf32>
    %85 = arith.subf %75, %84 : vector<4x32xf32>
    %86 = vector.broadcast %83 : vector<4x1xf32> to vector<4x32xf32>
    %87 = arith.subf %75, %86 : vector<4x32xf32>
    %88 = arith.mulf %85, %87 : vector<4x32xf32>
    %cst_37 = arith.constant dense<0.000000e+00> : vector<4xf32>
    %89 = vector.multi_reduction <add>, %88, %cst_37 [1] : vector<4x32xf32> to vector<4xf32>
    %90 = vector.shape_cast %89 : vector<4xf32> to vector<4x1xf32>
    %cst_38 = arith.constant 3.200000e+01 : f32
    %91 = vector.broadcast %cst_38 : f32 to vector<4x1xf32>
    %92 = arith.divf %90, %91 : vector<4x1xf32>
    %93 = vector.broadcast %83 : vector<4x1xf32> to vector<4x32xf32>
    %94 = arith.subf %75, %93 : vector<4x32xf32>
    %cst_39 = arith.constant 9.99999974E-6 : f32
    %95 = vector.broadcast %cst_39 : f32 to vector<4x1xf32>
    %96 = arith.addf %92, %95 : vector<4x1xf32>
    %97 = math.rsqrt %96 : vector<4x1xf32>
    %98 = vector.broadcast %97 : vector<4x1xf32> to vector<4x32xf32>
    %99 = arith.mulf %94, %98 : vector<4x32xf32>
    %100 = vector.broadcast %77 : vector<1x32xf32> to vector<4x32xf32>
    %101 = arith.mulf %99, %100 : vector<4x32xf32>
    %102 = vector.broadcast %79 : vector<1x32xf32> to vector<4x32xf32>
    %103 = arith.addf %101, %102 : vector<4x32xf32>
    %104 = arith.truncf %103 : vector<4x32xf32> to vector<4x32xbf16>
    %c0_40 = arith.constant 0 : index
    %c0_41 = arith.constant 0 : index
    %c0_42 = arith.constant 0 : index
    %105 = vector.load %arg8[%c0_40, %c0_41, %c0_42] : memref<2x32x32xbf16, #tpu.memory_space<vmem>>, vector<1x32x32xbf16>
    %106 = vector.shape_cast %105 : vector<1x32x32xbf16> to vector<32x32xbf16>
    %cst_43 = arith.constant dense<0.000000e+00> : vector<4x32xf32>
    %107 = tpu.matmul %104, %106, %cst_43 {dimension_numbers = #tpu.dot_dimension_numbers<[1], [0], [0], [1], [0, 0, 1, 1], [], []>} : vector<4x32xbf16>, vector<32x32xbf16>, vector<4x32xf32> -> vector<4x32xf32>
    %c0_44 = arith.constant 0 : index
    %c0_45 = arith.constant 0 : index
    %c0_46 = arith.constant 0 : index
    %108 = vector.load %arg9[%c0_44, %c0_45, %c0_46] : memref<2x1x32xf32, #tpu.memory_space<vmem>>, vector<1x1x32xf32>
    %109 = vector.shape_cast %108 : vector<1x1x32xf32> to vector<1x32xf32>
    %110 = vector.broadcast %109 : vector<1x32xf32> to vector<4x32xf32>
    %111 = arith.addf %107, %110 : vector<4x32xf32>
    %cst_47 = arith.constant 0.000000e+00 : f32
    %112 = vector.broadcast %cst_47 : f32 to vector<4x32xf32>
    %113 = arith.maximumf %111, %112 : vector<4x32xf32>
    %114 = arith.truncf %113 : vector<4x32xf32> to vector<4x32xbf16>
    %c0_48 = arith.constant 0 : index
    %c0_49 = arith.constant 0 : index
    %c0_50 = arith.constant 0 : index
    %115 = vector.load %arg10[%c0_48, %c0_49, %c0_50] : memref<2x32x32xbf16, #tpu.memory_space<vmem>>, vector<1x32x32xbf16>
    %116 = vector.shape_cast %115 : vector<1x32x32xbf16> to vector<32x32xbf16>
    %cst_51 = arith.constant dense<0.000000e+00> : vector<4x32xf32>
    %117 = tpu.matmul %114, %116, %cst_51 {dimension_numbers = #tpu.dot_dimension_numbers<[1], [0], [0], [1], [0, 0, 1, 1], [], []>} : vector<4x32xbf16>, vector<32x32xbf16>, vector<4x32xf32> -> vector<4x32xf32>
    %c0_52 = arith.constant 0 : index
    %c0_53 = arith.constant 0 : index
    %c0_54 = arith.constant 0 : index
    %118 = vector.load %arg11[%c0_52, %c0_53, %c0_54] : memref<2x1x32xf32, #tpu.memory_space<vmem>>, vector<1x1x32xf32>
    %119 = vector.shape_cast %118 : vector<1x1x32xf32> to vector<1x32xf32>
    %120 = vector.broadcast %119 : vector<1x32xf32> to vector<4x32xf32>
    %121 = arith.addf %117, %120 : vector<4x32xf32>
    %122 = arith.addf %103, %121 : vector<4x32xf32>
    %c0_55 = arith.constant 0 : index
    %c0_56 = arith.constant 0 : index
    %c0_57 = arith.constant 0 : index
    %123 = vector.load %arg12[%c0_55, %c0_56, %c0_57] : memref<2x1x32xf32, #tpu.memory_space<vmem>>, vector<1x1x32xf32>
    %124 = vector.shape_cast %123 : vector<1x1x32xf32> to vector<1x32xf32>
    %c0_58 = arith.constant 0 : index
    %c0_59 = arith.constant 0 : index
    %c0_60 = arith.constant 0 : index
    %125 = vector.load %arg13[%c0_58, %c0_59, %c0_60] : memref<2x1x32xf32, #tpu.memory_space<vmem>>, vector<1x1x32xf32>
    %126 = vector.shape_cast %125 : vector<1x1x32xf32> to vector<1x32xf32>
    %cst_61 = arith.constant dense<0.000000e+00> : vector<4xf32>
    %127 = vector.multi_reduction <add>, %122, %cst_61 [1] : vector<4x32xf32> to vector<4xf32>
    %128 = vector.shape_cast %127 : vector<4xf32> to vector<4x1xf32>
    %cst_62 = arith.constant 3.200000e+01 : f32
    %129 = vector.broadcast %cst_62 : f32 to vector<4x1xf32>
    %130 = arith.divf %128, %129 : vector<4x1xf32>
    %131 = vector.broadcast %130 : vector<4x1xf32> to vector<4x32xf32>
    %132 = arith.subf %122, %131 : vector<4x32xf32>
    %133 = vector.broadcast %130 : vector<4x1xf32> to vector<4x32xf32>
    %134 = arith.subf %122, %133 : vector<4x32xf32>
    %135 = arith.mulf %132, %134 : vector<4x32xf32>
    %cst_63 = arith.constant dense<0.000000e+00> : vector<4xf32>
    %136 = vector.multi_reduction <add>, %135, %cst_63 [1] : vector<4x32xf32> to vector<4xf32>
    %137 = vector.shape_cast %136 : vector<4xf32> to vector<4x1xf32>
    %cst_64 = arith.constant 3.200000e+01 : f32
    %138 = vector.broadcast %cst_64 : f32 to vector<4x1xf32>
    %139 = arith.divf %137, %138 : vector<4x1xf32>
    %140 = vector.broadcast %130 : vector<4x1xf32> to vector<4x32xf32>
    %141 = arith.subf %122, %140 : vector<4x32xf32>
    %cst_65 = arith.constant 9.99999974E-6 : f32
    %142 = vector.broadcast %cst_65 : f32 to vector<4x1xf32>
    %143 = arith.addf %139, %142 : vector<4x1xf32>
    %144 = math.rsqrt %143 : vector<4x1xf32>
    %145 = vector.broadcast %144 : vector<4x1xf32> to vector<4x32xf32>
    %146 = arith.mulf %141, %145 : vector<4x32xf32>
    %147 = vector.broadcast %124 : vector<1x32xf32> to vector<4x32xf32>
    %148 = arith.mulf %146, %147 : vector<4x32xf32>
    %149 = vector.broadcast %126 : vector<1x32xf32> to vector<4x32xf32>
    %150 = arith.addf %148, %149 : vector<4x32xf32>
    %151 = arith.truncf %150 : vector<4x32xf32> to vector<4x32xbf16>
    %c1 = arith.constant 1 : index
    %c0_66 = arith.constant 0 : index
    %c0_67 = arith.constant 0 : index
    %152 = vector.load %arg2[%c1, %c0_66, %c0_67] : memref<2x32x96xbf16, #tpu.memory_space<vmem>>, vector<1x32x96xbf16>
    %153 = vector.shape_cast %152 : vector<1x32x96xbf16> to vector<32x96xbf16>
    %cst_68 = arith.constant dense<0.000000e+00> : vector<4x96xf32>
    %154 = tpu.matmul %151, %153, %cst_68 {dimension_numbers = #tpu.dot_dimension_numbers<[1], [0], [0], [1], [0, 0, 1, 1], [], []>} : vector<4x32xbf16>, vector<32x96xbf16>, vector<4x96xf32> -> vector<4x96xf32>
    %c1_69 = arith.constant 1 : index
    %c0_70 = arith.constant 0 : index
    %c0_71 = arith.constant 0 : index
    %155 = vector.load %arg3[%c1_69, %c0_70, %c0_71] : memref<2x1x96xf32, #tpu.memory_space<vmem>>, vector<1x1x96xf32>
    %156 = vector.shape_cast %155 : vector<1x1x96xf32> to vector<1x96xf32>
    %157 = vector.broadcast %156 : vector<1x96xf32> to vector<4x96xf32>
    %158 = arith.addf %154, %157 : vector<4x96xf32>
    %c1_72 = arith.constant 1 : index
    %c0_73 = arith.constant 0 : index
    %c0_74 = arith.constant 0 : index
    %159 = vector.load %arg4[%c1_72, %c0_73, %c0_74] : memref<2x32x32xbf16, #tpu.memory_space<vmem>>, vector<1x32x32xbf16>
    %160 = vector.shape_cast %159 : vector<1x32x32xbf16> to vector<32x32xbf16>
    %cst_75 = arith.constant 0.000000e+00 : f32
    %161 = vector.broadcast %cst_75 : f32 to vector<4x32xf32>
    %162 = vector.extract_strided_slice %158 {offsets = [0, 0], sizes = [4, 16], strides = [1, 1]} : vector<4x96xf32> to vector<4x16xf32>
    %163 = vector.extract_strided_slice %158 {offsets = [0, 32], sizes = [4, 16], strides = [1, 1]} : vector<4x96xf32> to vector<4x16xf32>
    %164 = vector.extract_strided_slice %158 {offsets = [0, 64], sizes = [4, 16], strides = [1, 1]} : vector<4x96xf32> to vector<4x16xf32>
    %165 = arith.truncf %162 : vector<4x16xf32> to vector<4x16xbf16>
    %166 = arith.truncf %163 : vector<4x16xf32> to vector<4x16xbf16>
    %cst_76 = arith.constant dense<0.000000e+00> : vector<4x4xf32>
    %167 = tpu.matmul %165, %166, %cst_76 {dimension_numbers = #tpu.dot_dimension_numbers<[1], [1], [0], [0], [0, 0, 1, 0], [], []>} : vector<4x16xbf16>, vector<4x16xbf16>, vector<4x4xf32> -> vector<4x4xf32>
    %cst_77 = arith.constant 2.500000e-01 : f32
    %168 = vector.broadcast %cst_77 : f32 to vector<4x4xf32>
    %169 = arith.mulf %167, %168 : vector<4x4xf32>
    %170 = arith.addf %169, %5 : vector<4x4xf32>
    %cst_78 = arith.constant dense<0xFF800000> : vector<4xf32>
    %171 = vector.multi_reduction <maximumf>, %170, %cst_78 [1] : vector<4x4xf32> to vector<4xf32>
    %172 = vector.shape_cast %171 : vector<4xf32> to vector<4x1xf32>
    %173 = vector.broadcast %172 : vector<4x1xf32> to vector<4x4xf32>
    %174 = arith.subf %170, %173 : vector<4x4xf32>
    %175 = math.exp %174 : vector<4x4xf32>
    %cst_79 = arith.constant dense<0.000000e+00> : vector<4xf32>
    %176 = vector.multi_reduction <add>, %175, %cst_79 [1] : vector<4x4xf32> to vector<4xf32>
    %177 = vector.shape_cast %176 : vector<4xf32> to vector<4x1xf32>
    %178 = tpu.reciprocal %177 {approx = true} : vector<4x1xf32> -> vector<4x1xf32>
    %179 = vector.broadcast %178 : vector<4x1xf32> to vector<4x4xf32>
    %180 = arith.mulf %175, %179 : vector<4x4xf32>
    %181 = arith.truncf %180 : vector<4x4xf32> to vector<4x4xbf16>
    %182 = arith.truncf %164 : vector<4x16xf32> to vector<4x16xbf16>
    %cst_80 = arith.constant dense<0.000000e+00> : vector<4x16xf32>
    %183 = tpu.matmul %181, %182, %cst_80 {dimension_numbers = #tpu.dot_dimension_numbers<[1], [0], [0], [1], [0, 0, 1, 1], [], []>} : vector<4x4xbf16>, vector<4x16xbf16>, vector<4x16xf32> -> vector<4x16xf32>
    %184 = arith.truncf %183 : vector<4x16xf32> to vector<4x16xbf16>
    %185 = vector.extract_strided_slice %160 {offsets = [0, 0], sizes = [16, 32], strides = [1, 1]} : vector<32x32xbf16> to vector<16x32xbf16>
    %cst_81 = arith.constant dense<0.000000e+00> : vector<4x32xf32>
    %186 = tpu.matmul %184, %185, %cst_81 {dimension_numbers = #tpu.dot_dimension_numbers<[1], [0], [0], [1], [0, 0, 1, 1], [], []>} : vector<4x16xbf16>, vector<16x32xbf16>, vector<4x32xf32> -> vector<4x32xf32>
    %187 = arith.addf %161, %186 : vector<4x32xf32>
    %188 = vector.extract_strided_slice %158 {offsets = [0, 16], sizes = [4, 16], strides = [1, 1]} : vector<4x96xf32> to vector<4x16xf32>
    %189 = vector.extract_strided_slice %158 {offsets = [0, 48], sizes = [4, 16], strides = [1, 1]} : vector<4x96xf32> to vector<4x16xf32>
    %190 = vector.extract_strided_slice %158 {offsets = [0, 80], sizes = [4, 16], strides = [1, 1]} : vector<4x96xf32> to vector<4x16xf32>
    %191 = arith.truncf %188 : vector<4x16xf32> to vector<4x16xbf16>
    %192 = arith.truncf %189 : vector<4x16xf32> to vector<4x16xbf16>
    %cst_82 = arith.constant dense<0.000000e+00> : vector<4x4xf32>
    %193 = tpu.matmul %191, %192, %cst_82 {dimension_numbers = #tpu.dot_dimension_numbers<[1], [1], [0], [0], [0, 0, 1, 0], [], []>} : vector<4x16xbf16>, vector<4x16xbf16>, vector<4x4xf32> -> vector<4x4xf32>
    %cst_83 = arith.constant 2.500000e-01 : f32
    %194 = vector.broadcast %cst_83 : f32 to vector<4x4xf32>
    %195 = arith.mulf %193, %194 : vector<4x4xf32>
    %196 = arith.addf %195, %5 : vector<4x4xf32>
    %cst_84 = arith.constant dense<0xFF800000> : vector<4xf32>
    %197 = vector.multi_reduction <maximumf>, %196, %cst_84 [1] : vector<4x4xf32> to vector<4xf32>
    %198 = vector.shape_cast %197 : vector<4xf32> to vector<4x1xf32>
    %199 = vector.broadcast %198 : vector<4x1xf32> to vector<4x4xf32>
    %200 = arith.subf %196, %199 : vector<4x4xf32>
    %201 = math.exp %200 : vector<4x4xf32>
    %cst_85 = arith.constant dense<0.000000e+00> : vector<4xf32>
    %202 = vector.multi_reduction <add>, %201, %cst_85 [1] : vector<4x4xf32> to vector<4xf32>
    %203 = vector.shape_cast %202 : vector<4xf32> to vector<4x1xf32>
    %204 = tpu.reciprocal %203 {approx = true} : vector<4x1xf32> -> vector<4x1xf32>
    %205 = vector.broadcast %204 : vector<4x1xf32> to vector<4x4xf32>
    %206 = arith.mulf %201, %205 : vector<4x4xf32>
    %207 = arith.truncf %206 : vector<4x4xf32> to vector<4x4xbf16>
    %208 = arith.truncf %190 : vector<4x16xf32> to vector<4x16xbf16>
    %cst_86 = arith.constant dense<0.000000e+00> : vector<4x16xf32>
    %209 = tpu.matmul %207, %208, %cst_86 {dimension_numbers = #tpu.dot_dimension_numbers<[1], [0], [0], [1], [0, 0, 1, 1], [], []>} : vector<4x4xbf16>, vector<4x16xbf16>, vector<4x16xf32> -> vector<4x16xf32>
    %210 = arith.truncf %209 : vector<4x16xf32> to vector<4x16xbf16>
    %211 = vector.extract_strided_slice %160 {offsets = [16, 0], sizes = [16, 32], strides = [1, 1]} : vector<32x32xbf16> to vector<16x32xbf16>
    %cst_87 = arith.constant dense<0.000000e+00> : vector<4x32xf32>
    %212 = tpu.matmul %210, %211, %cst_87 {dimension_numbers = #tpu.dot_dimension_numbers<[1], [0], [0], [1], [0, 0, 1, 1], [], []>} : vector<4x16xbf16>, vector<16x32xbf16>, vector<4x32xf32> -> vector<4x32xf32>
    %213 = arith.addf %187, %212 : vector<4x32xf32>
    %c1_88 = arith.constant 1 : index
    %c0_89 = arith.constant 0 : index
    %c0_90 = arith.constant 0 : index
    %214 = vector.load %arg5[%c1_88, %c0_89, %c0_90] : memref<2x1x32xf32, #tpu.memory_space<vmem>>, vector<1x1x32xf32>
    %215 = vector.shape_cast %214 : vector<1x1x32xf32> to vector<1x32xf32>
    %216 = vector.broadcast %215 : vector<1x32xf32> to vector<4x32xf32>
    %217 = arith.addf %213, %216 : vector<4x32xf32>
    %218 = arith.addf %150, %217 : vector<4x32xf32>
    %c1_91 = arith.constant 1 : index
    %c0_92 = arith.constant 0 : index
    %c0_93 = arith.constant 0 : index
    %219 = vector.load %arg6[%c1_91, %c0_92, %c0_93] : memref<2x1x32xf32, #tpu.memory_space<vmem>>, vector<1x1x32xf32>
    %220 = vector.shape_cast %219 : vector<1x1x32xf32> to vector<1x32xf32>
    %c1_94 = arith.constant 1 : index
    %c0_95 = arith.constant 0 : index
    %c0_96 = arith.constant 0 : index
    %221 = vector.load %arg7[%c1_94, %c0_95, %c0_96] : memref<2x1x32xf32, #tpu.memory_space<vmem>>, vector<1x1x32xf32>
    %222 = vector.shape_cast %221 : vector<1x1x32xf32> to vector<1x32xf32>
    %cst_97 = arith.constant dense<0.000000e+00> : vector<4xf32>
    %223 = vector.multi_reduction <add>, %218, %cst_97 [1] : vector<4x32xf32> to vector<4xf32>
    %224 = vector.shape_cast %223 : vector<4xf32> to vector<4x1xf32>
    %cst_98 = arith.constant 3.200000e+01 : f32
    %225 = vector.broadcast %cst_98 : f32 to vector<4x1xf32>
    %226 = arith.divf %224, %225 : vector<4x1xf32>
    %227 = vector.broadcast %226 : vector<4x1xf32> to vector<4x32xf32>
    %228 = arith.subf %218, %227 : vector<4x32xf32>
    %229 = vector.broadcast %226 : vector<4x1xf32> to vector<4x32xf32>
    %230 = arith.subf %218, %229 : vector<4x32xf32>
    %231 = arith.mulf %228, %230 : vector<4x32xf32>
    %cst_99 = arith.constant dense<0.000000e+00> : vector<4xf32>
    %232 = vector.multi_reduction <add>, %231, %cst_99 [1] : vector<4x32xf32> to vector<4xf32>
    %233 = vector.shape_cast %232 : vector<4xf32> to vector<4x1xf32>
    %cst_100 = arith.constant 3.200000e+01 : f32
    %234 = vector.broadcast %cst_100 : f32 to vector<4x1xf32>
    %235 = arith.divf %233, %234 : vector<4x1xf32>
    %236 = vector.broadcast %226 : vector<4x1xf32> to vector<4x32xf32>
    %237 = arith.subf %218, %236 : vector<4x32xf32>
    %cst_101 = arith.constant 9.99999974E-6 : f32
    %238 = vector.broadcast %cst_101 : f32 to vector<4x1xf32>
    %239 = arith.addf %235, %238 : vector<4x1xf32>
    %240 = math.rsqrt %239 : vector<4x1xf32>
    %241 = vector.broadcast %240 : vector<4x1xf32> to vector<4x32xf32>
    %242 = arith.mulf %237, %241 : vector<4x32xf32>
    %243 = vector.broadcast %220 : vector<1x32xf32> to vector<4x32xf32>
    %244 = arith.mulf %242, %243 : vector<4x32xf32>
    %245 = vector.broadcast %222 : vector<1x32xf32> to vector<4x32xf32>
    %246 = arith.addf %244, %245 : vector<4x32xf32>
    %247 = arith.truncf %246 : vector<4x32xf32> to vector<4x32xbf16>
    %c1_102 = arith.constant 1 : index
    %c0_103 = arith.constant 0 : index
    %c0_104 = arith.constant 0 : index
    %248 = vector.load %arg8[%c1_102, %c0_103, %c0_104] : memref<2x32x32xbf16, #tpu.memory_space<vmem>>, vector<1x32x32xbf16>
    %249 = vector.shape_cast %248 : vector<1x32x32xbf16> to vector<32x32xbf16>
    %cst_105 = arith.constant dense<0.000000e+00> : vector<4x32xf32>
    %250 = tpu.matmul %247, %249, %cst_105 {dimension_numbers = #tpu.dot_dimension_numbers<[1], [0], [0], [1], [0, 0, 1, 1], [], []>} : vector<4x32xbf16>, vector<32x32xbf16>, vector<4x32xf32> -> vector<4x32xf32>
    %c1_106 = arith.constant 1 : index
    %c0_107 = arith.constant 0 : index
    %c0_108 = arith.constant 0 : index
    %251 = vector.load %arg9[%c1_106, %c0_107, %c0_108] : memref<2x1x32xf32, #tpu.memory_space<vmem>>, vector<1x1x32xf32>
    %252 = vector.shape_cast %251 : vector<1x1x32xf32> to vector<1x32xf32>
    %253 = vector.broadcast %252 : vector<1x32xf32> to vector<4x32xf32>
    %254 = arith.addf %250, %253 : vector<4x32xf32>
    %cst_109 = arith.constant 0.000000e+00 : f32
    %255 = vector.broadcast %cst_109 : f32 to vector<4x32xf32>
    %256 = arith.maximumf %254, %255 : vector<4x32xf32>
    %257 = arith.truncf %256 : vector<4x32xf32> to vector<4x32xbf16>
    %c1_110 = arith.constant 1 : index
    %c0_111 = arith.constant 0 : index
    %c0_112 = arith.constant 0 : index
    %258 = vector.load %arg10[%c1_110, %c0_111, %c0_112] : memref<2x32x32xbf16, #tpu.memory_space<vmem>>, vector<1x32x32xbf16>
    %259 = vector.shape_cast %258 : vector<1x32x32xbf16> to vector<32x32xbf16>
    %cst_113 = arith.constant dense<0.000000e+00> : vector<4x32xf32>
    %260 = tpu.matmul %257, %259, %cst_113 {dimension_numbers = #tpu.dot_dimension_numbers<[1], [0], [0], [1], [0, 0, 1, 1], [], []>} : vector<4x32xbf16>, vector<32x32xbf16>, vector<4x32xf32> -> vector<4x32xf32>
    %c1_114 = arith.constant 1 : index
    %c0_115 = arith.constant 0 : index
    %c0_116 = arith.constant 0 : index
    %261 = vector.load %arg11[%c1_114, %c0_115, %c0_116] : memref<2x1x32xf32, #tpu.memory_space<vmem>>, vector<1x1x32xf32>
    %262 = vector.shape_cast %261 : vector<1x1x32xf32> to vector<1x32xf32>
    %263 = vector.broadcast %262 : vector<1x32xf32> to vector<4x32xf32>
    %264 = arith.addf %260, %263 : vector<4x32xf32>
    %265 = arith.addf %246, %264 : vector<4x32xf32>
    %c1_117 = arith.constant 1 : index
    %c0_118 = arith.constant 0 : index
    %c0_119 = arith.constant 0 : index
    %266 = vector.load %arg12[%c1_117, %c0_118, %c0_119] : memref<2x1x32xf32, #tpu.memory_space<vmem>>, vector<1x1x32xf32>
    %267 = vector.shape_cast %266 : vector<1x1x32xf32> to vector<1x32xf32>
    %c1_120 = arith.constant 1 : index
    %c0_121 = arith.constant 0 : index
    %c0_122 = arith.constant 0 : index
    %268 = vector.load %arg13[%c1_120, %c0_121, %c0_122] : memref<2x1x32xf32, #tpu.memory_space<vmem>>, vector<1x1x32xf32>
    %269 = vector.shape_cast %268 : vector<1x1x32xf32> to vector<1x32xf32>
    %cst_123 = arith.constant dense<0.000000e+00> : vector<4xf32>
    %270 = vector.multi_reduction <add>, %265, %cst_123 [1] : vector<4x32xf32> to vector<4xf32>
    %271 = vector.shape_cast %270 : vector<4xf32> to vector<4x1xf32>
    %cst_124 = arith.constant 3.200000e+01 : f32
    %272 = vector.broadcast %cst_124 : f32 to vector<4x1xf32>
    %273 = arith.divf %271, %272 : vector<4x1xf32>
    %274 = vector.broadcast %273 : vector<4x1xf32> to vector<4x32xf32>
    %275 = arith.subf %265, %274 : vector<4x32xf32>
    %276 = vector.broadcast %273 : vector<4x1xf32> to vector<4x32xf32>
    %277 = arith.subf %265, %276 : vector<4x32xf32>
    %278 = arith.mulf %275, %277 : vector<4x32xf32>
    %cst_125 = arith.constant dense<0.000000e+00> : vector<4xf32>
    %279 = vector.multi_reduction <add>, %278, %cst_125 [1] : vector<4x32xf32> to vector<4xf32>
    %280 = vector.shape_cast %279 : vector<4xf32> to vector<4x1xf32>
    %cst_126 = arith.constant 3.200000e+01 : f32
    %281 = vector.broadcast %cst_126 : f32 to vector<4x1xf32>
    %282 = arith.divf %280, %281 : vector<4x1xf32>
    %283 = vector.broadcast %273 : vector<4x1xf32> to vector<4x32xf32>
    %284 = arith.subf %265, %283 : vector<4x32xf32>
    %cst_127 = arith.constant 9.99999974E-6 : f32
    %285 = vector.broadcast %cst_127 : f32 to vector<4x1xf32>
    %286 = arith.addf %282, %285 : vector<4x1xf32>
    %287 = math.rsqrt %286 : vector<4x1xf32>
    %288 = vector.broadcast %287 : vector<4x1xf32> to vector<4x32xf32>
    %289 = arith.mulf %284, %288 : vector<4x32xf32>
    %290 = vector.broadcast %267 : vector<1x32xf32> to vector<4x32xf32>
    %291 = arith.mulf %289, %290 : vector<4x32xf32>
    %292 = vector.broadcast %269 : vector<1x32xf32> to vector<4x32xf32>
    %293 = arith.addf %291, %292 : vector<4x32xf32>
    %294 = arith.truncf %293 : vector<4x32xf32> to vector<4x32xbf16>
    %c0_128 = arith.constant 0 : index
    %c0_129 = arith.constant 0 : index
    %295 = vector.load %arg14[%c0_128, %c0_129] : memref<32x6xbf16, #tpu.memory_space<vmem>>, vector<32x6xbf16>
    %cst_130 = arith.constant dense<0.000000e+00> : vector<4x6xf32>
    %296 = tpu.matmul %294, %295, %cst_130 {dimension_numbers = #tpu.dot_dimension_numbers<[1], [0], [0], [1], [0, 0, 1, 1], [], []>} : vector<4x32xbf16>, vector<32x6xbf16>, vector<4x6xf32> -> vector<4x6xf32>
    %c0_131 = arith.constant 0 : index
    %c0_132 = arith.constant 0 : index
    %297 = vector.load %arg15[%c0_131, %c0_132] : memref<1x6xf32, #tpu.memory_space<vmem>>, vector<1x6xf32>
    %298 = vector.broadcast %297 : vector<1x6xf32> to vector<4x6xf32>
    %299 = arith.addf %296, %298 : vector<4x6xf32>
    %c0_133 = arith.constant 0 : index
    %c0_134 = arith.constant 0 : index
    %c0_135 = arith.constant 0 : index
    %300 = vector.load %arg16[%c0_133, %c0_134, %c0_135] : memref<1x4x6xf32, #tpu.memory_space<vmem>>, vector<1x4x6xf32>
    %301 = vector.shape_cast %300 : vector<1x4x6xf32> to vector<4x6xf32>
    %302 = vector.shape_cast %299 : vector<4x6xf32> to vector<1x4x6xf32>
    tpu.vector_store %arg16[%c0_133, %c0_134, %c0_135], %302 {strides = array<i32>} : memref<1x4x6xf32, #tpu.memory_space<vmem>>, vector<1x4x6xf32>,
    return
  }
  func.func @transform_0(%arg0: i32) -> (i32, i32, i32) {
    %c0_i32 = arith.constant 0 : i32
    %c0_i32_0 = arith.constant 0 : i32
    %c0_i32_1 = arith.constant 0 : i32
    return %arg0, %c0_i32, %c0_i32_0 : i32, i32, i32
  }
  func.func @transform_1(%arg0: i32) -> (i32, i32, i32) {
    %c0_i32 = arith.constant 0 : i32
    %c0_i32_0 = arith.constant 0 : i32
    %c0_i32_1 = arith.constant 0 : i32
    %c0_i32_2 = arith.constant 0 : i32
    return %c0_i32, %c0_i32_0, %c0_i32_1 : i32, i32, i32
  }
  func.func @transform_2(%arg0: i32) -> (i32, i32, i32) {
    %c0_i32 = arith.constant 0 : i32
    %c0_i32_0 = arith.constant 0 : i32
    %c0_i32_1 = arith.constant 0 : i32
    %c0_i32_2 = arith.constant 0 : i32
    return %c0_i32, %c0_i32_0, %c0_i32_1 : i32, i32, i32
  }
  func.func @transform_3(%arg0: i32) -> (i32, i32, i32) {
    %c0_i32 = arith.constant 0 : i32
    %c0_i32_0 = arith.constant 0 : i32
    %c0_i32_1 = arith.constant 0 : i32
    %c0_i32_2 = arith.constant 0 : i32
    return %c0_i32, %c0_i32_0, %c0_i32_1 : i32, i32, i32
  }
  func.func @transform_4(%arg0: i32) -> (i32, i32, i32) {
    %c0_i32 = arith.constant 0 : i32
    %c0_i32_0 = arith.constant 0 : i32
    %c0_i32_1 = arith.constant 0 : i32
    %c0_i32_2 = arith.constant 0 : i32
    return %c0_i32, %c0_i32_0, %c0_i32_1 : i32, i32, i32
  }
  func.func @transform_5(%arg0: i32) -> (i32, i32, i32) {
    %c0_i32 = arith.constant 0 : i32
    %c0_i32_0 = arith.constant 0 : i32
    %c0_i32_1 = arith.constant 0 : i32
    %c0_i32_2 = arith.constant 0 : i32
    return %c0_i32, %c0_i32_0, %c0_i32_1 : i32, i32, i32
  }
  func.func @transform_6(%arg0: i32) -> (i32, i32, i32) {
    %c0_i32 = arith.constant 0 : i32
    %c0_i32_0 = arith.constant 0 : i32
    %c0_i32_1 = arith.constant 0 : i32
    %c0_i32_2 = arith.constant 0 : i32
    return %c0_i32, %c0_i32_0, %c0_i32_1 : i32, i32, i32
  }
  func.func @transform_7(%arg0: i32) -> (i32, i32, i32) {
    %c0_i32 = arith.constant 0 : i32
    %c0_i32_0 = arith.constant 0 : i32
    %c0_i32_1 = arith.constant 0 : i32
    %c0_i32_2 = arith.constant 0 : i32
    return %c0_i32, %c0_i32_0, %c0_i32_1 : i32, i32, i32
  }
  func.func @transform_8(%arg0: i32) -> (i32, i32, i32) {
    %c0_i32 = arith.constant 0 : i32
    %c0_i32_0 = arith.constant 0 : i32
    %c0_i32_1 = arith.constant 0 : i32
    %c0_i32_2 = arith.constant 0 : i32
    return %c0_i32, %c0_i32_0, %c0_i32_1 : i32, i32, i32
  }
  func.func @transform_9(%arg0: i32) -> (i32, i32, i32) {
    %c0_i32 = arith.constant 0 : i32
    %c0_i32_0 = arith.constant 0 : i32
    %c0_i32_1 = arith.constant 0 : i32
    %c0_i32_2 = arith.constant 0 : i32
    return %c0_i32, %c0_i32_0, %c0_i32_1 : i32, i32, i32
  }
  func.func @transform_10(%arg0: i32) -> (i32, i32, i32) {
    %c0_i32 = arith.constant 0 : i32
    %c0_i32_0 = arith.constant 0 : i32
    %c0_i32_1 = arith.constant 0 : i32
    %c0_i32_2 = arith.constant 0 : i32
    return %c0_i32, %c0_i32_0, %c0_i32_1 : i32, i32, i32
  }
  func.func @transform_11(%arg0: i32) -> (i32, i32, i32) {
    %c0_i32 = arith.constant 0 : i32
    %c0_i32_0 = arith.constant 0 : i32
    %c0_i32_1 = arith.constant 0 : i32
    %c0_i32_2 = arith.constant 0 : i32
    return %c0_i32, %c0_i32_0, %c0_i32_1 : i32, i32, i32
  }
  func.func @transform_12(%arg0: i32) -> (i32, i32, i32) {
    %c0_i32 = arith.constant 0 : i32
    %c0_i32_0 = arith.constant 0 : i32
    %c0_i32_1 = arith.constant 0 : i32
    %c0_i32_2 = arith.constant 0 : i32
    return %c0_i32, %c0_i32_0, %c0_i32_1 : i32, i32, i32
  }
  func.func @transform_13(%arg0: i32) -> (i32, i32) {
    %c0_i32 = arith.constant 0 : i32
    %c0_i32_0 = arith.constant 0 : i32
    %c0_i32_1 = arith.constant 0 : i32
    return %c0_i32, %c0_i32_0 : i32, i32
  }
  func.func @transform_14(%arg0: i32) -> (i32, i32) {
    %c0_i32 = arith.constant 0 : i32
    %c0_i32_0 = arith.constant 0 : i32
    %c0_i32_1 = arith.constant 0 : i32
    return %c0_i32, %c0_i32_0 : i32, i32
  }
  func.func @transform_15(%arg0: i32) -> (i32, i32, i32) {
    %c0_i32 = arith.constant 0 : i32
    %c0_i32_0 = arith.constant 0 : i32
    %c0_i32_1 = arith.constant 0 : i32
    return %arg0, %c0_i32, %c0_i32_0 : i32, i32, i32
  }
}

</mosaic_0001>

<bundles_post_ra>
// kernel: forward.4
= control target key start
LH: loop header
LB: loop body
LE: loop exit
PB: predicated region body
PF: predicated region fallthrough
CT: control target
= control target key end

     0   :  { %s2353_s12 = smov 0   ;;  %s2941_s0 = inlined_call_operand.vmem [shape: f32[8,10,160], index: 0, kind: input, shape index: {}]   ;;  %s2942_s1 = inlined_call_operand.vmem [shape: bf16[3,160,128], index: 1, kind: input, shape index: {}]   ;;  %s2943_s2 = inlined_call_operand.vmem [shape: f32[1,128], index: 2, kind: input, shape index: {}]   ;;  %s2944_s3 = inlined_call_operand.vmem [shape: f32[8,8,128], index: 3, kind: output, shape index: {}]  }
   0x1 LB: > { %s1871_s13 = sadd.s32 4294967295, %s2330_s12   ;;  %p1875_p0 = scmp.ge.s32.totalorder %s2330_s12, 1  ;;  %s2330_s12 = sphi %s2353_s12, %s13_s12  }
   0x2   : > { %p139_p1 = scmp.lt.s32.totalorder %s2330_s12, 3 }
   0x4   : > { %p140_p2 = pnand %p1875_p0, %p139_p1 }
   0x5   : > { %v2204_v0 = vld [vmem:[%s2942_s1 + $0x50] sm:$0xff] (!%p140_p2)   ;;  %v2332_v1 = vmov (!%p140_p2), 0   ;;  %v2205_v2 = vld [vmem:[%s2942_s1] sm:$0xff] (!%p140_p2)   ;;  %v2206_v3 = vld [vmem:[%s2942_s1 + $0x58] sm:$0xff] (!%p140_p2)   ;;  %s1876_s22 = sshll.u32 (!%p140_p2), %s1871_s13, 2  ;;  %vm300_vm0 = vcmask (!%p140_p2), 261120  }
   0x6   : > { %143 = sbr.rel (%p140_p2) target bundleno = 468 (0x1d4), region = 32  ;;  %304 = vmatprep.subr.bf16.mxu0 (!%p140_p2), %v2332_v1  ;;  %406 = vmatprep.subr.bf16.mxu1 (!%p140_p2), %v2332_v1  ;;  %v2207_v4 = vld [vmem:[%s2942_s1 + $0x8] sm:$0xff] (!%p140_p2)   ;;  %v2208_v5 = vld [vmem:[%s2942_s1 + $0x60] sm:$0xff] (!%p140_p2)   ;;  %p165_p3 = scmp.lt.s32.totalorder (!%p140_p2), %s1876_s22, 7  ;;  %v2209_v6 = vld [vmem:[%s2942_s1 + $0x10] sm:$0xff] (!%p140_p2)  }
   0x7   : > { %305 = vmatpush1.bf16.msra.mxu0 (!%p140_p2), %v2204_v0  ;;  %407 = vmatpush1.bf16.msra.mxu1 (!%p140_p2), %v2205_v2  ;;  %v2210_v7 = vld [vmem:[%s2942_s1 + $0x68] sm:$0xff] (!%p140_p2)   ;;  %v2211_v8 = vld [vmem:[%s2942_s1 + $0x18] sm:$0xff] (!%p140_p2)   ;;  %v2212_v9 = vld [vmem:[%s2942_s1 + $0x70] sm:$0xff] (!%p140_p2)  }
   0x8   : > { %306 = vmatprep.subr.bf16.mxu0 (!%p140_p2), %v2332_v1  ;;  %408 = vmatprep.subr.bf16.mxu1 (!%p140_p2), %v2332_v1  ;;  %v2213_v10 = vld [vmem:[%s2942_s1 + $0x20] sm:$0xff] (!%p140_p2)   ;;  %v2214_v11 = vld [vmem:[%s2942_s1 + $0x78] sm:$0xff] (!%p140_p2)   ;;  %v2215_v12 = vld [vmem:[%s2942_s1 + $0x28] sm:$0xff] (!%p140_p2)  }
   0x9   : > { %v2216_v13 = vld [vmem:[%s2942_s1 + $0x80] sm:$0xff] (!%p140_p2)   ;;  %v2217_v19 = vld [vmem:[%s2942_s1 + $0x30] sm:$0xff] (!%p140_p2)   ;;  %v2218_v24 = vld [vmem:[%s2942_s1 + $0x88] sm:$0xff] (!%p140_p2)  }
   0xa   : > { %v2219_v25 = vld [vmem:[%s2942_s1 + $0x38] sm:$0xff] (!%p140_p2)   ;;  %v2220_v28 = vld [vmem:[%s2942_s1 + $0x90] sm:$0xff] (!%p140_p2)   ;;  %v2221_v29 = vld [vmem:[%s2942_s1 + $0x40] sm:$0xff] (!%p140_p2)  }
   0xb   : > { %307 = vmatpush1.bf16.msra.mxu0 (!%p140_p2), %v2206_v3  ;;  %409 = vmatpush1.bf16.msra.mxu1 (!%p140_p2), %v2207_v4  ;;  %v2222_v32 = vld [vmem:[%s2942_s1 + $0x98] sm:$0xff] (!%p140_p2)   ;;  %v2223_v33 = vld [vmem:[%s2942_s1 + $0x48] sm:$0xff] (!%p140_p2)   ;;  %v2224_v35 = vld [vmem:[%s2942_s1 + $0xa0] sm:$0xff] (!%p140_p2)  }
   0xc   : > { %308 = vmatprep.subr.bf16.mxu0 (!%p140_p2), %v2332_v1  ;;  %410 = vmatprep.subr.bf16.mxu1 (!%p140_p2), %v2332_v1  ;;  %v2225_v36 = vld [vmem:[%s2942_s1 + $0x50] sm:$0xff] (!%p140_p2)   ;;  %v2226_v39 = vld [vmem:[%s2942_s1 + $0xa8] sm:$0xff] (!%p140_p2)   ;;  %v2227_v41 = vld [vmem:[%s2942_s1 + $0x58] sm:$0xff] (!%p140_p2)  }
   0xd   : > { %s2946_s22 = smov (!%p165_p3, %s1876_s22), 7  ;;  %v2228_v45 = vld [vmem:[%s2942_s1 + $0xb0] sm:$0xff]   ;;  %v2229_v46 = vld [vmem:[%s2942_s1 + $0x60] sm:$0xff]   ;;  %v2230_v49 = vld [vmem:[%s2942_s1 + $0xb8] sm:$0xff]  }
   0xe   : > { %s2194_s6 = sshll.u32 %s2946_s22, 5  ;;  %v2231_v50 = vld [vmem:[%s2942_s1 + $0x68] sm:$0xff]   ;;  %v2232_v51 = vld [vmem:[%s2942_s1 + $0xc0] sm:$0xff]   ;;  %v2233_v52 = vld [vmem:[%s2942_s1 + $0x70] sm:$0xff]  }
   0xf   : > { %309 = vmatpush1.bf16.msra.mxu0 %v2208_v5  ;;  %411 = vmatpush1.bf16.msra.mxu1 %v2209_v6  ;;  %s2407_s11 = scalar_lea.vmem %s2941_s0, %s2194_s6  ;;  %v2234_v53 = vld [vmem:[%s2942_s1 + $0xc8] sm:$0xff]   ;;  %v2235_v54 = vld [vmem:[%s2942_s1 + $0x78] sm:$0xff]   ;;  %v2236_v55 = vld [vmem:[%s2942_s1 + $0xd0] sm:$0xff]  }
  0x10   : > { %310 = vmatprep.subr.bf16.mxu0 %v2332_v1  ;;  %412 = vmatprep.subr.bf16.mxu1 %v2332_v1  ;;  %v179_v14 = vld [vmem:[%s2407_s11 + $0x8] sm:$0xff]  ;;  %v181_v15 = vld [vmem:[%s2407_s11 + $0x18] sm:$0x3]  ;;  %v178_v17 = vld [vmem:[%s2407_s11] sm:$0xff] }
  0x11   : > { %v183_v16 = vpack.c.bf16 %v181_v15, %v179_v14  ;;  %v180_v18 = vld [vmem:[%s2407_s11 + $0x10] sm:$0x3]  ;;  %v1956_v38 = vld [vmem:[%s2407_s11 + $0x28] sm:$0xff]  ;;  %v1958_v40 = vld [vmem:[%s2407_s11 + $0x38] sm:$0x3] }
  0x12   : > { %v2430_v23 = vpack.c.bf16 %v180_v18, %v178_v17  ;;  %v2477_v42 = vpack.c.bf16 %v1958_v40, %v1956_v38  ;;  %v2237_v56 = vld [vmem:[%s2942_s1 + $0x80] sm:$0xff]   ;;  %v1957_v58 = vld [vmem:[%s2407_s11 + $0x30] sm:$0x3]  ;;  %v2238_v59 = vld [vmem:[%s2942_s1 + $0xd8] sm:$0xff]  }
  0x13   : > { %311 = vmatpush1.bf16.msra.mxu0 %v2210_v7  ;;  %413 = vmatpush1.bf16.msra.mxu1 %v2211_v8  ;;  %v233_v20 = vshrl.u32 %v183_v16, 16  ;;  %v235_v21 = vshll.u32 %v183_v16, 16  ;;  %v470_v37 = vrot.slane %v183_v16, 1  ;;  %v1955_v57 = vld [vmem:[%s2407_s11 + $0x20] sm:$0xff]  ;;  %v2239_v61 = vld [vmem:[%s2942_s1 + $0x88] sm:$0xff]   ;;  %v2241_v0 = vld [vmem:[%s2942_s1 + $0x90] sm:$0xff]  }
  0x14   : > { %312 = vmatprep.subr.bf16.mxu0 %v2332_v1  ;;  %414 = vmatprep.subr.bf16.mxu1 %v2332_v1  ;;  %v228_v27 = vshll.u32 %v2430_v23, 16  ;;  %v226_v30 = vshrl.u32 %v2430_v23, 16  ;;  %v643_v43 = vshrl.u32 %v2477_v42, 16  ;;  %v645_v44 = vshll.u32 %v2477_v42, 16  ;;  %v2240_v62 = vld [vmem:[%s2942_s1 + $0xe0] sm:$0xff]   ;;  %v2242_v2 = vld [vmem:[%s2942_s1 + $0xe8] sm:$0xff]  }
  0x15   : > { %1922 = vmatprep.mubr.msk.bf16.mxu1 %vm300_vm0, %v183_v16  ;;  %v237_v22 = vrot.slane %v235_v21, 1  ;;  %v2529_v60 = vpack.c.bf16 %v1957_v58, %v1955_v57  ;;  %v2243_v5 = vld [vmem:[%s2942_s1 + $0x98] sm:$0xff]   ;;  %v469_v6 = vrot.slane %v2430_v23, 1  ;;  %v2244_v8 = vld [vmem:[%s2942_s1] sm:$0xff]   ;;  %v2249_v14 = vld [vmem:[%s2942_s1 + $0xb0] sm:$0xff]  }
  0x16   : > { %v230_v31 = vrot.slane %v228_v27, 1  ;;  %v647_v47 = vrot.slane %v645_v44, 1  ;;  %v2250_v15 = vld [vmem:[%s2942_s1 + $0x18] sm:$0xff]   ;;  %v2252_v17 = vld [vmem:[%s2942_s1 + $0x20] sm:$0xff]   ;;  %v2256_v21 = vld [vmem:[%s2942_s1 + $0x30] sm:$0xff]  }
  0x17   : > { %313 = vmatpush1.bf16.msra.mxu0 %v2212_v9  ;;  %415 = vmatpush1.bf16.msra.mxu1 %v2213_v10  ;;  %v238_v26 = vor.u32 %v237_v22, %v233_v20  ;;  %v638_v63 = vshll.u32 %v2529_v60, 16  ;;  %v636_v3 = vshrl.u32 %v2529_v60, 16  ;;  %v2245_v9 = vld [vmem:[%s2942_s1 + $0xa0] sm:$0xff]   ;;  %v878_v10 = vrot.slane %v2477_v42, 1  ;;  %v2251_v16 = vld [vmem:[%s2942_s1 + $0xb8] sm:$0xff]   ;;  %v2255_v20 = vld [vmem:[%s2942_s1 + $0xc8] sm:$0xff]  }
  0x18   : > { %314 = vmatprep.subr.bf16.mxu0 %v2332_v1  ;;  %416 = vmatprep.subr.bf16.mxu1 %v2332_v1  ;;  %v231_v34 = vor.u32 %v230_v31, %v226_v30  ;;  %v648_v48 = vor.u32 %v647_v47, %v643_v43  ;;  %v2253_v18 = vld [vmem:[%s2942_s1 + $0xc0] sm:$0xff]   ;;  %v2257_v22 = vld [vmem:[%s2942_s1 + $0xd0] sm:$0xff]   ;;  %v2262_v31 = vld [vmem:[%s2942_s1 + $0x48] sm:$0xff]  }
  0x19   : > { %1911 = vmatprep.mubr.msk.bf16.mxu0 %vm300_vm0, %v238_v26  ;;  %v640_v4 = vrot.slane %v638_v63, 1  ;;  %v2259_v26 = vld [vmem:[%s2942_s1 + $0xd8] sm:$0xff]   ;;  %v2267_v40 = vld [vmem:[%s2942_s1 + $0x8] sm:$0xff]  }
  0x1a   : > { %v2270_v43 = vld [vmem:[%s2942_s1 + $0x68] sm:$0xff]   ;;  %v2271_v44 = vld [vmem:[%s2942_s1 + $0x18] sm:$0xff]  }
  0x1b   : > { %315 = vmatpush1.bf16.msra.mxu0 %v2214_v11  ;;  %417 = vmatpush1.bf16.msra.mxu1 %v2215_v12  ;;  %v641_v7 = vor.u32 %v640_v4, %v636_v3  ;;  %v2246_v11 = vld [vmem:[%s2942_s1 + $0x8] sm:$0xff]   ;;  %v2274_v47 = vld [vmem:[%s2942_s1 + $0x78] sm:$0xff]  }
  0x1c   : > { %316 = vmatprep.subr.bf16.mxu0 %v2332_v1  ;;  %418 = vmatprep.subr.bf16.mxu1 %v2332_v1  ;;  %v2247_v12 = vld [vmem:[%s2942_s1 + $0xa8] sm:$0xff]   ;;  %v2279_v57 = vld [vmem:[%s2942_s1 + $0x38] sm:$0xff]  }
  0x1d   : > { %v2283_v3 = vld [vmem:[%s2942_s1 + $0x48] sm:$0xff]  }
  0x1f   : > { %317 = vmatpush1.bf16.msra.mxu0 %v2216_v13  ;;  %419 = vmatpush1.bf16.msra.mxu1 %v2217_v19  ;;  %v2248_v13 = vld [vmem:[%s2942_s1 + $0x10] sm:$0xff]   ;;  %v2254_v19 = vld [vmem:[%s2942_s1 + $0x28] sm:$0xff]  }
  0x20   : > { %318 = vmatprep.subr.bf16.mxu0 %v2332_v1  ;;  %420 = vmatprep.subr.bf16.mxu1 %v2332_v1 }
  0x23   : > { %319 = vmatpush1.bf16.msra.mxu0 %v2218_v24  ;;  %421 = vmatpush1.bf16.msra.mxu1 %v2219_v25  ;;  %v2037_v24 = vld [vmem:[%s2407_s11 + $0x58] sm:$0x3] }
  0x24   : > { %320 = vmatprep.subr.bf16.mxu0 %v2332_v1  ;;  %422 = vmatprep.subr.bf16.mxu1 %v2332_v1  ;;  %v2258_v25 = vld [vmem:[%s2942_s1 + $0x38] sm:$0xff]  }
  0x27   : > { %321 = vmatpush1.bf16.msra.mxu0 %v2220_v28  ;;  %423 = vmatpush1.bf16.msra.mxu1 %v2221_v29  ;;  %v2260_v28 = vld [vmem:[%s2942_s1 + $0x40] sm:$0xff]  }
  0x28   : > { %322 = vmatprep.subr.bf16.mxu0 %v2332_v1  ;;  %424 = vmatprep.subr.bf16.mxu1 %v2332_v1  ;;  %v2261_v29 = vld [vmem:[%s2942_s1 + $0xe0] sm:$0xff]  }
  0x2b   : > { %323 = vmatpush1.bf16.msra.mxu0 %v2222_v32  ;;  %425 = vmatpush1.bf16.msra.mxu1 %v2223_v33  ;;  %v2263_v32 = vld [vmem:[%s2942_s1 + $0xe8] sm:$0xff]  }
  0x2c   : > { %535 = vmatprep.subr.bf16.mxu0 %v2332_v1  ;;  %713 = vmatprep.subr.bf16.mxu1 %v2332_v1 }
  0x2e   : > { %337 = vmatmul.mubr.bf16.vlgmr.msra.gmra.mrb[0].mxu0 %v231_v34  ;;  %439 = vmatmul.mubr.bf16.vlgmr.msra.gmra.mrb[0].mxu1 %v2430_v23  ;;  %v2035_v23 = vld [vmem:[%s2407_s11 + $0x48] sm:$0xff] }
  0x2f   : > { %536 = vmatpush1.bf16.msra.mxu0 %v2224_v35  ;;  %714 = vmatpush1.bf16.msra.mxu1 %v2225_v36  ;;  %v2624_v27 = vpack.c.bf16 %v2037_v24, %v2035_v23  ;;  %v877_v35 = vrot.slane %v2529_v60, 1  ;;  %v2264_v36 = vld [vmem:[%s2942_s1 + $0x50] sm:$0xff]   ;;  %v2113_v23 = vld [vmem:[%s2407_s11 + $0x60] sm:$0xff] }
  0x30   : > { %537 = vmatprep.subr.bf16.mxu0 %v2332_v1  ;;  %715 = vmatprep.subr.bf16.mxu1 %v2332_v1  ;;  %v2115_v24 = vld [vmem:[%s2407_s11 + $0x70] sm:$0x3] }
  0x31   : > { %1953 = vmatprep.mubr.msk.bf16.mxu0 %vm300_vm0, %v470_v37  ;;  %1989 = vmatprep.mubr.msk.bf16.mxu1 %vm300_vm0, %v648_v48  ;;  %v1054_v30 = vshll.u32 %v2624_v27, 16  ;;  %v1052_v33 = vshrl.u32 %v2624_v27, 16  ;;  %v2265_v37 = vld [vmem:[%s2942_s1] sm:$0xff]   ;;  %v2275_v48 = vld [vmem:[%s2942_s1 + $0x28] sm:$0xff]  }
  0x33   : > { %538 = vmatpush1.bf16.msra.mxu0 %v2226_v39  ;;  %716 = vmatpush1.bf16.msra.mxu1 %v2227_v41  ;;  %v1056_v34 = vrot.slane %v1054_v30, 1  ;;  %v2266_v39 = vld [vmem:[%s2942_s1 + $0x58] sm:$0xff]   ;;  %v2268_v41 = vld [vmem:[%s2942_s1 + $0x60] sm:$0xff]   ;;  %v2301_v30 = vld [vmem:[%s2942_s1 + $0x90] sm:$0xff]  }
  0x34   : > { %539 = vmatprep.subr.bf16.mxu0 %v2332_v1  ;;  %717 = vmatprep.subr.bf16.mxu1 %v2332_v1 }
  0x35   : > { %v1057_v38 = vor.u32 %v1056_v34, %v1052_v33  ;;  %v2303_v34 = vld [vmem:[%s2942_s1 + $0x98] sm:$0xff]  }
  0x37   : > { %540 = vmatpush1.bf16.msra.mxu0 %v2228_v45  ;;  %718 = vmatpush1.bf16.msra.mxu1 %v2229_v46  ;;  %v2272_v45 = vld [vmem:[%s2942_s1 + $0x70] sm:$0xff]   ;;  %v2273_v46 = vld [vmem:[%s2942_s1 + $0x20] sm:$0xff]  }
  0x38   : > { %541 = vmatprep.subr.bf16.mxu0 %v2332_v1  ;;  %719 = vmatprep.subr.bf16.mxu1 %v2332_v1 }
  0x3b   : > { %542 = vmatpush1.bf16.msra.mxu0 %v2230_v49  ;;  %720 = vmatpush1.bf16.msra.mxu1 %v2231_v50  ;;  %v2276_v49 = vld [vmem:[%s2942_s1 + $0x80] sm:$0xff]  }
  0x3c   : > { %543 = vmatprep.subr.bf16.mxu0 %v2332_v1  ;;  %721 = vmatprep.subr.bf16.mxu1 %v2332_v1  ;;  %v2034_v50 = vld [vmem:[%s2407_s11 + $0x40] sm:$0xff] }
  0x3f   : > { %544 = vmatpush1.bf16.msra.mxu0 %v2232_v51  ;;  %722 = vmatpush1.bf16.msra.mxu1 %v2233_v52  ;;  %v2036_v51 = vld [vmem:[%s2407_s11 + $0x50] sm:$0x3] }
  0x40   : > { %545 = vmatprep.subr.bf16.mxu0 %v2332_v1  ;;  %723 = vmatprep.subr.bf16.mxu1 %v2332_v1  ;;  %v2277_v52 = vld [vmem:[%s2942_s1 + $0x30] sm:$0xff]  }
  0x43   : > { %546 = vmatpush1.bf16.msra.mxu0 %v2234_v53  ;;  %724 = vmatpush1.bf16.msra.mxu1 %v2235_v54  ;;  %v2708_v53 = vpack.c.bf16 %v2036_v51, %v2034_v50  ;;  %v2278_v54 = vld [vmem:[%s2942_s1 + $0x88] sm:$0xff]   ;;  %v2316_v50 = vld [vmem:[%s2942_s1 + $0x30] sm:$0xff]  }
  0x44   : > { %547 = vmatprep.subr.bf16.mxu0 %v2332_v1  ;;  %725 = vmatprep.subr.bf16.mxu1 %v2332_v1  ;;  %v2317_v51 = vld [vmem:[%s2942_s1 + $0xd0] sm:$0xff]  }
  0x45   : > { %v1047_v58 = vshll.u32 %v2708_v53, 16 }
  0x47   : > { %548 = vmatpush1.bf16.msra.mxu0 %v2236_v55  ;;  %726 = vmatpush1.bf16.msra.mxu1 %v2237_v56  ;;  %v2114_v55 = vld [vmem:[%s2407_s11 + $0x68] sm:$0xff]  ;;  %v2116_v56 = vld [vmem:[%s2407_s11 + $0x78] sm:$0x3]  ;;  %v1049_v63 = vrot.slane %v1047_v58, 1  ;;  %s1880_s11 = sshll.u32 %s2946_s22, 3 }
  0x48   : > { %549 = vmatprep.subr.bf16.mxu0 %v2332_v1  ;;  %727 = vmatprep.subr.bf16.mxu1 %v2332_v1  ;;  %s2929_s19 = scalar_lea.vmem %s2944_s3, %s1880_s11 }
  0x4b   : > { %550 = vmatpush1.bf16.msra.mxu0 %v2238_v59  ;;  %728 = vmatpush1.bf16.msra.mxu1 %v2239_v61  ;;  %v2721_v59 = vpack.c.bf16 %v2116_v56, %v2114_v55  ;;  %v2281_v61 = vld [vmem:[%s2942_s1 + $0x40] sm:$0xff]   ;;  %v2322_v56 = vld [vmem:[%s2942_s1 + $0x48] sm:$0xff]  }
  0x4c   : > { %551 = vmatprep.subr.bf16.mxu0 %v2332_v1  ;;  %729 = vmatprep.subr.bf16.mxu1 %v2332_v1  ;;  %v2321_v55 = vld [vmem:[%s2942_s1 + $0xe0] sm:$0xff]  }
  0x4f   : > { %552 = vmatpush1.bf16.msra.mxu0 %v2240_v62  ;;  %730 = vmatpush1.bf16.msra.mxu1 %v2241_v0  ;;  %v1045_v62 = vshrl.u32 %v2708_v53, 16  ;;  %v1463_v0 = vshll.u32 %v2721_v59, 16 }
  0x50   : > { %553 = vmatprep.subr.bf16.mxu0 %v2332_v1  ;;  %731 = vmatprep.subr.bf16.mxu1 %v2332_v1 }
  0x51   : > { %v1050_v4 = vor.u32 %v1049_v63, %v1045_v62 }
  0x53   : > { %554 = vmatpush1.bf16.msra.mxu0 %v2242_v2  ;;  %732 = vmatpush1.bf16.msra.mxu1 %v2243_v5  ;;  %v2282_v2 = vld [vmem:[%s2942_s1 + $0x98] sm:$0xff]   ;;  %v1461_v5 = vshrl.u32 %v2721_v59, 16 }
  0x54   : > { %815 = vmatprep.subr.bf16.mxu0 %v2332_v1  ;;  %943 = vmatprep.subr.bf16.mxu1 %v2332_v1 }
  0x56   : > { %568 = vmatmul.mubr.bf16.vlgmr.msra.gmra.mrb[4].mxu0 %v469_v6  ;;  %746 = vmatmul.mubr.bf16.vlgmr.msra.gmra.mrb[4].mxu1 %v641_v7  ;;  %v1465_v6 = vrot.slane %v1463_v0, 1  ;;  %v2284_v7 = vld [vmem:[%s2942_s1 + $0xa0] sm:$0xff]  }
  0x57   : > { %816 = vmatpush1.bf16.msra.mxu0 %v2244_v8  ;;  %944 = vmatpush1.bf16.msra.mxu1 %v2245_v9  ;;  %v2285_v8 = vld [vmem:[%s2942_s1 + $0x50] sm:$0xff]   ;;  %v1287_v9 = vrot.slane %v2624_v27, 1 }
  0x58   : > { %817 = vmatprep.subr.bf16.mxu0 %v2332_v1  ;;  %945 = vmatprep.subr.bf16.mxu1 %v2332_v1 }
  0x59   : > { %2000 = vmatprep.mubr.msk.bf16.mxu0 %vm300_vm0, %v2477_v42  ;;  %2031 = vmatprep.mubr.msk.bf16.mxu1 %vm300_vm0, %v878_v10  ;;  %v2269_v42 = vld [vmem:[%s2942_s1 + $0x10] sm:$0xff]   ;;  %v1466_v10 = vor.u32 %v1465_v6, %v1461_v5 }
  0x5b   : > { %818 = vmatpush1.bf16.msra.mxu0 %v2246_v11  ;;  %946 = vmatpush1.bf16.msra.mxu1 %v2247_v12  ;;  %v2286_v11 = vld [vmem:[%s2942_s1 + $0xa8] sm:$0xff]   ;;  %v2287_v12 = vld [vmem:[%s2942_s1 + $0x58] sm:$0xff]  }
  0x5c   : > { %819 = vmatprep.subr.bf16.mxu0 %v2332_v1  ;;  %947 = vmatprep.subr.bf16.mxu1 %v2332_v1 }
  0x5f   : > { %820 = vmatpush1.bf16.msra.mxu0 %v2248_v13  ;;  %948 = vmatpush1.bf16.msra.mxu1 %v2249_v14  ;;  %v2288_v13 = vld [vmem:[%s2942_s1 + $0xb0] sm:$0xff]   ;;  %v2289_v14 = vld [vmem:[%s2942_s1 + $0x60] sm:$0xff]  }
  0x60   : > { %821 = vmatprep.subr.bf16.mxu0 %v2332_v1  ;;  %949 = vmatprep.subr.bf16.mxu1 %v2332_v1 }
  0x63   : > { %822 = vmatpush1.bf16.msra.mxu0 %v2250_v15  ;;  %950 = vmatpush1.bf16.msra.mxu1 %v2251_v16  ;;  %v2290_v15 = vld [vmem:[%s2942_s1 + $0xb8] sm:$0xff]   ;;  %v2291_v16 = vld [vmem:[%s2942_s1 + $0x68] sm:$0xff]  }
  0x64   : > { %823 = vmatprep.subr.bf16.mxu0 %v2332_v1  ;;  %951 = vmatprep.subr.bf16.mxu1 %v2332_v1 }
  0x67   : > { %824 = vmatpush1.bf16.msra.mxu0 %v2252_v17  ;;  %952 = vmatpush1.bf16.msra.mxu1 %v2253_v18  ;;  %v2292_v17 = vld [vmem:[%s2942_s1 + $0xc0] sm:$0xff]   ;;  %v2293_v18 = vld [vmem:[%s2942_s1 + $0x70] sm:$0xff]  }
  0x68   : > { %825 = vmatprep.subr.bf16.mxu0 %v2332_v1  ;;  %953 = vmatprep.subr.bf16.mxu1 %v2332_v1 }
  0x6b   : > { %826 = vmatpush1.bf16.msra.mxu0 %v2254_v19  ;;  %954 = vmatpush1.bf16.msra.mxu1 %v2255_v20  ;;  %v2294_v19 = vld [vmem:[%s2942_s1 + $0xc8] sm:$0xff]   ;;  %v2295_v20 = vld [vmem:[%s2942_s1 + $0x78] sm:$0xff]  }
  0x6c   : > { %827 = vmatprep.subr.bf16.mxu0 %v2332_v1  ;;  %955 = vmatprep.subr.bf16.mxu1 %v2332_v1 }
  0x6f   : > { %828 = vmatpush1.bf16.msra.mxu0 %v2256_v21  ;;  %956 = vmatpush1.bf16.msra.mxu1 %v2257_v22  ;;  %v2296_v21 = vld [vmem:[%s2942_s1 + $0xd0] sm:$0xff]   ;;  %v2297_v22 = vld [vmem:[%s2942_s1 + $0x80] sm:$0xff]  }
  0x70   : > { %829 = vmatprep.subr.bf16.mxu0 %v2332_v1  ;;  %957 = vmatprep.subr.bf16.mxu1 %v2332_v1 }
  0x73   : > { %830 = vmatpush1.bf16.msra.mxu0 %v2258_v25  ;;  %958 = vmatpush1.bf16.msra.mxu1 %v2259_v26  ;;  %v2298_v25 = vld [vmem:[%s2942_s1 + $0xd8] sm:$0xff]   ;;  %v2807_v26 = vpack.c.bf16 %v2115_v24, %v2113_v23 }
  0x74   : > { %831 = vmatprep.subr.bf16.mxu0 %v2332_v1  ;;  %959 = vmatprep.subr.bf16.mxu1 %v2332_v1 }
  0x75   : > { %v1695_v58 = vrot.slane %v2807_v26, 1 }
  0x77   : > { %832 = vmatpush1.bf16.msra.mxu0 %v2260_v28  ;;  %960 = vmatpush1.bf16.msra.mxu1 %v2261_v29  ;;  %v2300_v28 = vld [vmem:[%s2942_s1 + $0xe0] sm:$0xff]   ;;  %v1456_v29 = vshll.u32 %v2807_v26, 16 }
  0x78   : > { %833 = vmatprep.subr.bf16.mxu0 %v2332_v1  ;;  %961 = vmatprep.subr.bf16.mxu1 %v2332_v1 }
  0x79   : > { %v1458_v33 = vrot.slane %v1456_v29, 1 }
  0x7b   : > { %834 = vmatpush1.bf16.msra.mxu0 %v2262_v31  ;;  %962 = vmatpush1.bf16.msra.mxu1 %v2263_v32  ;;  %v2302_v31 = vld [vmem:[%s2942_s1 + $0xe8] sm:$0xff]   ;;  %v1454_v32 = vshrl.u32 %v2807_v26, 16 }
  0x7c   : > { %1122 = vmatprep.subr.bf16.mxu0 %v2332_v1  ;;  %1224 = vmatprep.subr.bf16.mxu1 %v2332_v1 }
  0x7e   : > { %848 = vmatmul.mubr.bf16.vlgmr.msra.gmra.mrb[8].mxu0 %v2529_v60  ;;  %976 = vmatmul.mubr.bf16.vlgmr.msra.gmra.mrb[8].mxu1 %v877_v35  ;;  %v2280_v60 = vld [vmem:[%s2942_s1 + $0x90] sm:$0xff]   ;;  %v1286_v35 = vrot.slane %v2708_v53, 1 }
  0x7f   : > { %1123 = vmatpush1.bf16.msra.mxu0 %v2264_v36  ;;  %1225 = vmatpush1.bf16.msra.mxu1 %v2265_v37  ;;  %v1459_v36 = vor.u32 %v1458_v33, %v1454_v32  ;;  %v2304_v37 = vld [vmem:[%s2942_s1] sm:$0xff]  }
  0x80   : > { %1124 = vmatprep.subr.bf16.mxu0 %v2332_v1  ;;  %1226 = vmatprep.subr.bf16.mxu1 %v2332_v1 }
  0x81   : > { %2068 = vmatprep.mubr.msk.bf16.mxu0 %vm300_vm0, %v1057_v38  ;;  %2079 = vmatprep.mubr.msk.bf16.mxu1 %vm300_vm0, %v2624_v27  ;;  %v2299_v27 = vld [vmem:[%s2942_s1 + $0x88] sm:$0xff]   ;;  %v2305_v38 = vld [vmem:[%s2942_s1 + $0xa0] sm:$0xff]  }
  0x83   : > { %1125 = vmatpush1.bf16.msra.mxu0 %v2266_v39  ;;  %1227 = vmatpush1.bf16.msra.mxu1 %v2267_v40  ;;  %v1696_v39 = vrot.slane %v2721_v59, 1  ;;  %v2306_v40 = vld [vmem:[%s2942_s1 + $0x8] sm:$0xff]  }
  0x84   : > { %1126 = vmatprep.subr.bf16.mxu0 %v2332_v1  ;;  %1228 = vmatprep.subr.bf16.mxu1 %v2332_v1 }
  0x87   : > { %1127 = vmatpush1.bf16.msra.mxu0 %v2268_v41  ;;  %1229 = vmatpush1.bf16.msra.mxu1 %v2269_v42  ;;  %v2307_v41 = vld [vmem:[%s2942_s1 + $0xa8] sm:$0xff]   ;;  %v2308_v42 = vld [vmem:[%s2942_s1 + $0x10] sm:$0xff]  }
  0x88   : > { %1128 = vmatprep.subr.bf16.mxu0 %v2332_v1  ;;  %1230 = vmatprep.subr.bf16.mxu1 %v2332_v1 }
  0x8b   : > { %1129 = vmatpush1.bf16.msra.mxu0 %v2270_v43  ;;  %1231 = vmatpush1.bf16.msra.mxu1 %v2271_v44  ;;  %v2309_v43 = vld [vmem:[%s2942_s1 + $0xb0] sm:$0xff]   ;;  %v2310_v44 = vld [vmem:[%s2942_s1 + $0x18] sm:$0xff]  }
  0x8c   : > { %1130 = vmatprep.subr.bf16.mxu0 %v2332_v1  ;;  %1232 = vmatprep.subr.bf16.mxu1 %v2332_v1 }
  0x8f   : > { %1131 = vmatpush1.bf16.msra.mxu0 %v2272_v45  ;;  %1233 = vmatpush1.bf16.msra.mxu1 %v2273_v46  ;;  %v2311_v45 = vld [vmem:[%s2942_s1 + $0xb8] sm:$0xff]   ;;  %v2312_v46 = vld [vmem:[%s2942_s1 + $0x20] sm:$0xff]  }
  0x90   : > { %1132 = vmatprep.subr.bf16.mxu0 %v2332_v1  ;;  %1234 = vmatprep.subr.bf16.mxu1 %v2332_v1 }
  0x93   : > { %1133 = vmatpush1.bf16.msra.mxu0 %v2274_v47  ;;  %1235 = vmatpush1.bf16.msra.mxu1 %v2275_v48  ;;  %v2313_v47 = vld [vmem:[%s2942_s1 + $0xc0] sm:$0xff]   ;;  %v2314_v48 = vld [vmem:[%s2942_s1 + $0x28] sm:$0xff]  }
  0x94   : > { %1134 = vmatprep.subr.bf16.mxu0 %v2332_v1  ;;  %1236 = vmatprep.subr.bf16.mxu1 %v2332_v1 }
  0x97   : > { %1135 = vmatpush1.bf16.msra.mxu0 %v2276_v49  ;;  %1237 = vmatpush1.bf16.msra.mxu1 %v2277_v52  ;;  %v2315_v49 = vld [vmem:[%s2942_s1 + $0xc8] sm:$0xff]   ;;  %v2318_v52 = vld [vmem:[%s2942_s1 + $0x38] sm:$0xff]  }
  0x98   : > { %1136 = vmatprep.subr.bf16.mxu0 %v2332_v1  ;;  %1238 = vmatprep.subr.bf16.mxu1 %v2332_v1 }
  0x9b   : > { %1137 = vmatpush1.bf16.msra.mxu0 %v2278_v54  ;;  %1239 = vmatpush1.bf16.msra.mxu1 %v2279_v57  ;;  %v2320_v54 = vld [vmem:[%s2942_s1 + $0x40] sm:$0xff]   ;;  %v2323_v57 = vld [vmem:[%s2942_s1 + $0xe8] sm:$0xff]  }
  0x9c   : > { %1138 = vmatprep.subr.bf16.mxu0 %v2332_v1  ;;  %1240 = vmatprep.subr.bf16.mxu1 %v2332_v1 }
  0x9f   : > { %1139 = vmatpush1.bf16.msra.mxu0 %v2280_v60  ;;  %1241 = vmatpush1.bf16.msra.mxu1 %v2281_v61 }
  0xa0   : > { %1140 = vmatprep.subr.bf16.mxu0 %v2332_v1  ;;  %1242 = vmatprep.subr.bf16.mxu1 %v2332_v1 }
  0xa3   : > { %1141 = vmatpush1.bf16.msra.mxu0 %v2282_v2  ;;  %1243 = vmatpush1.bf16.msra.mxu1 %v2283_v3 }
  0xa4   : > { %1352 = vmatprep.subr.bf16.mxu0 %v2332_v1  ;;  %1531 = vmatprep.subr.bf16.mxu1 %v2332_v1 }
  0xa6   : > { %1155 = vmatmul.mubr.bf16.vlgmr.msra.gmra.mrb[12].mxu0 %v1050_v4  ;;  %1257 = vmatmul.mubr.bf16.vlgmr.msra.gmra.mrb[12].mxu1 %v2708_v53  ;;  %v2319_v53 = vld [vmem:[%s2942_s1 + $0xd8] sm:$0xff]  }
  0xa7   : > { %1353 = vmatpush1.bf16.msra.mxu0 %v2284_v7  ;;  %1532 = vmatpush1.bf16.msra.mxu1 %v2285_v8 }
  0xa8   : > { %1354 = vmatprep.subr.bf16.mxu0 %v2332_v1  ;;  %1533 = vmatprep.subr.bf16.mxu1 %v2332_v1 }
  0xa9   : > { %2110 = vmatprep.mubr.msk.bf16.mxu0 %vm300_vm0, %v1287_v9  ;;  %2147 = vmatprep.mubr.msk.bf16.mxu1 %vm300_vm0, %v1466_v10 }
  0xab   : > { %1355 = vmatpush1.bf16.msra.mxu0 %v2286_v11  ;;  %1534 = vmatpush1.bf16.msra.mxu1 %v2287_v12 }
  0xac   : > { %1356 = vmatprep.subr.bf16.mxu0 %v2332_v1  ;;  %1535 = vmatprep.subr.bf16.mxu1 %v2332_v1 }
  0xaf   : > { %1357 = vmatpush1.bf16.msra.mxu0 %v2288_v13  ;;  %1536 = vmatpush1.bf16.msra.mxu1 %v2289_v14 }
  0xb0   : > { %1358 = vmatprep.subr.bf16.mxu0 %v2332_v1  ;;  %1537 = vmatprep.subr.bf16.mxu1 %v2332_v1 }
  0xb3   : > { %1359 = vmatpush1.bf16.msra.mxu0 %v2290_v15  ;;  %1538 = vmatpush1.bf16.msra.mxu1 %v2291_v16 }
  0xb4   : > { %1360 = vmatprep.subr.bf16.mxu0 %v2332_v1  ;;  %1539 = vmatprep.subr.bf16.mxu1 %v2332_v1 }
  0xb7   : > { %1361 = vmatpush1.bf16.msra.mxu0 %v2292_v17  ;;  %1540 = vmatpush1.bf16.msra.mxu1 %v2293_v18 }
  0xb8   : > { %1362 = vmatprep.subr.bf16.mxu0 %v2332_v1  ;;  %1541 = vmatprep.subr.bf16.mxu1 %v2332_v1 }
  0xbb   : > { %1363 = vmatpush1.bf16.msra.mxu0 %v2294_v19  ;;  %1542 = vmatpush1.bf16.msra.mxu1 %v2295_v20 }
  0xbc   : > { %1364 = vmatprep.subr.bf16.mxu0 %v2332_v1  ;;  %1543 = vmatprep.subr.bf16.mxu1 %v2332_v1 }
  0xbf   : > { %1365 = vmatpush1.bf16.msra.mxu0 %v2296_v21  ;;  %1544 = vmatpush1.bf16.msra.mxu1 %v2297_v22 }
  0xc0   : > { %1366 = vmatprep.subr.bf16.mxu0 %v2332_v1  ;;  %1545 = vmatprep.subr.bf16.mxu1 %v2332_v1 }
  0xc3   : > { %1367 = vmatpush1.bf16.msra.mxu0 %v2298_v25  ;;  %1546 = vmatpush1.bf16.msra.mxu1 %v2299_v27 }
  0xc4   : > { %1368 = vmatprep.subr.bf16.mxu0 %v2332_v1  ;;  %1547 = vmatprep.subr.bf16.mxu1 %v2332_v1 }
  0xc7   : > { %1369 = vmatpush1.bf16.msra.mxu0 %v2300_v28  ;;  %1548 = vmatpush1.bf16.msra.mxu1 %v2301_v30 }
  0xc8   : > { %1370 = vmatprep.subr.bf16.mxu0 %v2332_v1  ;;  %1549 = vmatprep.subr.bf16.mxu1 %v2332_v1 }
  0xcb   : > { %1371 = vmatpush1.bf16.msra.mxu0 %v2302_v31  ;;  %1550 = vmatpush1.bf16.msra.mxu1 %v2303_v34 }
  0xcc   : > { %1633 = vmatprep.subr.bf16.mxu0 %v2332_v1  ;;  %1761 = vmatprep.subr.bf16.mxu1 %v2332_v1 }
  0xce   : > { %1385 = vmatmul.mubr.bf16.vlgmr.msra.gmra.mrb[16].mxu0 %v1286_v35  ;;  %1564 = vmatmul.mubr.bf16.vlgmr.msra.gmra.mrb[16].mxu1 %v1459_v36 }
  0xcf   : > { %1634 = vmatpush1.bf16.msra.mxu0 %v2304_v37  ;;  %1762 = vmatpush1.bf16.msra.mxu1 %v2305_v38 }
  0xd0   : > { %1635 = vmatprep.subr.bf16.mxu0 %v2332_v1  ;;  %1763 = vmatprep.subr.bf16.mxu1 %v2332_v1 }
  0xd1   : > { %2158 = vmatprep.mubr.msk.bf16.mxu0 %vm300_vm0, %v2721_v59  ;;  %2189 = vmatprep.mubr.msk.bf16.mxu1 %vm300_vm0, %v1696_v39 }
  0xd3   : > { %1636 = vmatpush1.bf16.msra.mxu0 %v2306_v40  ;;  %1764 = vmatpush1.bf16.msra.mxu1 %v2307_v41 }
  0xd4   : > { %1637 = vmatprep.subr.bf16.mxu0 %v2332_v1  ;;  %1765 = vmatprep.subr.bf16.mxu1 %v2332_v1 }
  0xd7   : > { %1638 = vmatpush1.bf16.msra.mxu0 %v2308_v42  ;;  %1766 = vmatpush1.bf16.msra.mxu1 %v2309_v43 }
  0xd8   : > { %1639 = vmatprep.subr.bf16.mxu0 %v2332_v1  ;;  %1767 = vmatprep.subr.bf16.mxu1 %v2332_v1 }
  0xdb   : > { %1640 = vmatpush1.bf16.msra.mxu0 %v2310_v44  ;;  %1768 = vmatpush1.bf16.msra.mxu1 %v2311_v45 }
  0xdc   : > { %1641 = vmatprep.subr.bf16.mxu0 %v2332_v1  ;;  %1769 = vmatprep.subr.bf16.mxu1 %v2332_v1 }
  0xdf   : > { %1642 = vmatpush1.bf16.msra.mxu0 %v2312_v46  ;;  %1770 = vmatpush1.bf16.msra.mxu1 %v2313_v47 }
  0xe0   : > { %1643 = vmatprep.subr.bf16.mxu0 %v2332_v1  ;;  %1771 = vmatprep.subr.bf16.mxu1 %v2332_v1 }
  0xe3   : > { %1644 = vmatpush1.bf16.msra.mxu0 %v2314_v48  ;;  %1772 = vmatpush1.bf16.msra.mxu1 %v2315_v49 }
  0xe4   : > { %1645 = vmatprep.subr.bf16.mxu0 %v2332_v1  ;;  %1773 = vmatprep.subr.bf16.mxu1 %v2332_v1 }
  0xe7   : > { %1646 = vmatpush1.bf16.msra.mxu0 %v2316_v50  ;;  %1774 = vmatpush1.bf16.msra.mxu1 %v2317_v51 }
  0xe8   : > { %1647 = vmatprep.subr.bf16.mxu0 %v2332_v1  ;;  %1775 = vmatprep.subr.bf16.mxu1 %v2332_v1 }
  0xeb   : > { %1648 = vmatpush1.bf16.msra.mxu0 %v2318_v52  ;;  %1776 = vmatpush1.bf16.msra.mxu1 %v2319_v53 }
  0xec   : > { %1649 = vmatprep.subr.bf16.mxu0 %v2332_v1  ;;  %1777 = vmatprep.subr.bf16.mxu1 %v2332_v1 }
  0xef   : > { %1650 = vmatpush1.bf16.msra.mxu0 %v2320_v54  ;;  %1778 = vmatpush1.bf16.msra.mxu1 %v2321_v55 }
  0xf0   : > { %1651 = vmatprep.subr.bf16.mxu0 %v2332_v1  ;;  %1779 = vmatprep.subr.bf16.mxu1 %v2332_v1  ;;  %v2922_v1 = vld [vmem:[%s2943_s2] ss:$0 sm:$0xff] }
  0xf3   : > { %1652 = vmatpush1.bf16.msra.mxu0 %v2322_v56  ;;  %1780 = vmatpush1.bf16.msra.mxu1 %v2323_v57 }
  0xf6   : > { %1666 = vmatmul.mubr.bf16.vlgmr.msra.gmra.mrb[20].mxu0 %v2807_v26  ;;  %1794 = vmatmul.mubr.bf16.vlgmr.msra.gmra.mrb[20].mxu1 %v1695_v58 }
 0x101   : > { %v338_v59 = vpop.f32.mrb[0].mxu0  ;;  %v440_v60 = vpop.f32.mrb[0].mxu1 }
 0x102   : > { %v340_v61 = vpop.f32.mrb[1].mxu0  ;;  %v441_v62 = vadd.f32 %v440_v60, %v338_v59  ;;  %v442_v63 = vpop.f32.mrb[1].mxu1 }
 0x103   : > { %v341_v0 = vpop.f32.mrb[2].mxu0  ;;  %v443_v2 = vpop.f32.mrb[2].mxu1 }
 0x104   : > { %v342_v3 = vpop.f32.mrb[3].mxu0  ;;  %v444_v4 = vpop.f32.mrb[3].mxu1 }
 0x129   : > { %v569_v5 = vpop.f32.mrb[4].mxu0  ;;  %v747_v7 = vpop.f32.mrb[4].mxu1 }
 0x12a   : > { %v575_v6 = vadd.f32 %v569_v5, %v441_v62  ;;  %v571_v8 = vpop.f32.mrb[5].mxu0  ;;  %v749_v9 = vpop.f32.mrb[5].mxu1 }
 0x12b   : > { %v572_v10 = vpop.f32.mrb[6].mxu0  ;;  %v750_v12 = vpop.f32.mrb[6].mxu1 }
 0x12c   : > { %v583_v11 = vadd.f32 %v2922_v1, %v575_v6  ;;  %v573_v13 = vpop.f32.mrb[7].mxu0  ;;  %v751_v14 = vpop.f32.mrb[7].mxu1 }
 0x12e   : > { %vm584_vm1 = vcmp.ge.f32.partialorder %v583_v11, 0.0  ;;  %v585_v15 = vmul.f32 0.01, %v583_v11 }
 0x130   : > { %v586_v16 = vsel %vm584_vm1, %v583_v11, %v585_v15 }
 0x131   : > { %587 = vst [vmem:[%s2929_s19] sm:$0xff] %v586_v16 }
 0x151   : > { %v849_v17 = vpop.f32.mrb[8].mxu0  ;;  %v977_v19 = vpop.f32.mrb[8].mxu1 }
 0x152   : > { %v850_v18 = vadd.f32 %v849_v17, %v747_v7  ;;  %v851_v20 = vpop.f32.mrb[9].mxu0  ;;  %v979_v21 = vpop.f32.mrb[9].mxu1 }
 0x153   : > { %v852_v22 = vpop.f32.mrb[10].mxu0  ;;  %v980_v24 = vpop.f32.mrb[10].mxu1 }
 0x154   : > { %v983_v23 = vadd.f32 %v977_v19, %v850_v18  ;;  %v853_v25 = vpop.f32.mrb[11].mxu0  ;;  %v981_v26 = vpop.f32.mrb[11].mxu1 }
 0x156   : > { %v991_v27 = vadd.f32 %v2922_v1, %v983_v23 }
 0x158   : > { %vm992_vm2 = vcmp.ge.f32.partialorder %v991_v27, 0.0  ;;  %v993_v28 = vmul.f32 0.01, %v991_v27 }
 0x15a   : > { %v994_v29 = vsel %vm992_vm2, %v991_v27, %v993_v28 }
 0x15b   : > { %2033 = vst [vmem:[%s2929_s19 + $0x8] sm:$0xff] %v994_v29 }
 0x179   : > { %v1156_v30 = vpop.f32.mrb[12].mxu0  ;;  %v1258_v31 = vpop.f32.mrb[12].mxu1 }
 0x17a   : > { %v1158_v32 = vpop.f32.mrb[13].mxu0  ;;  %v1259_v33 = vadd.f32 %v1258_v31, %v1156_v30  ;;  %v1260_v34 = vpop.f32.mrb[13].mxu1 }
 0x17b   : > { %v1159_v35 = vpop.f32.mrb[14].mxu0  ;;  %v1261_v36 = vpop.f32.mrb[14].mxu1 }
 0x17c   : > { %v1160_v37 = vpop.f32.mrb[15].mxu0  ;;  %v1262_v38 = vpop.f32.mrb[15].mxu1 }
 0x1a1   : > { %v1386_v39 = vpop.f32.mrb[16].mxu0  ;;  %v1565_v41 = vpop.f32.mrb[16].mxu1 }
 0x1a2   : > { %v1392_v40 = vadd.f32 %v1386_v39, %v1259_v33  ;;  %v1388_v42 = vpop.f32.mrb[17].mxu0  ;;  %v1567_v43 = vpop.f32.mrb[17].mxu1 }
 0x1a3   : > { %v1389_v44 = vpop.f32.mrb[18].mxu0  ;;  %v1568_v46 = vpop.f32.mrb[18].mxu1 }
 0x1a4   : > { %v1400_v45 = vadd.f32 %v2922_v1, %v1392_v40  ;;  %v1390_v47 = vpop.f32.mrb[19].mxu0  ;;  %v1569_v48 = vpop.f32.mrb[19].mxu1 }
 0x1a6   : > { %vm1401_vm3 = vcmp.ge.f32.partialorder %v1400_v45, 0.0  ;;  %v1402_v49 = vmul.f32 0.01, %v1400_v45 }
 0x1a8   : > { %v1403_v50 = vsel %vm1401_vm3, %v1400_v45, %v1402_v49 }
 0x1a9   : > { %2112 = vst [vmem:[%s2929_s19 + $0x10] sm:$0xff] %v1403_v50 }
 0x1c9   : > { %v1667_v51 = vpop.f32.mrb[20].mxu0  ;;  %v1795_v53 = vpop.f32.mrb[20].mxu1 }
 0x1ca   : > { %v1668_v52 = vadd.f32 %v1667_v51, %v1565_v41  ;;  %v1669_v54 = vpop.f32.mrb[21].mxu0  ;;  %v1797_v55 = vpop.f32.mrb[21].mxu1 }
 0x1cb   : > { %v1670_v56 = vpop.f32.mrb[22].mxu0  ;;  %v1798_v58 = vpop.f32.mrb[22].mxu1 }
 0x1cc   : > { %v1801_v57 = vadd.f32 %v1795_v53, %v1668_v52  ;;  %v1671_v59 = vpop.f32.mrb[23].mxu0  ;;  %v1799_v60 = vpop.f32.mrb[23].mxu1 }
 0x1ce   : > { %v1809_v61 = vadd.f32 %v2922_v1, %v1801_v57 }
 0x1d0   : > { %vm1810_vm4 = vcmp.ge.f32.partialorder %v1809_v61, 0.0  ;;  %v1811_v62 = vmul.f32 0.01, %v1809_v61 }
 0x1d2   : > { %v1812_v63 = vsel %vm1810_vm4, %v1809_v61, %v1811_v62 }
 0x1d3   : > { %2191 = vst [vmem:[%s2929_s19 + $0x18] sm:$0xff] %v1812_v63 }
 0x1d4 PF: > { %s13_s12 = sadd.s32 1, %s2330_s12  }
 0x1d5   : > { %p10_p4 = scmp.ge.s32.totalorder %s13_s12, 4  }
 0x1d7   :  { %12 = sbr.rel (!%p10_p4) target bundleno = 1 (0x1), region = 70 }

// kernel: forward.6
= control target key start
LH: loop header
LB: loop body
LE: loop exit
PB: predicated region body
PF: predicated region fallthrough
CT: control target
= control target key end

     0   :  { %vm710_vm0 = vcmask 261120   ;;  %s1175_s1 = inlined_call_operand.vmem [shape: bf16[1024,32], index: 1, kind: input, shape index: {}]   ;;  %s1176_s0 = inlined_call_operand.vmem [shape: f32[8,1024], index: 0, kind: input, shape index: {}]   ;;  %s1177_s2 = inlined_call_operand.vmem [shape: f32[1,32], index: 2, kind: input, shape index: {}]   ;;  %s1178_s3 = inlined_call_operand.vmem [shape: f32[8,32], index: 3, kind: output, shape index: {}]  }
   0x1   :  { %v869_v0 = vld [vmem:[%s1175_s1 + $0x40] sm:$0xff]   ;;  %v873_v4 = vld [vmem:[%s1175_s1 + $0x48] sm:$0xff]   ;;  %v877_v8 = vld [vmem:[%s1175_s1 + $0x50] sm:$0xff]  }
   0x2   :  { %v870_v1 = vld [vmem:[%s1175_s1 + $0xc0] sm:$0xff]   ;;  %781 = vmatprep.subr.bf16.mxu0 %v869_v0  ;;  %v874_v5 = vld [vmem:[%s1175_s1 + $0xc8] sm:$0xff]   ;;  %v878_v9 = vld [vmem:[%s1175_s1 + $0xd0] sm:$0xff]  }
   0x3   :  { %v871_v2 = vld [vmem:[%s1175_s1] sm:$0xff]   ;;  %803 = vmatprep.subr.bf16.mxu1 %v870_v1  ;;  %v875_v6 = vld [vmem:[%s1175_s1 + $0x8] sm:$0xff]   ;;  %v879_v10 = vld [vmem:[%s1175_s1 + $0x10] sm:$0xff]  }
   0x4   :  { %v872_v3 = vld [vmem:[%s1175_s1 + $0x80] sm:$0xff]   ;;  %782 = vmatpush3.bf16.msra.mxu0 %v871_v2  ;;  %v876_v7 = vld [vmem:[%s1175_s1 + $0x88] sm:$0xff]   ;;  %v880_v11 = vld [vmem:[%s1175_s1 + $0x90] sm:$0xff]  }
   0x5   :  { %804 = vmatpush3.bf16.msra.mxu1 %v872_v3  ;;  %783 = vmatprep.subr.bf16.mxu0 %v873_v4  ;;  %v881_v12 = vld [vmem:[%s1175_s1 + $0x58] sm:$0xff]   ;;  %v885_v16 = vld [vmem:[%s1175_s1 + $0x60] sm:$0xff]   ;;  %v889_v20 = vld [vmem:[%s1175_s1 + $0x68] sm:$0xff]  }
   0x6   :  { %805 = vmatprep.subr.bf16.mxu1 %v874_v5  ;;  %v882_v13 = vld [vmem:[%s1175_s1 + $0xd8] sm:$0xff]   ;;  %v886_v17 = vld [vmem:[%s1175_s1 + $0xe0] sm:$0xff]   ;;  %v890_v21 = vld [vmem:[%s1175_s1 + $0xe8] sm:$0xff]  }
   0x7   :  { %v883_v14 = vld [vmem:[%s1175_s1 + $0x18] sm:$0xff]   ;;  %v887_v18 = vld [vmem:[%s1175_s1 + $0x20] sm:$0xff]   ;;  %v891_v22 = vld [vmem:[%s1175_s1 + $0x28] sm:$0xff]  }
   0x8   :  { %784 = vmatpush3.bf16.msra.mxu0 %v875_v6  ;;  %v884_v15 = vld [vmem:[%s1175_s1 + $0x98] sm:$0xff]   ;;  %v888_v19 = vld [vmem:[%s1175_s1 + $0xa0] sm:$0xff]   ;;  %v892_v23 = vld [vmem:[%s1175_s1 + $0xa8] sm:$0xff]  }
   0x9   :  { %806 = vmatpush3.bf16.msra.mxu1 %v876_v7  ;;  %785 = vmatprep.subr.bf16.mxu0 %v877_v8  ;;  %v893_v24 = vld [vmem:[%s1175_s1 + $0x70] sm:$0xff]   ;;  %v897_v28 = vld [vmem:[%s1175_s1 + $0x78] sm:$0xff]   ;;  %v16_v32 = vld [vmem:[%s1176_s0 + $0x8] sm:$0xff] }
   0xa   :  { %807 = vmatprep.subr.bf16.mxu1 %v878_v9  ;;  %v894_v25 = vld [vmem:[%s1175_s1 + $0xf0] sm:$0xff]   ;;  %v898_v29 = vld [vmem:[%s1175_s1 + $0xf8] sm:$0xff]   ;;  %v15_v34 = vld [vmem:[%s1176_s0] sm:$0xff]  ;;  %v24_v35 = vpack.c.bf16 %v16_v32, %v16_v32 }
   0xb   :  { %v895_v26 = vld [vmem:[%s1175_s1 + $0x30] sm:$0xff]   ;;  %v899_v30 = vld [vmem:[%s1175_s1 + $0x38] sm:$0xff]   ;;  %v23_v37 = vpack.c.bf16 %v15_v34, %v15_v34  ;;  %v901_v40 = vld [vmem:[%s1175_s1 + $0x140] sm:$0xff]  }
   0xc   :  { %786 = vmatpush3.bf16.msra.mxu0 %v879_v10  ;;  %v896_v27 = vld [vmem:[%s1175_s1 + $0xb0] sm:$0xff]   ;;  %v900_v31 = vld [vmem:[%s1175_s1 + $0xb8] sm:$0xff]   ;;  %582 = vmatprep.mubr.bf16.mxu0 %v24_v35  ;;  %v902_v41 = vld [vmem:[%s1175_s1 + $0x1c0] sm:$0xff]  }
   0xd   :  { %808 = vmatpush3.bf16.msra.mxu1 %v880_v11  ;;  %787 = vmatprep.subr.bf16.mxu0 %v881_v12  ;;  %v18_v33 = vld [vmem:[%s1176_s0 + $0x18] sm:$0xff]  ;;  %v17_v38 = vld [vmem:[%s1176_s0 + $0x10] sm:$0xff]  ;;  %v903_v42 = vld [vmem:[%s1175_s1 + $0x100] sm:$0xff]  }
   0xe   :  { %809 = vmatprep.subr.bf16.mxu1 %v882_v13  ;;  %v26_v36 = vpack.c.bf16 %v18_v33, %v18_v33  ;;  %v25_v39 = vpack.c.bf16 %v17_v38, %v17_v38  ;;  %v904_v43 = vld [vmem:[%s1175_s1 + $0x180] sm:$0xff]   ;;  %v905_v44 = vld [vmem:[%s1175_s1 + $0x148] sm:$0xff]   ;;  %v909_v48 = vld [vmem:[%s1175_s1 + $0x150] sm:$0xff]  }
   0xf   :  { %v906_v45 = vld [vmem:[%s1175_s1 + $0x1c8] sm:$0xff]   ;;  %v910_v49 = vld [vmem:[%s1175_s1 + $0x1d0] sm:$0xff]   ;;  %v913_v52 = vld [vmem:[%s1175_s1 + $0x158] sm:$0xff]  }
  0x10   :  { %788 = vmatpush3.bf16.msra.mxu0 %v883_v14  ;;  %622 = vmatprep.mubr.bf16.mxu1 %v26_v36  ;;  %v907_v46 = vld [vmem:[%s1175_s1 + $0x108] sm:$0xff]   ;;  %v911_v50 = vld [vmem:[%s1175_s1 + $0x110] sm:$0xff]   ;;  %v914_v53 = vld [vmem:[%s1175_s1 + $0x1d8] sm:$0xff]  }
  0x11   :  { %810 = vmatpush3.bf16.msra.mxu1 %v884_v15  ;;  %789 = vmatprep.subr.bf16.mxu0 %v885_v16  ;;  %v908_v47 = vld [vmem:[%s1175_s1 + $0x188] sm:$0xff]   ;;  %v912_v51 = vld [vmem:[%s1175_s1 + $0x190] sm:$0xff]   ;;  %v915_v54 = vld [vmem:[%s1175_s1 + $0x118] sm:$0xff]  }
  0x12   :  { %811 = vmatprep.subr.bf16.mxu1 %v886_v17  ;;  %v916_v55 = vld [vmem:[%s1175_s1 + $0x198] sm:$0xff]   ;;  %v917_v56 = vld [vmem:[%s1175_s1 + $0x160] sm:$0xff]   ;;  %v921_v60 = vld [vmem:[%s1175_s1 + $0x168] sm:$0xff]  }
  0x13   :  { %v918_v57 = vld [vmem:[%s1175_s1 + $0x1e0] sm:$0xff]   ;;  %v922_v61 = vld [vmem:[%s1175_s1 + $0x1e8] sm:$0xff]   ;;  %v925_v0 = vld [vmem:[%s1175_s1 + $0x170] sm:$0xff]  }
  0x14   :  { %790 = vmatpush3.bf16.msra.mxu0 %v887_v18  ;;  %v919_v58 = vld [vmem:[%s1175_s1 + $0x120] sm:$0xff]   ;;  %v923_v62 = vld [vmem:[%s1175_s1 + $0x128] sm:$0xff]   ;;  %v926_v1 = vld [vmem:[%s1175_s1 + $0x1f0] sm:$0xff]  }
  0x15   :  { %812 = vmatpush3.bf16.msra.mxu1 %v888_v19  ;;  %791 = vmatprep.subr.bf16.mxu0 %v889_v20  ;;  %v920_v59 = vld [vmem:[%s1175_s1 + $0x1a0] sm:$0xff]   ;;  %v924_v63 = vld [vmem:[%s1175_s1 + $0x1a8] sm:$0xff]   ;;  %v927_v2 = vld [vmem:[%s1175_s1 + $0x130] sm:$0xff]  }
  0x16   :  { %813 = vmatprep.subr.bf16.mxu1 %v890_v21  ;;  %v928_v3 = vld [vmem:[%s1175_s1 + $0x1b0] sm:$0xff]   ;;  %v929_v4 = vld [vmem:[%s1175_s1 + $0x178] sm:$0xff]   ;;  %v20_v8 = vld [vmem:[%s1176_s0 + $0x28] sm:$0xff] }
  0x17   :  { %v930_v5 = vld [vmem:[%s1175_s1 + $0x1f8] sm:$0xff]   ;;  %v28_v10 = vpack.c.bf16 %v20_v8, %v20_v8  ;;  %v19_v12 = vld [vmem:[%s1176_s0 + $0x20] sm:$0xff]  ;;  %v21_v13 = vld [vmem:[%s1176_s0 + $0x30] sm:$0xff] }
  0x18   :  { %792 = vmatpush3.bf16.msra.mxu0 %v891_v22  ;;  %v931_v6 = vld [vmem:[%s1175_s1 + $0x138] sm:$0xff]   ;;  %v27_v14 = vpack.c.bf16 %v19_v12, %v19_v12  ;;  %v29_v15 = vpack.c.bf16 %v21_v13, %v21_v13  ;;  %v716_v18 = vld [vmem:[%s1177_s2] ss:$0 sm:$0xff] }
  0x19   :  { %814 = vmatpush3.bf16.msra.mxu1 %v892_v23  ;;  %793 = vmatprep.subr.bf16.mxu0 %v893_v24  ;;  %v932_v7 = vld [vmem:[%s1175_s1 + $0x1b8] sm:$0xff]  }
  0x1a   :  { %815 = vmatprep.subr.bf16.mxu1 %v894_v25  ;;  %v22_v9 = vld [vmem:[%s1176_s0 + $0x38] sm:$0xff] }
  0x1b   :  { %v30_v11 = vpack.c.bf16 %v22_v9, %v22_v9 }
  0x1c   :  { %794 = vmatpush3.bf16.msra.mxu0 %v895_v26 }
  0x1d   :  { %816 = vmatpush3.bf16.msra.mxu1 %v896_v27  ;;  %795 = vmatprep.subr.bf16.mxu0 %v897_v28 }
  0x1e   :  { %817 = vmatprep.subr.bf16.mxu1 %v898_v29 }
  0x20   :  { %796 = vmatpush3.bf16.msra.mxu0 %v899_v30 }
  0x21   :  { %818 = vmatpush3.bf16.msra.mxu1 %v900_v31  ;;  %825 = vmatprep.subr.bf16.mxu0 %v901_v40 }
  0x22   :  { %847 = vmatprep.subr.bf16.mxu1 %v902_v41 }
  0x23   :  { %583 = vmatmul.mubr.bf16.vlgmr.msra.gmra.mrb[0].mxu0 %v23_v37 }
  0x24   :  { %623 = vmatmul.mubr.bf16.vlgmr.msra.gmra.mrb[0].mxu1 %v25_v39  ;;  %826 = vmatpush3.bf16.msra.mxu0 %v903_v42 }
  0x25   :  { %848 = vmatpush3.bf16.msra.mxu1 %v904_v43  ;;  %827 = vmatprep.subr.bf16.mxu0 %v905_v44 }
  0x26   :  { %849 = vmatprep.subr.bf16.mxu1 %v906_v45  ;;  %662 = vmatprep.mubr.bf16.mxu0 %v28_v10 }
  0x27   :  { %702 = vmatprep.mubr.bf16.mxu1 %v30_v11 }
  0x28   :  { %828 = vmatpush3.bf16.msra.mxu0 %v907_v46 }
  0x29   :  { %850 = vmatpush3.bf16.msra.mxu1 %v908_v47  ;;  %829 = vmatprep.subr.bf16.mxu0 %v909_v48 }
  0x2a   :  { %851 = vmatprep.subr.bf16.mxu1 %v910_v49 }
  0x2c   :  { %830 = vmatpush3.bf16.msra.mxu0 %v911_v50 }
  0x2d   :  { %852 = vmatpush3.bf16.msra.mxu1 %v912_v51  ;;  %831 = vmatprep.subr.bf16.mxu0 %v913_v52 }
  0x2e   :  { %853 = vmatprep.subr.bf16.mxu1 %v914_v53 }
  0x30   :  { %832 = vmatpush3.bf16.msra.mxu0 %v915_v54 }
  0x31   :  { %854 = vmatpush3.bf16.msra.mxu1 %v916_v55  ;;  %833 = vmatprep.subr.bf16.mxu0 %v917_v56 }
  0x32   :  { %855 = vmatprep.subr.bf16.mxu1 %v918_v57 }
  0x34   :  { %834 = vmatpush3.bf16.msra.mxu0 %v919_v58 }
  0x35   :  { %856 = vmatpush3.bf16.msra.mxu1 %v920_v59  ;;  %835 = vmatprep.subr.bf16.mxu0 %v921_v60 }
  0x36   :  { %857 = vmatprep.subr.bf16.mxu1 %v922_v61 }
  0x38   :  { %836 = vmatpush3.bf16.msra.mxu0 %v923_v62 }
  0x39   :  { %858 = vmatpush3.bf16.msra.mxu1 %v924_v63  ;;  %837 = vmatprep.subr.bf16.mxu0 %v925_v0 }
  0x3a   :  { %859 = vmatprep.subr.bf16.mxu1 %v926_v1 }
  0x3c   :  { %838 = vmatpush3.bf16.msra.mxu0 %v927_v2 }
  0x3d   :  { %860 = vmatpush3.bf16.msra.mxu1 %v928_v3  ;;  %839 = vmatprep.subr.bf16.mxu0 %v929_v4 }
  0x3e   :  { %861 = vmatprep.subr.bf16.mxu1 %v930_v5 }
  0x40   :  { %840 = vmatpush3.bf16.msra.mxu0 %v931_v6 }
  0x41   :  { %862 = vmatpush3.bf16.msra.mxu1 %v932_v7 }
  0x43   :  { %663 = vmatmul.mubr.bf16.vlgmr.msra.gmra.mrb[4].mxu0 %v27_v14 }
  0x44   :  { %703 = vmatmul.mubr.bf16.vlgmr.msra.gmra.mrb[4].mxu1 %v29_v15 }
  0xf6   :  { %v797_v16 = vpop.f32.mrb[0].mxu0 }
  0xf7   :  { %v819_v17 = vpop.f32.mrb[0].mxu1  ;;  %v798_v19 = vpop.f32.mrb[1].mxu0 }
  0xf8   :  { %v820_v20 = vpop.f32.mrb[1].mxu1  ;;  %v799_v21 = vadd.f32 %v798_v19, %v797_v16  ;;  %v800_v23 = vpop.f32.mrb[2].mxu0 }
  0xf9   :  { %v821_v22 = vadd.f32 %v820_v20, %v819_v17  ;;  %v822_v24 = vpop.f32.mrb[2].mxu1  ;;  %v801_v25 = vpop.f32.mrb[3].mxu0 }
  0xfa   :  { %v823_v26 = vpop.f32.mrb[3].mxu1  ;;  %v585_v27 = vadd.f32 %v799_v21, %v716_v18 }
  0xfc   :  { %v625_v28 = vadd.f32 %v821_v22, %v585_v27 }
 0x116   :  { %v841_v29 = vpop.f32.mrb[4].mxu0 }
 0x117   :  { %v863_v30 = vpop.f32.mrb[4].mxu1  ;;  %v842_v31 = vpop.f32.mrb[5].mxu0 }
 0x118   :  { %v843_v32 = vadd.f32 %v842_v31, %v841_v29  ;;  %v864_v33 = vpop.f32.mrb[5].mxu1  ;;  %v844_v34 = vpop.f32.mrb[6].mxu0 }
 0x119   :  { %v865_v35 = vadd.f32 %v864_v33, %v863_v30  ;;  %v866_v36 = vpop.f32.mrb[6].mxu1  ;;  %v845_v37 = vpop.f32.mrb[7].mxu0 }
 0x11a   :  { %v665_v38 = vadd.f32 %v843_v32, %v625_v28  ;;  %v867_v39 = vpop.f32.mrb[7].mxu1 }
 0x11c   :  { %v705_v40 = vadd.f32 %v865_v35, %v665_v38 }
 0x11e   :  { %711 = vst.msk [vmem:[%s1178_s3] sm:$0xff] %vm710_vm0, %v705_v40 }

// kernel: forward.7
= control target key start
LH: loop header
LB: loop body
LE: loop exit
PB: predicated region body
PF: predicated region fallthrough
CT: control target
= control target key end

     0   :  { %s2695_s0 = inlined_call_operand.vmem [shape: f32[2,4,32], index: 0, kind: input, shape index: {}]   ;;  %s2696_s1 = inlined_call_operand.vmem [shape: bf16[2,32,96], index: 1, kind: input, shape index: {}]   ;;  %s2697_s2 = inlined_call_operand.vmem [shape: f32[2,1,96], index: 2, kind: input, shape index: {}]   ;;  %s2698_s3 = inlined_call_operand.vmem [shape: bf16[2,32,32], index: 3, kind: input, shape index: {}]   ;;  %s2699_s4 = inlined_call_operand.vmem [shape: f32[2,1,32], index: 4, kind: input, shape index: {}]   ;;  %s2700_s5 = inlined_call_operand.vmem [shape: f32[2,1,32], index: 5, kind: input, shape index: {}]   ;;  %s2701_s6 = inlined_call_operand.vmem [shape: f32[2,1,32], index: 6, kind: input, shape index: {}]   ;;  %s2702_s7 = inlined_call_operand.vmem [shape: bf16[2,32,32], index: 7, kind: input, shape index: {}]   ;;  %s2703_s8 = inlined_call_operand.vmem [shape: f32[2,1,32], index: 8, kind: input, shape index: {}]   ;;  %s2704_s9 = inlined_call_operand.vmem [shape: bf16[2,32,32], index: 9, kind: input, shape index: {}]   ;;  %s2705_s10 = inlined_call_operand.vmem [shape: f32[2,1,32], index: 10, kind: input, shape index: {}]   ;;  %s2706_s11 = inlined_call_operand.vmem [shape: f32[2,1,32], index: 11, kind: input, shape index: {}]   ;;  %s2707_s12 = inlined_call_operand.vmem [shape: f32[2,1,32], index: 12, kind: input, shape index: {}]   ;;  %s2708_s13 = inlined_call_operand.vmem [shape: bf16[32,6], index: 13, kind: input, shape index: {}]   ;;  %s2709_s14 = inlined_call_operand.vmem [shape: f32[1,6], index: 14, kind: input, shape index: {}]   ;;  %s2710_s15 = inlined_call_operand.hbm [shape: f32[2,4,6], index: 15, kind: output, shape index: {}]  }
   0x1   :  { %2715 = sst [smem:[#allocation6_spill]] %s2695_s0 }
   0x2   :  { %2716 = sst [smem:[#allocation7_spill]] %s2696_s1 }
   0x3   :  { %2717 = sst [smem:[#allocation8_spill]] %s2697_s2 }
   0x4   :  { %20 = vsyncpa [#allocation3], 0 }
   0x5   :  { %22 = vsyncpa [#allocation3 + $0x1], 0  ;;  %s2356_s18 = smov 0   ;;  %s2358_s19 = smov 0  }
   0x6   :  { %s2360_s20 = smov 0   ;;  %s2362_s21 = smov 0  }
   0x7 LB: > { %s2377_s22 = sadd.s32 4294967295, %s2266_s21   ;;  %s1855_s23 = sadd.s32 4294967294, %s2266_s21   ;;  %s2266_s21 = sphi %s2362_s21, %s2732_s21   ;;  %s2262_s20 = sphi %s2360_s20, %s2731_s20   ;;  %s2258_s19 = sphi %s2358_s19, %s2730_s19   ;;  %s2254_s18 = sphi %s2356_s18, %s2729_s18  }
   0x8   : > { %s2381_s24 = sadd.s32 1, %s2266_s21   ;;  %s355_s25 = sadd.s32 1, %s2262_s20 }
   0x9   : > { %s352_s26 = ssub.s32 %s2266_s21, %s2381_s24  ;;  %p365_p0 = scmp.ne.s32.totalorder %s2262_s20, %s2258_s19 }
   0xa   : > { %p353_p1 = scmp.eq.s32.totalorder %s352_s26, 0  ;;  %p366_p2 = scmp.eq.s32.totalorder %s2377_s22, 1 }
   0xb   : > { %p371_p3 = scmp.ne.s32.totalorder %s2258_s19, %s2254_s18  ;;  %p372_p4 = scmp.eq.s32.totalorder %s1855_s23, 1 }
   0xc   : > { %s2392_s27 = scalar_select %p353_p1, %s2262_s20, %s355_s25  }
   0xd   : > { %p2394_p5 = por %p366_p2, %p365_p0  ;;  %p2398_p6 = por %p372_p4, %p371_p3 }
   0xe   : > { %2718 = sst [smem:[#allocation5_spill]] %s2392_s27  ;;  %p1858_p7 = scmp.ge.s32.totalorder %s2266_s21, 1 }
   0xf   : > { %p439_p8 = scmp.lt.s32.totalorder %s2266_s21, 3 }
  0x11   : > { %p440_p9 = pnand %p1858_p7, %p439_p8 }
  0x12   : > { %s2721_s1 = sld [smem:[#allocation7_spill]] (!%p440_p9)  ;;  %v2268_v1 = vmov (!%p440_p9), 0.0   ;;  %vm2269_vm0 = vmmov (!%p440_p9), 0   ;;  %p486_p10 = scmp.lt.s32.totalorder (!%p440_p9), %s2377_s22, 1  ;;  %vm522_vm1 = vcmask (!%p440_p9), 261120   ;;  %vm574_vm2 = vcmask (!%p440_p9), 130048  }
  0x13   : > { %443 = sbr.rel (%p440_p9) target bundleno = 5011 (0x1393), region = 80  ;;  %1988 = vmatprep.subr.bf16.mxu0 (!%p440_p9), %v2268_v1  ;;  %1996 = vmatprep.subr.bf16.mxu1 (!%p440_p9), %v2268_v1  ;;  %s2722_s0 = sld [smem:[#allocation6_spill]] (!%p440_p9)  ;;  %v491_v17 = vlaneseq (!%p440_p9)  ;;  %vm623_vm4 = vcmask (!%p440_p9), 27648   ;;  %vm642_vm5 = vcmask (!%p440_p9), 1041408   ;;  %vm638_vm6 = vcmask (!%p440_p9), 31744   ;;  %v2164_v57 = vld [vmem:[%s2698_s3] sm:$0xff] (!%p440_p9)  }
  0x14   : > { %1992 = vmatprep.mubr.msk.bf16.mxu0 (!%p440_p9), %vm2269_vm0, %v2268_v1  ;;  %1998 = vmatprep.mubr.msk.bf16.mxu1 (!%p440_p9), %vm2269_vm0, %v2268_v1  ;;  %s2723_s2 = sld [smem:[#allocation8_spill]] (!%p440_p9)  ;;  %s2712_s30 = smov (!%p440_p9), 64   ;;  %v2165_v58 = vld [vmem:[%s2698_s3 + $0x8] sm:$0xff] (!%p440_p9)   ;;  %vm909_vm7 = vcmask (!%p440_p9), 257024   ;;  %vm1780_vm8 = vcmask (!%p440_p9), 44032  }
  0x15   : > { %v492_v18 = vshrl.u32 (!%p440_p9), %v491_v17, 7  ;;  %v494_v19 = vand.u32 (!%p440_p9), 127, %v491_v17  ;;  %s2711_s16 = smov (!%p440_p9), 48   ;;  %s483_s23 = sand.u32 (!%p440_p9), 1, %s2258_s19  }
  0x17   : > { %vm495_vm3 = vcmp.gt.s32.totalorder (!%p440_p9), %v494_v19, %v492_v18 }
  0x18   : > { %v2162_v0 = vld [vmem:[%s2721_s1] sm:$0xff] (!%p440_p9)   ;;  %v2163_v2 = vld [vmem:[%s2721_s1 + $0x8] sm:$0xff] (!%p440_p9)   ;;  %v2447_v21 = vsel (!%p440_p9), %vm495_vm3, -1e+30, %v2268_v1 }
  0x19   : > { %1989 = vmatpush3.bf16.msra.mxu0 (!%p440_p9), %v2162_v0 }
  0x1a   : > { %1990 = vmatprep.subr.bf16.mxu0 %v2268_v1  ;;  %s487_s25 = scalar_select %p486_p10, %s2377_s22, 1  ;;  %v1861_v5 = vld [vmem:[%s2723_s2] ss:$0 sm:$0xff] }
  0x1c   : > { %s1860_s26 = sshll.u32 %s487_s25, 2  ;;  %s2714_s25 = smov 96  }
  0x1d   : > { %1991 = vmatpush3.bf16.msra.mxu0 %v2163_v2  ;;  %s489_s27 = scalar_lea.vmem %s2722_s0, %s1860_s26  ;;  %s2272_s26 = smov 80  }
  0x1e   : > { %2002 = vmatprep.subr.bf16.mxu0 %v2268_v1  ;;  %v2423_v3 = vld [vmem:[%s489_s27] sm:$0xf]  ;;  %s2713_s27 = smov 112   ;;  %s1783_s0 = scalar_lea.sflag [#allocation3], %s483_s23 }
  0x1f   : > { %v498_v4 = vpack.c.bf16 %v2423_v3, %v2423_v3 }
  0x21   : > { %1993 = vmatmul.mubr.msk.bf16.vlgmr.msra.gmra.mrb[0].mxu0 %vm522_vm1, %v498_v4 }
  0x22   : > { %2004 = vmatprep.mubr.msk.bf16.mxu0 %vm2269_vm0, %v2268_v1 }
  0xf4   : > { %v560_v6 = vpop.f32.mrb[0].mxu0 }
  0xf5   : > { %v561_v7 = vadd.f32 %v1861_v5, %v560_v6  ;;  %v1994_v8 = vpop.f32.mrb[1].mxu0 }
  0xf6   : > { %v563_v9 = vpop.f32.mrb[2].mxu0 }
  0xf7   : > { %v570_v10 = vpack.c.bf16 %v561_v7, %v561_v7  ;;  %v1995_v11 = vpop.f32.mrb[3].mxu0 }
  0xf9   : > { %687 = vrot.lane.b32.xlu1 %v570_v10, %s2713_s27  ;;  %572 = vrot.lane.b32.xlu0 %v570_v10, %s2714_s25  ;;  %s2727_s27 = smov 48  }
  0xfd   : > { %689 = vrot.lane.b32.xlu0 %v570_v10, %s2272_s26 }
 0x16b   : > { %v573_v12 = vpop.permute.xlu0 %572  ;;  %v688_v16 = vpop.permute.xlu1 %687 }
 0x16c   : > { %v579_v13 = vsel %vm574_vm2, %v573_v12, 0  ;;  %v1873_v12 = vld [vmem:[%s2699_s4] ss:$0 sm:$0xff] }
 0x16d   : > { %1997 = vmatpush3.bf16.xpose.msra.mxu1 %v579_v13 }
 0x16e   : > { %2008 = vmatprep.subr.bf16.mxu1 %v2268_v1 }
 0x16f   : > { %v690_v14 = vpop.permute.xlu0 %689 }
 0x170   : > { %v695_v15 = vsel %vm574_vm2, %v690_v14, 0 }
 0x174   : > { %1999 = vmatmul.mubr.msk.bf16.vlgmr.msra.gmra.mrb[0].mxu1 %vm574_vm2, %v570_v10 }
 0x175   : > { %2009 = vmatpush3.bf16.xpose.msra.mxu1 %v695_v15  ;;  %2010 = vmatprep.mubr.msk.bf16.mxu1 %vm2269_vm0, %v2268_v1 }
 0x176   : > { %2020 = vmatprep.subr.bf16.mxu1 %v2268_v1 }
 0x17c   : > { %2011 = vmatmul.mubr.msk.bf16.vlgmr.msra.gmra.mrb[4].mxu1 %vm574_vm2, %v688_v16 }
 0x17d   : > { %2022 = vmatprep.mubr.msk.bf16.mxu1 %vm2269_vm0, %v2268_v1  ;;  %2021 = vmatpush3.bf16.msra.mxu1 %v2165_v58 }
 0x17e   : > { %2032 = vmatprep.subr.bf16.mxu1 %v2268_v1 }
 0x247   : > { %v615_v20 = vpop.f32.mrb[0].mxu1 }
 0x248   : > { %v621_v22 = vmul.f32 0.25, %v615_v20  ;;  %v2000_v23 = vpop.f32.mrb[1].mxu1 }
 0x249   : > { %v618_v24 = vpop.f32.mrb[2].mxu1 }
 0x24a   : > { %v2001_v25 = vpop.f32.mrb[3].mxu1  ;;  %v622_v26 = vadd.f32 %v621_v22, %v2447_v21 }
 0x24c   : > { %v624_v27 = vsel %vm623_vm4, %v622_v26, -inf }
 0x24d   : > { %625 = vmax.xlane.f32.xlu1 %v624_v27  ;;  %v2167_v27 = vld [vmem:[%s2702_s7 + $0x8] sm:$0xff]  }
 0x24f   : > { %v731_v28 = vpop.f32.mrb[4].mxu1 }
 0x250   : > { %v737_v29 = vmul.f32 0.25, %v731_v28  ;;  %v2012_v30 = vpop.f32.mrb[5].mxu1 }
 0x251   : > { %v734_v31 = vpop.f32.mrb[6].mxu1 }
 0x252   : > { %v2013_v32 = vpop.f32.mrb[7].mxu1  ;;  %v738_v33 = vadd.f32 %v737_v29, %v2447_v21  ;;  %v1874_v31 = vld [vmem:[%s2700_s5] ss:$0 sm:$0xff] }
 0x254   : > { %v739_v34 = vsel %vm623_vm4, %v738_v33, -inf }
 0x255   : > { %740 = vmax.xlane.f32.xlu0 %v739_v34 }
 0x2da   : > { %v626_v35 = vpop.xlane.xlu1 %625 }
 0x2db   : > { %v627_v36 = vsub.f32 %v622_v26, %v626_v35  ;;  %v2166_v26 = vld [vmem:[%s2702_s7] sm:$0xff]  }
 0x2dd   : > { %v628_v37 = vmul.f32 1.442695, %v627_v36 }
 0x2df   : > { %2180 = vpow2.f32 %v628_v37  ;;  %v2168_v37 = vld [vmem:[%s2704_s9] sm:$0xff]  }
 0x2e2   : > { %v741_v38 = vpop.xlane.xlu0 %740 }
 0x2e3   : > { %v742_v39 = vsub.f32 %v738_v33, %v741_v38  ;;  %v1875_v33 = vld [vmem:[%s2701_s6] ss:$0 sm:$0xff]  ;;  %v2169_v38 = vld [vmem:[%s2704_s9 + $0x8] sm:$0xff]  }
 0x2e5   : > { %v743_v40 = vmul.f32 1.442695, %v742_v39  ;;  %v1876_v39 = vld [vmem:[%s2703_s8] ss:$0 sm:$0xff] }
 0x2e7   : > { %2182 = vpow2.f32 %v743_v40 }
 0x2e9   : > { %v2181_v41 = vpop.eup %2180 }
 0x2ea   : > { %v630_v42 = vsel %vm623_vm4, %v2181_v41, 0.0 }
 0x2eb   : > { %631 = vadd.xlane.f32.xlu0 %v630_v42 }
 0x2f1   : > { %v2183_v43 = vpop.eup %2182 }
 0x2f2   : > { %v745_v44 = vsel %vm623_vm4, %v2183_v43, 0.0 }
 0x2f3   : > { %746 = vadd.xlane.f32.xlu1 %v745_v44 }
 0x301   : > { %636 = vrot.lane.b32.xlu0 %v570_v10, %s2712_s30  ;;  %s2724_s30 = smov 96  }
 0x304   : > { %751 = vrot.lane.b32.xlu1 %v570_v10, %s2711_s16  ;;  %s2725_s16 = smov 112  }
 0x378   : > { %v632_v45 = vpop.xlane.xlu0 %631 }
 0x379   : > { %2184 = vrcp.f32 %v632_v45 }
 0x37c   : > { %v637_v46 = vpop.permute.xlu0 %636 }
 0x37d   : > { %v644_v47 = vsel %vm642_vm5, %v637_v46, 0 }
 0x37e   : > { %2003 = vmatpush3.bf16.msra.mxu0 %v644_v47  ;;  %v1880_v47 = vld [vmem:[%s2705_s10] ss:$0 sm:$0xff] }
 0x37f   : > { %2014 = vmatprep.subr.bf16.mxu0 %v2268_v1 }
 0x380   : > { %v747_v48 = vpop.xlane.xlu1 %746 }
 0x381   : > { %2186 = vrcp.f32 %v747_v48 }
 0x383   : > { %v2185_v49 = vpop.eup %2184 }
 0x384   : > { %v634_v50 = vmul.f32 %v2185_v49, %v2181_v41  ;;  %v752_v51 = vpop.permute.xlu1 %751 }
 0x385   : > { %v757_v53 = vsel %vm642_vm5, %v752_v51, 0 }
 0x386   : > { %v635_v52 = vpack.c.bf16 %v634_v50, %v634_v50 }
 0x388   : > { %2005 = vmatmul.mubr.msk.bf16.vlgmr.msra.gmra.mrb[4].mxu0 %vm638_vm6, %v635_v52 }
 0x389   : > { %2015 = vmatpush3.bf16.msra.mxu0 %v757_v53  ;;  %2016 = vmatprep.mubr.msk.bf16.mxu0 %vm2269_vm0, %v2268_v1 }
 0x38a   : > { %2026 = vmatprep.subr.bf16.mxu0 %v2268_v1 }
 0x38b   : > { %v2187_v54 = vpop.eup %2186 }
 0x38c   : > { %v749_v55 = vmul.f32 %v2187_v54, %v2183_v43 }
 0x38e   : > { %v750_v56 = vpack.c.bf16 %v749_v55, %v749_v55 }
 0x390   : > { %2017 = vmatmul.mubr.msk.bf16.vlgmr.msra.gmra.mrb[8].mxu0 %vm638_vm6, %v750_v56 }
 0x391   : > { %2028 = vmatprep.mubr.msk.bf16.mxu0 %vm2269_vm0, %v2268_v1  ;;  %2027 = vmatpush3.bf16.msra.mxu0 %v2164_v57 }
 0x392   : > { %2040 = vmatprep.subr.bf16.mxu0 %v2268_v1 }
 0x45b   : > { %v680_v59 = vpop.f32.mrb[4].mxu0 }
 0x45c   : > { %v686_v60 = vpack.c.bf16 %v680_v59, %v680_v59  ;;  %v2006_v61 = vpop.f32.mrb[5].mxu0 }
 0x45d   : > { %v683_v62 = vpop.f32.mrb[6].mxu0  ;;  %v2171_v61 = vld [vmem:[%s2721_s1 + $0x18] sm:$0xff]  }
 0x45e   : > { %v2007_v63 = vpop.f32.mrb[7].mxu0  ;;  %2029 = vmatmul.mubr.msk.bf16.vlgmr.msra.gmra.mrb[12].mxu0 %vm574_vm2, %v686_v60  ;;  %v2170_v60 = vld [vmem:[%s2721_s1 + $0x10] sm:$0xff]   ;;  %s1940_s1 = sshll.u32 %s2377_s22, 6 }
 0x45f   : > { %2044 = vmatprep.mubr.msk.bf16.mxu0 %vm2269_vm0, %v2268_v1  ;;  %2041 = vmatpush3.bf16.msra.mxu0 %v2168_v37 }
 0x460   : > { %2042 = vmatprep.subr.bf16.mxu0 %v2268_v1 }
 0x463   : > { %v793_v0 = vpop.f32.mrb[8].mxu0  ;;  %2043 = vmatpush3.bf16.msra.mxu0 %v2169_v38 }
 0x464   : > { %v799_v2 = vpack.c.bf16 %v793_v0, %v793_v0  ;;  %v2018_v4 = vpop.f32.mrb[9].mxu0  ;;  %2056 = vmatprep.subr.bf16.mxu0 %v2268_v1 }
 0x465   : > { %v796_v5 = vpop.f32.mrb[10].mxu0  ;;  %v1884_v4 = vld [vmem:[%s2706_s11] ss:$0 sm:$0xff] }
 0x466   : > { %v2019_v6 = vpop.f32.mrb[11].mxu0  ;;  %2023 = vmatmul.mubr.msk.bf16.vlgmr.msra.gmra.mrb[8].mxu1 %vm574_vm2, %v799_v2 }
 0x467   : > { %2036 = vmatprep.mubr.msk.bf16.mxu1 %vm2269_vm0, %v2268_v1  ;;  %2033 = vmatpush3.bf16.msra.mxu1 %v2166_v26  ;;  %v1885_v6 = vld [vmem:[%s2707_s12] ss:$0 sm:$0xff] }
 0x468   : > { %2034 = vmatprep.subr.bf16.mxu1 %v2268_v1 }
 0x46b   : > { %2035 = vmatpush3.bf16.msra.mxu1 %v2167_v27 }
 0x46c   : > { %2048 = vmatprep.subr.bf16.mxu1 %v2268_v1 }
 0x531   : > { %v892_v7 = vpop.f32.mrb[12].mxu0 }
 0x532   : > { %v2030_v8 = vpop.f32.mrb[13].mxu0 }
 0x533   : > { %v895_v9 = vpop.f32.mrb[14].mxu0 }
 0x534   : > { %v2031_v10 = vpop.f32.mrb[15].mxu0 }
 0x535   : > { %v1891_v10 = vld [vmem:[%s2723_s2 + $0x1] ss:$0 sm:$0xff]  ;;  %s2653_s2 = scalar_lea.hbm %s2710_s15, %s1940_s1 }
 0x539   : > { %v843_v11 = vpop.f32.mrb[8].mxu1 }
 0x53a   : > { %v893_v13 = vadd.f32 %v892_v7, %v843_v11  ;;  %v2024_v14 = vpop.f32.mrb[9].mxu1 }
 0x53b   : > { %v846_v15 = vpop.f32.mrb[10].mxu1 }
 0x53c   : > { %v905_v16 = vadd.f32 %v1873_v12, %v893_v13  ;;  %v2025_v17 = vpop.f32.mrb[11].mxu1 }
 0x53e   : > { %v906_v18 = vadd.f32 %v905_v16, %v2423_v3 }
 0x540   : > { %v910_v19 = vsel %vm909_vm7, %v906_v18, 0.0 }
 0x541   : > { %911 = vadd.xlane.f32.xlu1 %v910_v19 }
 0x5ce   : > { %v912_v20 = vpop.xlane.xlu1 %911 }
 0x5cf   : > { %v914_v22 = vmul.f32 0.03125, %v912_v20 }
 0x5d1   : > { %v915_v23 = vsub.f32 %v906_v18, %v914_v22 }
 0x5d3   : > { %v916_v24 = vmul.f32 %v915_v23, %v915_v23 }
 0x5d5   : > { %v917_v25 = vsel %vm909_vm7, %v916_v24, 0.0 }
 0x5d6   : > { %918 = vadd.xlane.f32.xlu0 %v917_v25 }
 0x663   : > { %v919_v3 = vpop.xlane.xlu0 %918 }
 0x664   : > { %v920_v28 = vmul.f32 0.03125, %v919_v3 }
 0x666   : > { %v921_v29 = vadd.f32 1e-05, %v920_v28 }
 0x668   : > { %2188 = vrsqrt.f32 %v921_v29 }
 0x672   : > { %v2189_v30 = vpop.eup %2188 }
 0x673   : > { %v923_v32 = vmul.f32 %v2189_v30, %v915_v23 }
 0x675   : > { %v930_v34 = vmul.f32 %v1874_v31, %v923_v32 }
 0x677   : > { %v937_v35 = vadd.f32 %v1875_v33, %v930_v34 }
 0x679   : > { %v938_v36 = vpack.c.bf16 %v937_v35, %v937_v35 }
 0x67b   : > { %2037 = vmatmul.mubr.msk.bf16.vlgmr.msra.gmra.mrb[12].mxu1 %vm522_vm1, %v938_v36 }
 0x67c   : > { %2052 = vmatprep.mubr.msk.bf16.mxu1 %vm2269_vm0, %v2268_v1  ;;  %2049 = vmatpush3.bf16.msra.mxu1 %v2170_v60 }
 0x67d   : > { %2050 = vmatprep.subr.bf16.mxu1 %v2268_v1 }
 0x680   : > { %2051 = vmatpush3.bf16.msra.mxu1 %v2171_v61 }
 0x681   : > { %2062 = vmatprep.subr.bf16.mxu1 %v2268_v1 }
 0x74e   : > { %v999_v40 = vpop.f32.mrb[12].mxu1 }
 0x74f   : > { %v1000_v41 = vadd.f32 %v1876_v39, %v999_v40  ;;  %v2038_v42 = vpop.f32.mrb[13].mxu1 }
 0x750   : > { %v1002_v43 = vpop.f32.mrb[14].mxu1 }
 0x751   : > { %v1005_v44 = vmax.f32 %v1000_v41, 0.0  ;;  %v2039_v45 = vpop.f32.mrb[15].mxu1 }
 0x753   : > { %v1006_v46 = vpack.c.bf16 %v1005_v44, %v1005_v44 }
 0x755   : > { %2045 = vmatmul.mubr.msk.bf16.vlgmr.msra.gmra.mrb[16].mxu0 %vm522_vm1, %v1006_v46 }
 0x756   : > { %2058 = vmatprep.mubr.msk.bf16.mxu0 %vm2269_vm0, %v2268_v1 }
 0x828   : > { %v1067_v48 = vpop.f32.mrb[16].mxu0 }
 0x829   : > { %v1068_v49 = vadd.f32 %v1880_v47, %v1067_v48  ;;  %v2046_v50 = vpop.f32.mrb[17].mxu0 }
 0x82a   : > { %v1070_v51 = vpop.f32.mrb[18].mxu0 }
 0x82b   : > { %v2047_v52 = vpop.f32.mrb[19].mxu0  ;;  %v1073_v53 = vadd.f32 %v1068_v49, %v937_v35 }
 0x82d   : > { %v1076_v54 = vsel %vm909_vm7, %v1073_v53, 0.0 }
 0x82e   : > { %1077 = vadd.xlane.f32.xlu0 %v1076_v54 }
 0x8bb   : > { %v1078_v55 = vpop.xlane.xlu0 %1077 }
 0x8bc   : > { %v1079_v56 = vmul.f32 0.03125, %v1078_v55 }
 0x8be   : > { %v1080_v57 = vsub.f32 %v1073_v53, %v1079_v56 }
 0x8c0   : > { %v1081_v58 = vmul.f32 %v1080_v57, %v1080_v57 }
 0x8c2   : > { %v1082_v59 = vsel %vm909_vm7, %v1081_v58, 0.0  ;;  %v2173_v58 = vld [vmem:[%s2698_s3 + $0x18] sm:$0xff]  }
 0x8c3   : > { %1083 = vadd.xlane.f32.xlu1 %v1082_v59 }
 0x950   : > { %v1084_v62 = vpop.xlane.xlu1 %1083 }
 0x951   : > { %v1085_v63 = vmul.f32 0.03125, %v1084_v62 }
 0x953   : > { %v1086_v0 = vadd.f32 1e-05, %v1085_v63 }
 0x955   : > { %2190 = vrsqrt.f32 %v1086_v0 }
 0x95f   : > { %v2191_v2 = vpop.eup %2190 }
 0x960   : > { %v1088_v5 = vmul.f32 %v2191_v2, %v1080_v57  ;;  %v2172_v57 = vld [vmem:[%s2698_s3 + $0x10] sm:$0xff]  }
 0x962   : > { %v1095_v7 = vmul.f32 %v1884_v4, %v1088_v5 }
 0x964   : > { %v2537_v8 = vadd.f32 %v1885_v6, %v1095_v7 }
 0x966   : > { %v1103_v9 = vpack.c.bf16 %v2537_v8, %v2537_v8 }
 0x968   : > { %2053 = vmatmul.mubr.msk.bf16.vlgmr.msra.gmra.mrb[16].mxu1 %vm522_vm1, %v1103_v9 }
 0x969   : > { %2064 = vmatprep.mubr.msk.bf16.mxu1 %vm2269_vm0, %v2268_v1 }
 0xa3b   : > { %v1166_v11 = vpop.f32.mrb[16].mxu1 }
 0xa3c   : > { %v1167_v12 = vadd.f32 %v1891_v10, %v1166_v11  ;;  %v2054_v13 = vpop.f32.mrb[17].mxu1 }
 0xa3d   : > { %v1169_v14 = vpop.f32.mrb[18].mxu1  ;;  %v1908_v13 = vld [vmem:[%s2699_s4 + $0x1] ss:$0 sm:$0xff] }
 0xa3e   : > { %v1177_v15 = vpack.c.bf16 %v1167_v12, %v1167_v12  ;;  %v2055_v16 = vpop.f32.mrb[19].mxu1 }
 0xa40   : > { %1292 = vrot.lane.b32.xlu1 %v1177_v15, %s2272_s26  ;;  %1179 = vrot.lane.b32.xlu0 %v1177_v15, %s2724_s30  ;;  %s2726_s26 = smov 64   ;;  %s1859_s30 = sshll.u32 %s483_s23, 2 }
 0xa44   : > { %1290 = vrot.lane.b32.xlu1 %v1177_v15, %s2725_s16 }
 0xab2   : > { %v1180_v17 = vpop.permute.xlu0 %1179  ;;  %v1293_v19 = vpop.permute.xlu1 %1292 }
 0xab3   : > { %v1185_v18 = vsel %vm574_vm2, %v1180_v17, 0  ;;  %v1298_v20 = vsel %vm574_vm2, %v1293_v19, 0 }
 0xab4   : > { %2057 = vmatpush3.bf16.xpose.msra.mxu0 %v1185_v18 }
 0xab5   : > { %2068 = vmatprep.subr.bf16.mxu0 %v2268_v1 }
 0xab6   : > { %v1291_v22 = vpop.permute.xlu1 %1290 }
 0xabb   : > { %2059 = vmatmul.mubr.msk.bf16.vlgmr.msra.gmra.mrb[20].mxu0 %vm574_vm2, %v1177_v15 }
 0xabc   : > { %2069 = vmatpush3.bf16.xpose.msra.mxu0 %v1298_v20  ;;  %2070 = vmatprep.mubr.msk.bf16.mxu0 %vm2269_vm0, %v2268_v1 }
 0xabd   : > { %2080 = vmatprep.subr.bf16.mxu0 %v2268_v1 }
 0xac3   : > { %2071 = vmatmul.mubr.msk.bf16.vlgmr.msra.gmra.mrb[24].mxu0 %vm574_vm2, %v1291_v22 }
 0xac4   : > { %2082 = vmatprep.mubr.msk.bf16.mxu0 %vm2269_vm0, %v2268_v1  ;;  %2081 = vmatpush3.bf16.msra.mxu0 %v2173_v58 }
 0xac5   : > { %2092 = vmatprep.subr.bf16.mxu0 %v2268_v1 }
 0xb8e   : > { %v1221_v23 = vpop.f32.mrb[20].mxu0 }
 0xb8f   : > { %v1227_v24 = vmul.f32 0.25, %v1221_v23  ;;  %v2060_v25 = vpop.f32.mrb[21].mxu0 }
 0xb90   : > { %v1224_v26 = vpop.f32.mrb[22].mxu0 }
 0xb91   : > { %v2061_v27 = vpop.f32.mrb[23].mxu0  ;;  %v1228_v3 = vadd.f32 %v1227_v24, %v2447_v21 }
 0xb92   : > { %v2174_v27 = vld [vmem:[%s2702_s7 + $0x10] sm:$0xff]  }
 0xb93   : > { %v1229_v28 = vsel %vm623_vm4, %v1228_v3, -inf }
 0xb94   : > { %1230 = vmax.xlane.f32.xlu0 %v1229_v28 }
 0xb96   : > { %v1334_v29 = vpop.f32.mrb[24].mxu0 }
 0xb97   : > { %v1340_v30 = vmul.f32 0.25, %v1334_v29  ;;  %v2072_v31 = vpop.f32.mrb[25].mxu0 }
 0xb98   : > { %v1337_v32 = vpop.f32.mrb[26].mxu0  ;;  %v1911_v31 = vld [vmem:[%s2700_s5 + $0x1] ss:$0 sm:$0xff] }
 0xb99   : > { %v2073_v33 = vpop.f32.mrb[27].mxu0  ;;  %v1341_v34 = vadd.f32 %v1340_v30, %v2447_v21 }
 0xb9a   : > { %v1912_v33 = vld [vmem:[%s2701_s6 + $0x1] ss:$0 sm:$0xff] }
 0xb9b   : > { %v1342_v35 = vsel %vm623_vm4, %v1341_v34, -inf }
 0xb9c   : > { %1343 = vmax.xlane.f32.xlu1 %v1342_v35 }
 0xbad   : > { %1241 = vrot.lane.b32.xlu1 %v1177_v15, %s2726_s26  ;;  %s485_s26 = scalar_lea.vmem [#allocation2], %s1859_s30  ;;  %s2275_s30 = smov [#allocation2]  }
 0xbae   : > { %s2208_s16 = sshll.u32 %s2275_s30, 4  ;;  %s2209_s16 = int_to_ptr.vmem [resolvable:$false] %s2208_s16 }
 0xbaf   : > { %s2210_s25 = scalar_lea.vmem %s2209_s16, 128 }
 0xc21   : > { %v1231_v36 = vpop.xlane.xlu0 %1230 }
 0xc22   : > { %v1232_v37 = vsub.f32 %v1228_v3, %v1231_v36  ;;  %v2175_v3 = vld [vmem:[%s2702_s7 + $0x18] sm:$0xff]  }
 0xc24   : > { %v1233_v38 = vmul.f32 1.442695, %v1232_v37  ;;  %v2176_v37 = vld [vmem:[%s2704_s9 + $0x10] sm:$0xff]  }
 0xc26   : > { %2192 = vpow2.f32 %v1233_v38  ;;  %v2177_v38 = vld [vmem:[%s2704_s9 + $0x18] sm:$0xff]  }
 0xc29   : > { %v1344_v39 = vpop.xlane.xlu1 %1343 }
 0xc2a   : > { %v1345_v40 = vsub.f32 %v1341_v34, %v1344_v39  ;;  %v1918_v39 = vld [vmem:[%s2703_s8 + $0x1] ss:$0 sm:$0xff] }
 0xc2c   : > { %v1346_v41 = vmul.f32 1.442695, %v1345_v40 }
 0xc2d   : > { %v1242_v42 = vpop.permute.xlu1 %1241 }
 0xc2e   : > { %2194 = vpow2.f32 %v1346_v41  ;;  %v1247_v43 = vsel %vm642_vm5, %v1242_v42, 0 }
 0xc2f   : > { %2063 = vmatpush3.bf16.msra.mxu1 %v1247_v43 }
 0xc30   : > { %v2193_v44 = vpop.eup %2192  ;;  %2074 = vmatprep.subr.bf16.mxu1 %v2268_v1 }
 0xc31   : > { %v1235_v21 = vsel %vm623_vm4, %v2193_v44, 0.0 }
 0xc32   : > { %1236 = vadd.xlane.f32.xlu0 %v1235_v21 }
 0xc38   : > { %v2195_v45 = vpop.eup %2194 }
 0xc39   : > { %v1348_v46 = vsel %vm623_vm4, %v2195_v45, 0.0 }
 0xc3a   : > { %1349 = vadd.xlane.f32.xlu0 %v1348_v46  ;;  %v1927_v46 = vld [vmem:[%s2705_s10 + $0x1] ss:$0 sm:$0xff] }
 0xc50   : > { %1354 = vrot.lane.b32.xlu0 %v1177_v15, %s2727_s27  ;;  %s1796_s27 = sshll.u32 %s485_s26, 4  ;;  %s2655_s27 = int_to_ptr.vmem [resolvable:$true] %s1796_s27 }
 0xc51   : > { %s2204_s22 = scalar_lea.vmem %s2655_s27, 64  ;;  %p2211_p0 = scmp.lt.s32.totalorder %s2655_s27, %s2209_s16 }
 0xc52   : > { %p2205_p11 = scmp.ne.s32.totalorder %s2655_s27, %s2204_s22  ;;  %p2212_p1 = scmp.lt.s32.totalorder %s2210_s25, %s2204_s22 }
 0xc54   : > { %p2206_p12 = pnand %p2205_p11, %p2394_p5  ;;  %p2213_p2 = por %p2212_p1, %p2211_p0 }
 0xc56   : > { %p2207_p13 = pneg %p2206_p12 }
 0xc58   : > { %p2214_p3 = pnand %p2213_p2, %p2207_p13 }
 0xcbf   : > { %v1237_v47 = vpop.xlane.xlu0 %1236 }
 0xcc0   : > { %2196 = vrcp.f32 %v1237_v47 }
 0xcc7   : > { %v1350_v48 = vpop.xlane.xlu0 %1349 }
 0xcc8   : > { %2198 = vrcp.f32 %v1350_v48 }
 0xcca   : > { %v2197_v49 = vpop.eup %2196 }
 0xccb   : > { %v1239_v50 = vmul.f32 %v2197_v49, %v2193_v44  ;;  %v1355_v51 = vpop.permute.xlu0 %1354 }
 0xccc   : > { %v1360_v53 = vsel %vm642_vm5, %v1355_v51, 0 }
 0xccd   : > { %v1240_v52 = vpack.c.bf16 %v1239_v50, %v1239_v50 }
 0xccf   : > { %2065 = vmatmul.mubr.msk.bf16.vlgmr.msra.gmra.mrb[20].mxu1 %vm638_vm6, %v1240_v52 }
 0xcd0   : > { %2075 = vmatpush3.bf16.msra.mxu1 %v1360_v53  ;;  %2076 = vmatprep.mubr.msk.bf16.mxu1 %vm2269_vm0, %v2268_v1 }
 0xcd1   : > { %2086 = vmatprep.subr.bf16.mxu1 %v2268_v1 }
 0xcd2   : > { %v2199_v54 = vpop.eup %2198 }
 0xcd3   : > { %v1352_v55 = vmul.f32 %v2199_v54, %v2195_v45 }
 0xcd5   : > { %v1353_v56 = vpack.c.bf16 %v1352_v55, %v1352_v55 }
 0xcd7   : > { %2077 = vmatmul.mubr.msk.bf16.vlgmr.msra.gmra.mrb[24].mxu1 %vm638_vm6, %v1353_v56 }
 0xcd8   : > { %2088 = vmatprep.mubr.msk.bf16.mxu1 %vm2269_vm0, %v2268_v1  ;;  %2087 = vmatpush3.bf16.msra.mxu1 %v2172_v57 }
 0xcd9   : > { %2100 = vmatprep.subr.bf16.mxu1 %v2268_v1 }
 0xda2   : > { %v1283_v59 = vpop.f32.mrb[20].mxu1 }
 0xda3   : > { %v1289_v60 = vpack.c.bf16 %v1283_v59, %v1283_v59  ;;  %v2066_v61 = vpop.f32.mrb[21].mxu1  ;;  %v2178_v59 = vld [vmem:[%s2708_s13] sm:$0xff]  }
 0xda4   : > { %v1286_v62 = vpop.f32.mrb[22].mxu1 }
 0xda5   : > { %v2067_v63 = vpop.f32.mrb[23].mxu1  ;;  %2089 = vmatmul.mubr.msk.bf16.vlgmr.msra.gmra.mrb[28].mxu1 %vm574_vm2, %v1289_v60  ;;  %v2179_v60 = vld [vmem:[%s2708_s13 + $0x8] sm:$0xff]  }
 0xda6   : > { %2104 = vmatprep.mubr.msk.bf16.mxu1 %vm2269_vm0, %v2268_v1  ;;  %2101 = vmatpush3.bf16.msra.mxu1 %v2176_v37 }
 0xda7   : > { %2102 = vmatprep.subr.bf16.mxu1 %v2268_v1 }
 0xdaa   : > { %v1396_v0 = vpop.f32.mrb[24].mxu1  ;;  %2103 = vmatpush3.bf16.msra.mxu1 %v2177_v38 }
 0xdab   : > { %v1402_v2 = vpack.c.bf16 %v1396_v0, %v1396_v0  ;;  %v2078_v4 = vpop.f32.mrb[25].mxu1 }
 0xdac   : > { %v1399_v5 = vpop.f32.mrb[26].mxu1 }
 0xdad   : > { %v2079_v6 = vpop.f32.mrb[27].mxu1  ;;  %2083 = vmatmul.mubr.msk.bf16.vlgmr.msra.gmra.mrb[28].mxu0 %vm574_vm2, %v1402_v2  ;;  %v1933_v2 = vld [vmem:[%s2706_s11 + $0x1] ss:$0 sm:$0xff] }
 0xdae   : > { %2096 = vmatprep.mubr.msk.bf16.mxu0 %vm2269_vm0, %v2268_v1  ;;  %2093 = vmatpush3.bf16.msra.mxu0 %v2174_v27  ;;  %v1934_v5 = vld [vmem:[%s2707_s12 + $0x1] ss:$0 sm:$0xff] }
 0xdaf   : > { %2094 = vmatprep.subr.bf16.mxu0 %v2268_v1 }
 0xdb2   : > { %2095 = vmatpush3.bf16.msra.mxu0 %v2175_v3 }
 0xdb3   : > { %2108 = vmatprep.subr.bf16.mxu0 %v2268_v1 }
 0xe78   : > { %v1495_v7 = vpop.f32.mrb[28].mxu1 }
 0xe79   : > { %v2090_v9 = vpop.f32.mrb[29].mxu1 }
 0xe7a   : > { %v1498_v10 = vpop.f32.mrb[30].mxu1 }
 0xe7b   : > { %v2091_v11 = vpop.f32.mrb[31].mxu1 }
 0xe80   : > { %v1446_v12 = vpop.f32.mrb[28].mxu0 }
 0xe81   : > { %v1496_v14 = vadd.f32 %v1495_v7, %v1446_v12  ;;  %v2084_v15 = vpop.f32.mrb[29].mxu0 }
 0xe82   : > { %v1449_v16 = vpop.f32.mrb[30].mxu0 }
 0xe83   : > { %v1509_v17 = vadd.f32 %v1908_v13, %v1496_v14  ;;  %v2085_v18 = vpop.f32.mrb[31].mxu0 }
 0xe85   : > { %v1510_v19 = vadd.f32 %v1509_v17, %v2537_v8 }
 0xe87   : > { %v1515_v20 = vsel %vm909_vm7, %v1510_v19, 0.0 }
 0xe88   : > { %1516 = vadd.xlane.f32.xlu1 %v1515_v20 }
 0xf15   : > { %v1517_v22 = vpop.xlane.xlu1 %1516 }
 0xf16   : > { %v1518_v23 = vmul.f32 0.03125, %v1517_v22 }
 0xf18   : > { %v1519_v24 = vsub.f32 %v1510_v19, %v1518_v23 }
 0xf1a   : > { %v1520_v25 = vmul.f32 %v1519_v24, %v1519_v24 }
 0xf1c   : > { %v1521_v26 = vsel %vm909_vm7, %v1520_v25, 0.0 }
 0xf1d   : > { %1522 = vadd.xlane.f32.xlu0 %v1521_v26 }
 0xfaa   : > { %v1523_v8 = vpop.xlane.xlu0 %1522 }
 0xfab   : > { %v1524_v28 = vmul.f32 0.03125, %v1523_v8 }
 0xfad   : > { %v1525_v29 = vadd.f32 1e-05, %v1524_v28 }
 0xfaf   : > { %2200 = vrsqrt.f32 %v1525_v29 }
 0xfb9   : > { %v2201_v30 = vpop.eup %2200 }
 0xfba   : > { %v1527_v32 = vmul.f32 %v2201_v30, %v1519_v24 }
 0xfbc   : > { %v1534_v34 = vmul.f32 %v1911_v31, %v1527_v32 }
 0xfbe   : > { %v1541_v35 = vadd.f32 %v1912_v33, %v1534_v34 }
 0xfc0   : > { %v1542_v36 = vpack.c.bf16 %v1541_v35, %v1541_v35 }
 0xfc2   : > { %2097 = vmatmul.mubr.msk.bf16.vlgmr.msra.gmra.mrb[32].mxu0 %vm522_vm1, %v1542_v36 }
 0xfc3   : > { %2112 = vmatprep.mubr.msk.bf16.mxu0 %vm2269_vm0, %v2268_v1  ;;  %2109 = vmatpush3.bf16.msra.mxu0 %v2178_v59 }
 0xfc4   : > { %2110 = vmatprep.subr.bf16.mxu0 %v2268_v1  ;;  %v1935_v1 = vld [vmem:[%s2709_s14] ss:$0 sm:$0xff] }
 0xfc7   : > { %2111 = vmatpush3.bf16.msra.mxu0 %v2179_v60 }
0x1095   : > { %v1605_v40 = vpop.f32.mrb[32].mxu0 }
0x1096   : > { %v1606_v41 = vadd.f32 %v1918_v39, %v1605_v40  ;;  %v2098_v42 = vpop.f32.mrb[33].mxu0 }
0x1097   : > { %v1608_v43 = vpop.f32.mrb[34].mxu0 }
0x1098   : > { %v1611_v44 = vmax.f32 %v1606_v41, 0.0  ;;  %v2099_v21 = vpop.f32.mrb[35].mxu0 }
0x109a   : > { %v1612_v45 = vpack.c.bf16 %v1611_v44, %v1611_v44 }
0x109c   : > { %2105 = vmatmul.mubr.msk.bf16.vlgmr.msra.gmra.mrb[32].mxu1 %vm522_vm1, %v1612_v45 }
0x116f   : > { %v1675_v47 = vpop.f32.mrb[32].mxu1 }
0x1170   : > { %v1676_v48 = vadd.f32 %v1927_v46, %v1675_v47  ;;  %v2106_v49 = vpop.f32.mrb[33].mxu1 }
0x1171   : > { %v1678_v50 = vpop.f32.mrb[34].mxu1 }
0x1172   : > { %v2107_v51 = vpop.f32.mrb[35].mxu1  ;;  %v1681_v52 = vadd.f32 %v1676_v48, %v1541_v35 }
0x1174   : > { %v1686_v53 = vsel %vm909_vm7, %v1681_v52, 0.0 }
0x1175   : > { %1687 = vadd.xlane.f32.xlu1 %v1686_v53 }
0x1202   : > { %v1688_v54 = vpop.xlane.xlu1 %1687 }
0x1203   : > { %v1689_v55 = vmul.f32 0.03125, %v1688_v54 }
0x1205   : > { %v1690_v56 = vsub.f32 %v1681_v52, %v1689_v55 }
0x1207   : > { %v1691_v57 = vmul.f32 %v1690_v56, %v1690_v56 }
0x1209   : > { %v1692_v58 = vsel %vm909_vm7, %v1691_v57, 0.0 }
0x120a   : > { %1693 = vadd.xlane.f32.xlu0 %v1692_v58 }
0x1297   : > { %v1694_v61 = vpop.xlane.xlu0 %1693 }
0x1298   : > { %v1695_v62 = vmul.f32 0.03125, %v1694_v61 }
0x129a   : > { %v1696_v63 = vadd.f32 1e-05, %v1695_v62 }
0x129c   : > { %2202 = vrsqrt.f32 %v1696_v63 }
0x12a6   : > { %v2203_v0 = vpop.eup %2202 }
0x12a7   : > { %v1698_v4 = vmul.f32 %v2203_v0, %v1690_v56 }
0x12a9   : > { %v1705_v6 = vmul.f32 %v1933_v2, %v1698_v4 }
0x12ab   : > { %v1712_v7 = vadd.f32 %v1934_v5, %v1705_v6 }
0x12ad   : > { %v1713_v9 = vpack.c.bf16 %v1712_v7, %v1712_v7 }
0x12af   : > { %2113 = vmatmul.mubr.msk.bf16.vlgmr.msra.gmra.mrb[36].mxu0 %vm522_vm1, %v1713_v9 }
0x1382   : > { %v1774_v10 = vpop.f32.mrb[36].mxu0 }
0x1383   : > { %v1775_v11 = vadd.f32 %v1935_v1, %v1774_v10  ;;  %v2114_v12 = vpop.f32.mrb[37].mxu0 }
0x1384   : > { %v1777_v13 = vpop.f32.mrb[38].mxu0 }
0x1385   : > { %v2115_v14 = vpop.f32.mrb[39].mxu0  ;;  %1781 = vst.msk [vmem:[%s485_s26] sm:$0xf] %vm1780_vm8, %v1775_v11 }
0x1386   : > { %2217 = shalt.err (!%p2214_p3)
}
0x1387   : > { %s2218_s1 = scalar_lea.hbm %s2653_s2, 64  ;;  %s2222_s17 = scalar_lea.hbm %s2710_s15, 128 }
0x1388   : > { %p2219_p4 = scmp.ne.s32.totalorder %s2653_s2, %s2218_s1  ;;  %p2223_p9 = scmp.lt.u32.totalorder %s2653_s2, %s2710_s15 }
0x1389   : > { %p2224_p10 = scmp.lt.u32.totalorder %s2222_s17, %s2218_s1  ;;  %p2226_p12 = scmp.lt.u32.totalorder %s2218_s1, %s2653_s2 }
0x138a   : > { %p2220_p7 = pnand %p2219_p4, %p2394_p5 }
0x138b   : > { %p2225_p11 = por %p2224_p10, %p2223_p9 }
0x138c   : > { %p2221_p8 = pneg %p2220_p7 }
0x138d   : > { %p2227_p13 = por %p2226_p12, %p2225_p11 }
0x138f   : > { %p2228_p0 = pnand %p2227_p13, %p2221_p8 }
0x1391   : > { %2231 = shalt.err (!%p2228_p0)
}
0x1392   : > { %2116 = dma.vmem_to_hbm [thread:$0]  (%p2394_p5), %s2655_s27, 64, %s2653_s2, %s1783_s0  }
0x1393 PF: > { %p2122_p1 = scmp.ge.s32.totalorder %s2266_s21, 2  ;;  %s1808_s22 = sand.u32 1, %s2254_s18  }
0x1394   : > { %s1809_s25 = scalar_lea.sflag [#allocation3], %s1808_s22 }
0x1395   : > { %p2119_p2 = pnand %p2122_p1, %p2398_p6 }
0x1397   : > { %2249 = dma.done.wait (!%p2119_p2), %s1809_s25, 64  }
0x1398   : > { %2251 = vsyncadd (!%p2119_p2), %s1809_s25, 4294967232  ;;  %s2728_s1 = sld [smem:[#allocation5_spill]]  ;;  %p25_p3 = scmp.ge.s32.totalorder %s2381_s24, 4  }
0x1399   : > { %s2729_s18 = smov %s2258_s19  ;;  %s2730_s19 = smov %s2262_s20 }
0x139a   : > { %s2732_s21 = smov %s2381_s24  ;;  %27 = sbr.rel (!%p25_p3) target bundleno = 7 (0x7), region = 127 }
0x139e   : > { %s2731_s20 = smov %s2728_s1 }
0x13a1   :  { %1814 = vsyncpa [#allocation3], 1 }
0x13a2   :  { %1816 = vsyncpa [#allocation3 + $0x1], 1 }

</bundles_post_ra>
